<compile_context>
chip_gen: v5e
topology: v5e:2x2
jax: 0.10.0
libtpu: 0.0.40
codegen_flags: <defaults>
</compile_context>

<pallas_src>
import jax
import jax.numpy as jnp
from jax import lax
from jax.experimental import pallas as pl
from jax.experimental.pallas import tpu as pltpu


# ----------------------------- in-kernel helpers -----------------------------

def _im2col_3x3(src, H, W):
    """Build (H*W, 9*C) im2col patches from a padded (H+2, W+2, C) ref or value."""
    C = src.shape[-1]
    cols = [src[dy:dy + H, dx:dx + W, :].reshape(H * W, C)
            for dy in range(3) for dx in range(3)]
    return jnp.concatenate(cols, axis=1)


def _top_pool(y, H, W):
    """Reverse cumulative max over H on a (H*W, C) row-major (h*W + w) layout.
    Log-step doubling; shifts use pltpu.roll (XLU) + iota mask (no concat temporaries)."""
    row = lax.broadcasted_iota(jnp.int32, y.shape, 0)
    off = 1
    while off < H:
        # row r receives y[r + off*W]  (pltpu.roll == jnp.roll semantics)
        shifted = pltpu.roll(y, shift=H * W - off * W, axis=0)
        y = jnp.where(row < (H - off) * W, jnp.maximum(y, shifted), y)
        off *= 2
    return y


def _left_pool(y, H, W):
    """Reverse cumulative max over W on a (H*W, C) row-major layout."""
    row = lax.broadcasted_iota(jnp.int32, y.shape, 0)
    w_idx = row % W
    off = 1
    while off < W:
        shifted = pltpu.roll(y, shift=H * W - off, axis=0)   # row r <- y[r + off]
        y = jnp.where(w_idx < W - off, jnp.maximum(y, shifted), y)
        off *= 2
    return y


def _pad_hw(a, H, W):
    """Zero-pad a (H, W, C) value to (H+2, W+2, C) in VMEM (SAME padding for 3x3)."""
    C = a.shape[-1]
    zr = jnp.zeros((1, W, C), a.dtype)
    zc = jnp.zeros((H + 2, 1, C), a.dtype)
    a = jnp.concatenate([zr, a, zr], axis=0)
    return jnp.concatenate([zc, a, zc], axis=1)


# ----------------------------- kernel A: convs + corner pools -----------------

def _make_pool_branch_kernel(H, W, Cin, Cmid):
    def kernel(xp_ref, w1_ref, w2_ref, aff_ref, out_ref):
        # Shared im2col of the (padded) input x -- read once, used by both convs.
        patches = _im2col_3x3(xp_ref, H, W).astype(jnp.bfloat16)      # (H*W, 9*Cin)

        p1 = jnp.dot(patches, w1_ref[...], preferred_element_type=jnp.float32)
        p1 = jnp.maximum(p1 * aff_ref[0:1, :] + aff_ref[1:2, :], 0.0)  # p1_conv1 BN+ReLU
        p2 = jnp.dot(patches, w2_ref[...], preferred_element_type=jnp.float32)
        p2 = jnp.maximum(p2 * aff_ref[2:3, :] + aff_ref[3:4, :], 0.0)  # p2_conv1 BN+ReLU

        pools = _top_pool(p1, H, W) + _left_pool(p2, H, W)             # (H*W, Cmid) f32

        # Emit the pools already zero-padded (halo for the 3x3 conv in kernel B),
        # avoiding a wrapper-side jnp.pad pass over the largest intermediate.
        out_ref[...] = _pad_hw(pools.reshape(H, W, Cmid), H, W)

    return kernel


# ----------------------------- kernel B: head (p_conv1/bn + 1x1/bn + relu + conv2) ---

def _make_head_kernel(H, W, Cin, Cmid):
    def kernel(pools_ref, xp_ref, wp_ref, w1_ref, w2_ref, aff_ref, out_ref):
        # p_conv1 (3x3, Cmid -> Cin) + p_bn1, single im2col matmul on the MXU.
        patches = _im2col_3x3(pools_ref, H, W).astype(jnp.bfloat16)    # (H*W, 9*Cmid)
        p = jnp.dot(patches, wp_ref[...], preferred_element_type=jnp.float32)
        p = p * aff_ref[0:1, :] + aff_ref[1:2, :]

        # conv1 (1x1, Cin -> Cin) + bn1, reusing the interior of the same padded x.
        xin = xp_ref[1:H + 1, 1:W + 1, :].reshape(H * W, Cin).astype(jnp.bfloat16)
        q = jnp.dot(xin, w1_ref[...], preferred_element_type=jnp.float32)
        q = q * aff_ref[2:3, :] + aff_ref[3:4, :]

        r = jnp.maximum(p + q, 0.0)                                    # relu1, f32

        # conv2 (3x3, Cin -> Cin) + BN + ReLU; halo padded in VMEM, no HBM trip.
        r3 = _pad_hw(r.reshape(H, W, Cin), H, W)
        patches2 = _im2col_3x3(r3, H, W).astype(jnp.bfloat16)          # (H*W, 9*Cin)
        o = jnp.dot(patches2, w2_ref[...], preferred_element_type=jnp.float32)
        o = jnp.maximum(o * aff_ref[4:5, :] + aff_ref[5:6, :], 0.0)
        out_ref[...] = o.reshape(H, W, Cin)

    return kernel


# ----------------------------- full CornerPool forward ------------------------

def _imcol_weight(w):
    """(KH, KW, Ci, Co) -> (KH*KW*Ci, Co) bf16 (matches _im2col_3x3 column order)."""
    kh, kw, ci, co = w.shape
    return w.reshape(kh * kw * ci, co).astype(jnp.bfloat16)


def corner_pool_forward(x_nchw, params):
    x = jnp.transpose(x_nchw, (0, 2, 3, 1)).astype(jnp.float32)        # NCHW -> NHWC
    N, H, W, Cin = x.shape
    Hp, Wp = H + 2, W + 2
    Cmid = params["p1_conv1"][0].shape[-1]                             # 128

    # Pad x ONCE; reused by kernel A (3x3 halo) and kernel B (1x1 conv on its interior).
    xp = jnp.pad(x, ((0, 0), (1, 1), (1, 1), (0, 0)))

    w1, s1, b1 = params["p1_conv1"]
    w2, s2, b2 = params["p2_conv1"]
    w1r, w2r = _imcol_weight(w1), _imcol_weight(w2)
    aff_a = jnp.stack([s1, b1, s2, b2]).astype(jnp.float32)            # (4, Cmid)

    cparams = pltpu.CompilerParams(dimension_semantics=("parallel",),
                                   vmem_limit_bytes=32 * 1024 * 1024)

    pools_p = pl.pallas_call(
        _make_pool_branch_kernel(H, W, Cin, Cmid),
        out_shape=jax.ShapeDtypeStruct((N, Hp, Wp, Cmid), jnp.float32),
        grid=(N,),
        in_specs=[
            pl.BlockSpec((pl.Squeezed(), Hp, Wp, Cin), lambda n: (n, 0, 0, 0)),
            pl.BlockSpec(w1r.shape, lambda n: (0, 0)),
            pl.BlockSpec(w2r.shape, lambda n: (0, 0)),
            pl.BlockSpec(aff_a.shape, lambda n: (0, 0)),
        ],
        out_specs=pl.BlockSpec((pl.Squeezed(), Hp, Wp, Cmid), lambda n: (n, 0, 0, 0)),
        compiler_params=cparams,
    )(xp, w1r, w2r, aff_a)

    wp, sp, bp = params["p_conv1_bn1"]
    wc1, sc1, bc1 = params["conv1_bn1"]
    wc2, sc2, bc2 = params["conv2"]
    wpr = _imcol_weight(wp)                                            # (9*Cmid, Cin)
    w1x1 = wc1.reshape(Cin, Cin).astype(jnp.bfloat16)
    w2r2 = _imcol_weight(wc2)                                          # (9*Cin, Cin)
    aff_b = jnp.stack([sp, bp, sc1, bc1, sc2, bc2]).astype(jnp.float32)  # (6, Cin)

    out = pl.pallas_call(
        _make_head_kernel(H, W, Cin, Cmid),
        out_shape=jax.ShapeDtypeStruct((N, H, W, Cin), jnp.float32),
        grid=(N,),
        in_specs=[
            pl.BlockSpec((pl.Squeezed(), Hp, Wp, Cmid), lambda n: (n, 0, 0, 0)),
            pl.BlockSpec((pl.Squeezed(), Hp, Wp, Cin), lambda n: (n, 0, 0, 0)),
            pl.BlockSpec(wpr.shape, lambda n: (0, 0)),
            pl.BlockSpec(w1x1.shape, lambda n: (0, 0)),
            pl.BlockSpec(w2r2.shape, lambda n: (0, 0)),
            pl.BlockSpec(aff_b.shape, lambda n: (0, 0)),
        ],
        out_specs=pl.BlockSpec((pl.Squeezed(), H, W, Cin), lambda n: (n, 0, 0, 0)),
        compiler_params=cparams,
    )(pools_p, xp, wpr, w1x1, w2r2, aff_b)

    return jnp.transpose(out, (0, 3, 1, 2))                            # back to NCHW


# ----------------------------- deterministic params ---------------------------

def make_params(key, dim):
    def bn_fold(k, c, eps=1e-5):
        k1, k2, k3, k4 = jax.random.split(k, 4)
        gamma = 1.0 + 0.1 * jax.random.normal(k1, (c,), jnp.float32)
        beta = 0.05 * jax.random.normal(k2, (c,), jnp.float32)
        mean = 0.1 * jax.random.normal(k3, (c,), jnp.float32)
        var = jax.random.uniform(k4, (c,), jnp.float32, minval=0.5, maxval=1.5)
        scale = gamma / jnp.sqrt(var + eps)
        shift = beta - mean * scale
        return scale, shift

    def conv_w(k, kh, kw, cin, cout):
        fan_in = kh * kw * cin
        return jax.random.normal(k, (kh, kw, cin, cout), jnp.float32) / jnp.sqrt(fan_in)

    ks = jax.random.split(key, 10)
    return {
        "p1_conv1":    (conv_w(ks[0], 3, 3, dim, 128), *bn_fold(ks[1], 128)),
        "p2_conv1":    (conv_w(ks[2], 3, 3, dim, 128), *bn_fold(ks[3], 128)),
        "p_conv1_bn1": (conv_w(ks[4], 3, 3, 128, dim), *bn_fold(ks[5], dim)),
        "conv1_bn1":   (conv_w(ks[6], 1, 1, dim, dim), *bn_fold(ks[7], dim)),
        "conv2":       (conv_w(ks[8], 3, 3, dim, dim), *bn_fold(ks[9], dim)),
    }


# ----------------------------- pure-JAX reference -----------------------------

def corner_pool_reference(x_nchw, params):
    x = jnp.transpose(x_nchw, (0, 2, 3, 1)).astype(jnp.float32)

    def conv(inp, w, scale, shift, relu, residual=None):
        out = lax.conv_general_dilated(
            inp, w, window_strides=(1, 1), padding="SAME",
            dimension_numbers=("NHWC", "HWIO", "NHWC"),
            precision=lax.Precision.HIGHEST)
        out = out * scale.reshape(1, 1, 1, -1) + shift.reshape(1, 1, 1, -1)
        if residual is not None:
            out = out + residual
        if relu:
            out = jnp.maximum(out, 0.0)
        return out

    p1 = conv(x, *params["p1_conv1"], True)
    p2 = conv(x, *params["p2_conv1"], True)
    pools = (lax.cummax(p1, axis=1, reverse=True)
             + lax.cummax(p2, axis=2, reverse=True))
    bn1 = conv(x, *params["conv1_bn1"], False)
    relu1 = conv(pools, *params["p_conv1_bn1"], True, residual=bn1)
    out = conv(relu1, *params["conv2"], True)
    return jnp.transpose(out, (0, 3, 1, 2))


# ----------------------------- main -------------------------------------------

if __name__ == "__main__":
    dim = 4
    key = jax.random.PRNGKey(0)
    k_x, k_p = jax.random.split(key)

    x = jax.random.normal(k_x, (2, dim, 16, 16), jnp.float32)   # NCHW, like PyTorch
    params = make_params(k_p, dim)

    out = corner_pool_forward(x, params)
    out = jax.block_until_ready(out)

    ref = corner_pool_reference(x, params)
    assert out.shape == (2, dim, 16, 16), out.shape
    # bf16 MXU operands (f32 accumulation / f32 BN epilogue) across 3 stacked convs
    # -> tolerance slightly looser than the pure-f32 version.
    assert bool(jnp.allclose(out, ref, rtol=3e-2, atol=3e-2)), \
        float(jnp.max(jnp.abs(out - ref)))

    print("KERNEL_OK")
</pallas_src>

<mosaic_0001>
module attributes {stable_mosaic.version = 11 : i64} {
  func.func @kernel(%arg0: i32, %arg1: memref<1x18x18x4xf32, #tpu.memory_space<vmem>>, %arg2: memref<36x128xbf16, #tpu.memory_space<vmem>>, %arg3: memref<36x128xbf16, #tpu.memory_space<vmem>>, %arg4: memref<4x128xf32, #tpu.memory_space<vmem>>, %arg5: memref<1x18x18x128xf32, #tpu.memory_space<vmem>>) attributes {dimension_semantics = [#tpu.dimension_semantics<parallel>], iteration_bounds = array<i64: 2>, scalar_prefetch = 0 : i64, scratch_operands = 0 : i64, tpu.core_type = #tpu.core_type<tc>, window_params = [{transform_indices = @transform_0, window_bounds = array<i64: 1, 18, 18, 4>}, {pipeline_mode = #tpu.pipeline_mode<synchronous>, transform_indices = @transform_1, window_bounds = array<i64: 36, 128>}, {pipeline_mode = #tpu.pipeline_mode<synchronous>, transform_indices = @transform_2, window_bounds = array<i64: 36, 128>}, {pipeline_mode = #tpu.pipeline_mode<synchronous>, transform_indices = @transform_3, window_bounds = array<i64: 4, 128>}, {transform_indices = @transform_4, window_bounds = array<i64: 1, 18, 18, 128>}]} {
    %c0 = arith.constant 0 : index
    %c0_0 = arith.constant 0 : index
    %c0_1 = arith.constant 0 : index
    %c0_2 = arith.constant 0 : index
    %0 = vector.load %arg1[%c0, %c0_0, %c0_1, %c0_2] : memref<1x18x18x4xf32, #tpu.memory_space<vmem>>, vector<1x16x16x4xf32>
    %1 = vector.shape_cast %0 : vector<1x16x16x4xf32> to vector<16x16x4xf32>
    %2 = vector.shape_cast %1 : vector<16x16x4xf32> to vector<256x4xf32>
    %c0_3 = arith.constant 0 : index
    %c0_4 = arith.constant 0 : index
    %c1 = arith.constant 1 : index
    %c0_5 = arith.constant 0 : index
    %3 = vector.load %arg1[%c0_3, %c0_4, %c1, %c0_5] : memref<1x18x18x4xf32, #tpu.memory_space<vmem>>, vector<1x16x16x4xf32>
    %4 = vector.shape_cast %3 : vector<1x16x16x4xf32> to vector<16x16x4xf32>
    %5 = vector.shape_cast %4 : vector<16x16x4xf32> to vector<256x4xf32>
    %c0_6 = arith.constant 0 : index
    %c0_7 = arith.constant 0 : index
    %c2 = arith.constant 2 : index
    %c0_8 = arith.constant 0 : index
    %6 = vector.load %arg1[%c0_6, %c0_7, %c2, %c0_8] : memref<1x18x18x4xf32, #tpu.memory_space<vmem>>, vector<1x16x16x4xf32>
    %7 = vector.shape_cast %6 : vector<1x16x16x4xf32> to vector<16x16x4xf32>
    %8 = vector.shape_cast %7 : vector<16x16x4xf32> to vector<256x4xf32>
    %c0_9 = arith.constant 0 : index
    %c1_10 = arith.constant 1 : index
    %c0_11 = arith.constant 0 : index
    %c0_12 = arith.constant 0 : index
    %9 = vector.load %arg1[%c0_9, %c1_10, %c0_11, %c0_12] : memref<1x18x18x4xf32, #tpu.memory_space<vmem>>, vector<1x16x16x4xf32>
    %10 = vector.shape_cast %9 : vector<1x16x16x4xf32> to vector<16x16x4xf32>
    %11 = vector.shape_cast %10 : vector<16x16x4xf32> to vector<256x4xf32>
    %c0_13 = arith.constant 0 : index
    %c1_14 = arith.constant 1 : index
    %c1_15 = arith.constant 1 : index
    %c0_16 = arith.constant 0 : index
    %12 = vector.load %arg1[%c0_13, %c1_14, %c1_15, %c0_16] : memref<1x18x18x4xf32, #tpu.memory_space<vmem>>, vector<1x16x16x4xf32>
    %13 = vector.shape_cast %12 : vector<1x16x16x4xf32> to vector<16x16x4xf32>
    %14 = vector.shape_cast %13 : vector<16x16x4xf32> to vector<256x4xf32>
    %c0_17 = arith.constant 0 : index
    %c1_18 = arith.constant 1 : index
    %c2_19 = arith.constant 2 : index
    %c0_20 = arith.constant 0 : index
    %15 = vector.load %arg1[%c0_17, %c1_18, %c2_19, %c0_20] : memref<1x18x18x4xf32, #tpu.memory_space<vmem>>, vector<1x16x16x4xf32>
    %16 = vector.shape_cast %15 : vector<1x16x16x4xf32> to vector<16x16x4xf32>
    %17 = vector.shape_cast %16 : vector<16x16x4xf32> to vector<256x4xf32>
    %c0_21 = arith.constant 0 : index
    %c2_22 = arith.constant 2 : index
    %c0_23 = arith.constant 0 : index
    %c0_24 = arith.constant 0 : index
    %18 = vector.load %arg1[%c0_21, %c2_22, %c0_23, %c0_24] : memref<1x18x18x4xf32, #tpu.memory_space<vmem>>, vector<1x16x16x4xf32>
    %19 = vector.shape_cast %18 : vector<1x16x16x4xf32> to vector<16x16x4xf32>
    %20 = vector.shape_cast %19 : vector<16x16x4xf32> to vector<256x4xf32>
    %c0_25 = arith.constant 0 : index
    %c2_26 = arith.constant 2 : index
    %c1_27 = arith.constant 1 : index
    %c0_28 = arith.constant 0 : index
    %21 = vector.load %arg1[%c0_25, %c2_26, %c1_27, %c0_28] : memref<1x18x18x4xf32, #tpu.memory_space<vmem>>, vector<1x16x16x4xf32>
    %22 = vector.shape_cast %21 : vector<1x16x16x4xf32> to vector<16x16x4xf32>
    %23 = vector.shape_cast %22 : vector<16x16x4xf32> to vector<256x4xf32>
    %c0_29 = arith.constant 0 : index
    %c2_30 = arith.constant 2 : index
    %c2_31 = arith.constant 2 : index
    %c0_32 = arith.constant 0 : index
    %24 = vector.load %arg1[%c0_29, %c2_30, %c2_31, %c0_32] : memref<1x18x18x4xf32, #tpu.memory_space<vmem>>, vector<1x16x16x4xf32>
    %25 = vector.shape_cast %24 : vector<1x16x16x4xf32> to vector<16x16x4xf32>
    %26 = vector.shape_cast %25 : vector<16x16x4xf32> to vector<256x4xf32>
    %27 = tpu.concatenate %2, %5, %8, %11, %14, %17, %20, %23, %26 in 1 : vector<256x4xf32>, vector<256x4xf32>, vector<256x4xf32>, vector<256x4xf32>, vector<256x4xf32>, vector<256x4xf32>, vector<256x4xf32>, vector<256x4xf32>, vector<256x4xf32> -> vector<256x36xf32>
    %28 = arith.truncf %27 : vector<256x36xf32> to vector<256x36xbf16>
    %c0_33 = arith.constant 0 : index
    %c0_34 = arith.constant 0 : index
    %29 = vector.load %arg2[%c0_33, %c0_34] : memref<36x128xbf16, #tpu.memory_space<vmem>>, vector<36x128xbf16>
    %cst = arith.constant dense<0.000000e+00> : vector<256x128xf32>
    %30 = tpu.matmul %28, %29, %cst {dimension_numbers = #tpu.dot_dimension_numbers<[1], [0], [0], [1], [0, 0, 1, 1], [], []>} : vector<256x36xbf16>, vector<36x128xbf16>, vector<256x128xf32> -> vector<256x128xf32>
    %c0_35 = arith.constant 0 : index
    %c0_36 = arith.constant 0 : index
    %31 = vector.load %arg4[%c0_35, %c0_36] : memref<4x128xf32, #tpu.memory_space<vmem>>, vector<1x128xf32>
    %32 = vector.broadcast %31 : vector<1x128xf32> to vector<256x128xf32>
    %33 = arith.mulf %30, %32 : vector<256x128xf32>
    %c1_37 = arith.constant 1 : index
    %c0_38 = arith.constant 0 : index
    %34 = vector.load %arg4[%c1_37, %c0_38] : memref<4x128xf32, #tpu.memory_space<vmem>>, vector<1x128xf32>
    %35 = vector.broadcast %34 : vector<1x128xf32> to vector<256x128xf32>
    %36 = arith.addf %33, %35 : vector<256x128xf32>
    %cst_39 = arith.constant 0.000000e+00 : f32
    %37 = vector.broadcast %cst_39 : f32 to vector<256x128xf32>
    %38 = arith.maximumf %36, %37 : vector<256x128xf32>
    %c0_40 = arith.constant 0 : index
    %c0_41 = arith.constant 0 : index
    %39 = vector.load %arg3[%c0_40, %c0_41] : memref<36x128xbf16, #tpu.memory_space<vmem>>, vector<36x128xbf16>
    %cst_42 = arith.constant dense<0.000000e+00> : vector<256x128xf32>
    %40 = tpu.matmul %28, %39, %cst_42 {dimension_numbers = #tpu.dot_dimension_numbers<[1], [0], [0], [1], [0, 0, 1, 1], [], []>} : vector<256x36xbf16>, vector<36x128xbf16>, vector<256x128xf32> -> vector<256x128xf32>
    %c2_43 = arith.constant 2 : index
    %c0_44 = arith.constant 0 : index
    %41 = vector.load %arg4[%c2_43, %c0_44] : memref<4x128xf32, #tpu.memory_space<vmem>>, vector<1x128xf32>
    %42 = vector.broadcast %41 : vector<1x128xf32> to vector<256x128xf32>
    %43 = arith.mulf %40, %42 : vector<256x128xf32>
    %c3 = arith.constant 3 : index
    %c0_45 = arith.constant 0 : index
    %44 = vector.load %arg4[%c3, %c0_45] : memref<4x128xf32, #tpu.memory_space<vmem>>, vector<1x128xf32>
    %45 = vector.broadcast %44 : vector<1x128xf32> to vector<256x128xf32>
    %46 = arith.addf %43, %45 : vector<256x128xf32>
    %cst_46 = arith.constant 0.000000e+00 : f32
    %47 = vector.broadcast %cst_46 : f32 to vector<256x128xf32>
    %48 = arith.maximumf %46, %47 : vector<256x128xf32>
    %49 = tpu.iota {dimensions = array<i32: 0>} : vector<256x128xi32>
    %c240_i32 = arith.constant 240 : i32
    %50 = tpu.dynamic_rotate %38 by %c240_i32 dim 0 : vector<256x128xf32>, i32 -> vector<256x128xf32>
    %c240_i32_47 = arith.constant 240 : i32
    %51 = vector.broadcast %c240_i32_47 : i32 to vector<256x128xi32>
    %52 = arith.cmpi slt, %49, %51 : vector<256x128xi32>
    %53 = arith.maximumf %38, %50 : vector<256x128xf32>
    %54 = arith.select %52, %53, %38 : vector<256x128xi1>, vector<256x128xf32>
    %c224_i32 = arith.constant 224 : i32
    %55 = tpu.dynamic_rotate %54 by %c224_i32 dim 0 : vector<256x128xf32>, i32 -> vector<256x128xf32>
    %c224_i32_48 = arith.constant 224 : i32
    %56 = vector.broadcast %c224_i32_48 : i32 to vector<256x128xi32>
    %57 = arith.cmpi slt, %49, %56 : vector<256x128xi32>
    %58 = arith.maximumf %54, %55 : vector<256x128xf32>
    %59 = arith.select %57, %58, %54 : vector<256x128xi1>, vector<256x128xf32>
    %c192_i32 = arith.constant 192 : i32
    %60 = tpu.dynamic_rotate %59 by %c192_i32 dim 0 : vector<256x128xf32>, i32 -> vector<256x128xf32>
    %c192_i32_49 = arith.constant 192 : i32
    %61 = vector.broadcast %c192_i32_49 : i32 to vector<256x128xi32>
    %62 = arith.cmpi slt, %49, %61 : vector<256x128xi32>
    %63 = arith.maximumf %59, %60 : vector<256x128xf32>
    %64 = arith.select %62, %63, %59 : vector<256x128xi1>, vector<256x128xf32>
    %c128_i32 = arith.constant 128 : i32
    %65 = tpu.dynamic_rotate %64 by %c128_i32 dim 0 : vector<256x128xf32>, i32 -> vector<256x128xf32>
    %c128_i32_50 = arith.constant 128 : i32
    %66 = vector.broadcast %c128_i32_50 : i32 to vector<256x128xi32>
    %67 = arith.cmpi slt, %49, %66 : vector<256x128xi32>
    %68 = arith.maximumf %64, %65 : vector<256x128xf32>
    %69 = arith.select %67, %68, %64 : vector<256x128xi1>, vector<256x128xf32>
    %70 = tpu.iota {dimensions = array<i32: 0>} : vector<256x128xi32>
    %c16_i32 = arith.constant 16 : i32
    %c0_i32 = arith.constant 0 : i32
    %71 = arith.cmpi eq, %c16_i32, %c0_i32 : i32
    %c1_i32 = arith.constant 1 : i32
    %72 = arith.select %71, %c1_i32, %c16_i32 : i32
    %73 = vector.broadcast %72 : i32 to vector<256x128xi32>
    %74 = arith.remsi %70, %73 : vector<256x128xi32>
    %c0_i32_51 = arith.constant 0 : i32
    %75 = vector.broadcast %c0_i32_51 : i32 to vector<256x128xi32>
    %76 = arith.cmpi ne, %74, %75 : vector<256x128xi32>
    %c0_i32_52 = arith.constant 0 : i32
    %77 = vector.broadcast %c0_i32_52 : i32 to vector<256x128xi32>
    %78 = arith.cmpi slt, %74, %77 : vector<256x128xi32>
    %c0_i32_53 = arith.constant 0 : i32
    %79 = arith.cmpi slt, %72, %c0_i32_53 : i32
    %80 = vector.broadcast %79 : i1 to vector<256x128xi1>
    %81 = vector.broadcast %80 : vector<256x128xi1> to vector<256x128xi1>
    %82 = arith.xori %78, %81 : vector<256x128xi1>
    %83 = arith.andi %82, %76 : vector<256x128xi1>
    %84 = vector.broadcast %72 : i32 to vector<256x128xi32>
    %85 = arith.addi %74, %84 : vector<256x128xi32>
    %86 = arith.select %83, %85, %74 : vector<256x128xi1>, vector<256x128xi32>
    %c255_i32 = arith.constant 255 : i32
    %87 = tpu.dynamic_rotate %48 by %c255_i32 dim 0 : vector<256x128xf32>, i32 -> vector<256x128xf32>
    %c15_i32 = arith.constant 15 : i32
    %88 = vector.broadcast %c15_i32 : i32 to vector<256x128xi32>
    %89 = arith.cmpi slt, %86, %88 : vector<256x128xi32>
    %90 = arith.maximumf %48, %87 : vector<256x128xf32>
    %91 = arith.select %89, %90, %48 : vector<256x128xi1>, vector<256x128xf32>
    %c254_i32 = arith.constant 254 : i32
    %92 = tpu.dynamic_rotate %91 by %c254_i32 dim 0 : vector<256x128xf32>, i32 -> vector<256x128xf32>
    %c14_i32 = arith.constant 14 : i32
    %93 = vector.broadcast %c14_i32 : i32 to vector<256x128xi32>
    %94 = arith.cmpi slt, %86, %93 : vector<256x128xi32>
    %95 = arith.maximumf %91, %92 : vector<256x128xf32>
    %96 = arith.select %94, %95, %91 : vector<256x128xi1>, vector<256x128xf32>
    %c252_i32 = arith.constant 252 : i32
    %97 = tpu.dynamic_rotate %96 by %c252_i32 dim 0 : vector<256x128xf32>, i32 -> vector<256x128xf32>
    %c12_i32 = arith.constant 12 : i32
    %98 = vector.broadcast %c12_i32 : i32 to vector<256x128xi32>
    %99 = arith.cmpi slt, %86, %98 : vector<256x128xi32>
    %100 = arith.maximumf %96, %97 : vector<256x128xf32>
    %101 = arith.select %99, %100, %96 : vector<256x128xi1>, vector<256x128xf32>
    %c248_i32 = arith.constant 248 : i32
    %102 = tpu.dynamic_rotate %101 by %c248_i32 dim 0 : vector<256x128xf32>, i32 -> vector<256x128xf32>
    %c8_i32 = arith.constant 8 : i32
    %103 = vector.broadcast %c8_i32 : i32 to vector<256x128xi32>
    %104 = arith.cmpi slt, %86, %103 : vector<256x128xi32>
    %105 = arith.maximumf %101, %102 : vector<256x128xf32>
    %106 = arith.select %104, %105, %101 : vector<256x128xi1>, vector<256x128xf32>
    %107 = arith.addf %69, %106 : vector<256x128xf32>
    %108 = vector.shape_cast %107 : vector<256x128xf32> to vector<16x16x128xf32>
    %cst_54 = arith.constant 0.000000e+00 : f32
    %109 = vector.broadcast %cst_54 : f32 to vector<1x16x128xf32>
    %cst_55 = arith.constant 0.000000e+00 : f32
    %110 = vector.broadcast %cst_55 : f32 to vector<18x1x128xf32>
    %111 = tpu.concatenate %109, %108, %109 in 0 : vector<1x16x128xf32>, vector<16x16x128xf32>, vector<1x16x128xf32> -> vector<18x16x128xf32>
    %112 = tpu.concatenate %110, %111, %110 in 1 : vector<18x1x128xf32>, vector<18x16x128xf32>, vector<18x1x128xf32> -> vector<18x18x128xf32>
    %c0_56 = arith.constant 0 : index
    %c0_57 = arith.constant 0 : index
    %c0_58 = arith.constant 0 : index
    %c0_59 = arith.constant 0 : index
    %113 = vector.load %arg5[%c0_56, %c0_57, %c0_58, %c0_59] : memref<1x18x18x128xf32, #tpu.memory_space<vmem>>, vector<1x18x18x128xf32>
    %114 = vector.shape_cast %113 : vector<1x18x18x128xf32> to vector<18x18x128xf32>
    %115 = vector.shape_cast %112 : vector<18x18x128xf32> to vector<1x18x18x128xf32>
    tpu.vector_store %arg5[%c0_56, %c0_57, %c0_58, %c0_59], %115 {strides = array<i32>} : memref<1x18x18x128xf32, #tpu.memory_space<vmem>>, vector<1x18x18x128xf32>,
    return
  }
  func.func @transform_0(%arg0: i32) -> (i32, i32, i32, i32) {
    %c0_i32 = arith.constant 0 : i32
    %c0_i32_0 = arith.constant 0 : i32
    %c0_i32_1 = arith.constant 0 : i32
    %c0_i32_2 = arith.constant 0 : i32
    return %arg0, %c0_i32, %c0_i32_0, %c0_i32_1 : i32, i32, i32, i32
  }
  func.func @transform_1(%arg0: i32) -> (i32, i32) {
    %c0_i32 = arith.constant 0 : i32
    %c0_i32_0 = arith.constant 0 : i32
    %c0_i32_1 = arith.constant 0 : i32
    return %c0_i32, %c0_i32_0 : i32, i32
  }
  func.func @transform_2(%arg0: i32) -> (i32, i32) {
    %c0_i32 = arith.constant 0 : i32
    %c0_i32_0 = arith.constant 0 : i32
    %c0_i32_1 = arith.constant 0 : i32
    return %c0_i32, %c0_i32_0 : i32, i32
  }
  func.func @transform_3(%arg0: i32) -> (i32, i32) {
    %c0_i32 = arith.constant 0 : i32
    %c0_i32_0 = arith.constant 0 : i32
    %c0_i32_1 = arith.constant 0 : i32
    return %c0_i32, %c0_i32_0 : i32, i32
  }
  func.func @transform_4(%arg0: i32) -> (i32, i32, i32, i32) {
    %c0_i32 = arith.constant 0 : i32
    %c0_i32_0 = arith.constant 0 : i32
    %c0_i32_1 = arith.constant 0 : i32
    %c0_i32_2 = arith.constant 0 : i32
    return %arg0, %c0_i32, %c0_i32_0, %c0_i32_1 : i32, i32, i32, i32
  }
}

</mosaic_0001>

<bundles_post_ra>
// kernel: tpu_custom_call.1
= control target key start
LH: loop header
LB: loop body
LE: loop exit
PB: predicated region body
PF: predicated region fallthrough
CT: control target
= control target key end

     0   :  { %s4907_s15 = smov 0   ;;  %s7921_s0 = inlined_call_operand.vmem [shape: f32[2,18,18,4], index: 0, kind: input, shape index: {}]   ;;  %s7922_s1 = inlined_call_operand.vmem [shape: bf16[36,128], index: 1, kind: input, shape index: {}]   ;;  %s7923_s2 = inlined_call_operand.vmem [shape: bf16[36,128], index: 2, kind: input, shape index: {}]   ;;  %s7924_s3 = inlined_call_operand.vmem [shape: f32[4,128], index: 3, kind: input, shape index: {}]   ;;  %s7925_s4 = inlined_call_operand.vmem [shape: f32[2,18,18,128], index: 4, kind: output, shape index: {}]  }
   0x1 LB: > { %s3940_s16 = sadd.s32 4294967295, %s4871_s15   ;;  %p3944_p0 = scmp.ge.s32.totalorder %s4871_s15, 1  ;;  %s4871_s15 = sphi %s4907_s15, %s14_s15  }
   0x2   : > { %p162_p1 = scmp.lt.s32.totalorder %s4871_s15, 3 }
   0x4   : > { %p163_p2 = pnand %p3944_p0, %p162_p1 }
   0x6   : > { %166 = sbr.rel (%p163_p2) target bundleno = 733 (0x2dd), region = 36 }
   0xb   : > { %p188_p3 = scmp.lt.s32.totalorder %s3940_s16, 1  ;;  %s4873_s21 = smov 4   ;;  %vm1513_vm0 = vcmask 31744   ;;  %vm1546_vm1 = vcmask 64512   ;;  %vm1579_vm2 = vcmask 97280   ;;  %vm1612_vm3 = vcmask 130048  }
   0xc   : > { %s4874_s22 = smov 8   ;;  %s4875_s23 = smov 12   ;;  %vm1645_vm4 = vcmask 162816   ;;  %vm1862_vm5 = vcmask 1041408   ;;  %vm1678_vm6 = vcmask 195584   ;;  %vm1711_vm7 = vcmask 228352  }
   0xd   : > { %s8420_s16 = smov (!%p188_p3, %s3940_s16), 1  ;;  %s4876_s24 = smov 16   ;;  %vm1744_vm8 = vcmask 261120   ;;  %vm1813_vm9 = vcmask 293888  }
   0xe   : > { %s4199_s17 = smul.u32 432, %s8420_s16  ;;  %s4877_s25 = smov 20  }
   0xf   : > { %s4878_s26 = smov 24   ;;  %s4879_s27 = smov 32  }
  0x10   : > { %s4923_s20 = scalar_lea.vmem %s7921_s0, %s4199_s17  ;;  %s4880_s28 = smov 28  }
  0x11   : > { %v239_v0 = vld [vmem:[%s4923_s20 + $0x61] sm:$0xff]  ;;  %v240_v1 = vld [vmem:[%s4923_s20 + $0x69] sm:$0xff]  ;;  %v235_v2 = vld [vmem:[%s4923_s20 + $0x31] sm:$0xff]  ;;  %s7480_s10 = scalar_lea.vmem %s7925_s4, %s4199_s17 }
  0x12   : > { %v4928_v3 = vpack.i.bf16 %v240_v1, %v239_v0  ;;  %v236_v4 = vld [vmem:[%s4923_s20 + $0x39] sm:$0xff]  ;;  %v231_v5 = vld [vmem:[%s4923_s20 + $0x1] sm:$0xff]  ;;  %v232_v6 = vld [vmem:[%s4923_s20 + $0x9] sm:$0xff] }
  0x13   : > { %v4933_v7 = vpack.i.bf16 %v236_v4, %v235_v2  ;;  %v4217_v8 = vpack.i.bf16 %v232_v6, %v231_v5  ;;  %v241_v9 = vld [vmem:[%s4923_s20 + $0x79] sm:$0xff]  ;;  %v242_v10 = vld [vmem:[%s4923_s20 + $0x81] sm:$0xff]  ;;  %v237_v11 = vld [vmem:[%s4923_s20 + $0x49] sm:$0xff] }
  0x14   : > { %4238 = vrot.lane.b32.xlu2 %v4928_v3, %s4873_s21  ;;  %v238_v12 = vld [vmem:[%s4923_s20 + $0x51] sm:$0xff]  ;;  %v233_v13 = vld [vmem:[%s4923_s20 + $0x19] sm:$0xff]  ;;  %v234_v14 = vld [vmem:[%s4923_s20 + $0x21] sm:$0xff]  ;;  %v4946_v15 = vpack.i.bf16 %v242_v10, %v241_v9 }
  0x15   : > { %4228 = vrot.lane.b32.xlu1 %v4933_v7, %s4873_s21  ;;  %4218 = vrot.lane.b32.xlu0 %v4217_v8, %s4873_s21  ;;  %v4948_v16 = vpack.i.bf16 %v238_v12, %v237_v11  ;;  %v4950_v17 = vpack.i.bf16 %v234_v14, %v233_v13  ;;  %v247_v18 = vld [vmem:[%s4923_s20 + $0xc1] sm:$0xff]  ;;  %v248_v19 = vld [vmem:[%s4923_s20 + $0xc9] sm:$0xff] }
  0x16   : > { %v245_v20 = vld [vmem:[%s4923_s20 + $0xa9] sm:$0xff]  ;;  %v246_v21 = vld [vmem:[%s4923_s20 + $0xb1] sm:$0xff]  ;;  %v244_v23 = vld [vmem:[%s4923_s20 + $0x99] sm:$0xff]  ;;  %v4964_v24 = vpack.i.bf16 %v248_v19, %v247_v18 }
  0x17   : > { %v243_v22 = vld [vmem:[%s4923_s20 + $0x91] sm:$0xff]  ;;  %v4966_v25 = vpack.i.bf16 %v246_v21, %v245_v20  ;;  %v253_v27 = vld [vmem:[%s4923_s20 + $0x109] sm:$0xff]  ;;  %v252_v30 = vld [vmem:[%s4923_s20 + $0xf9] sm:$0xff] }
  0x18   : > { %v4968_v26 = vpack.i.bf16 %v244_v23, %v243_v22  ;;  %v254_v28 = vld [vmem:[%s4923_s20 + $0x111] sm:$0xff]  ;;  %v249_v31 = vld [vmem:[%s4923_s20 + $0xd9] sm:$0xff]  ;;  %v250_v32 = vld [vmem:[%s4923_s20 + $0xe1] sm:$0xff] }
  0x19   : > { %v251_v29 = vld [vmem:[%s4923_s20 + $0xf1] sm:$0xff]  ;;  %v4982_v33 = vpack.i.bf16 %v254_v28, %v253_v27  ;;  %v4986_v35 = vpack.i.bf16 %v250_v32, %v249_v31  ;;  %v260_v37 = vld [vmem:[%s4923_s20 + $0x159] sm:$0xff]  ;;  %v258_v39 = vld [vmem:[%s4923_s20 + $0x141] sm:$0xff] }
  0x1a   : > { %v4984_v34 = vpack.i.bf16 %v252_v30, %v251_v29  ;;  %v259_v36 = vld [vmem:[%s4923_s20 + $0x151] sm:$0xff]  ;;  %v257_v38 = vld [vmem:[%s4923_s20 + $0x139] sm:$0xff]  ;;  %v255_v40 = vld [vmem:[%s4923_s20 + $0x121] sm:$0xff] }
  0x1b   : > { %v256_v41 = vld [vmem:[%s4923_s20 + $0x129] sm:$0xff]  ;;  %v5000_v42 = vpack.i.bf16 %v260_v37, %v259_v36  ;;  %v5002_v43 = vpack.i.bf16 %v258_v39, %v257_v38  ;;  %v265_v45 = vld [vmem:[%s4923_s20 + $0x1a] sm:$0xff]  ;;  %v262_v50 = vld [vmem:[%s4923_s20 + $0x171] sm:$0xff] }
  0x1c   : > { %4243 = vrot.lane.b32.xlu2 %v4946_v15, %s4873_s21  ;;  %v5004_v44 = vpack.i.bf16 %v256_v41, %v255_v40  ;;  %v266_v46 = vld [vmem:[%s4923_s20 + $0x22] sm:$0xff]  ;;  %v264_v48 = vld [vmem:[%s4923_s20 + $0xa] sm:$0xff]  ;;  %v270_v57 = vld [vmem:[%s4923_s20 + $0x52] sm:$0xff] }
  0x1d   : > { %4233 = vrot.lane.b32.xlu1 %v4948_v16, %s4873_s21  ;;  %4223 = vrot.lane.b32.xlu0 %v4950_v17, %s4873_s21  ;;  %v263_v47 = vld [vmem:[%s4923_s20 + $0x2] sm:$0xff]  ;;  %v5018_v51 = vpack.i.bf16 %v266_v46, %v265_v45  ;;  %v272_v55 = vld [vmem:[%s4923_s20 + $0x6a] sm:$0xff] }
  0x1e   : > { %v261_v49 = vld [vmem:[%s4923_s20 + $0x169] sm:$0xff]  ;;  %v4297_v52 = vpack.i.bf16 %v264_v48, %v263_v47  ;;  %v267_v58 = vld [vmem:[%s4923_s20 + $0x32] sm:$0xff]  ;;  %v268_v59 = vld [vmem:[%s4923_s20 + $0x3a] sm:$0xff] }
  0x1f   : > { %v5020_v53 = vpack.i.bf16 %v262_v50, %v261_v49  ;;  %v271_v54 = vld [vmem:[%s4923_s20 + $0x62] sm:$0xff]  ;;  %v269_v56 = vld [vmem:[%s4923_s20 + $0x4a] sm:$0xff]  ;;  %v5037_v62 = vpack.i.bf16 %v268_v59, %v267_v58  ;;  %v278_v0 = vld [vmem:[%s4923_s20 + $0xb2] sm:$0xff] }
  0x20   : > { %v5033_v60 = vpack.i.bf16 %v272_v55, %v271_v54  ;;  %v5035_v61 = vpack.i.bf16 %v270_v57, %v269_v56  ;;  %v277_v63 = vld [vmem:[%s4923_s20 + $0xaa] sm:$0xff]  ;;  %v275_v1 = vld [vmem:[%s4923_s20 + $0x92] sm:$0xff]  ;;  %v276_v2 = vld [vmem:[%s4923_s20 + $0x9a] sm:$0xff] }
  0x21   : > { %v273_v4 = vld [vmem:[%s4923_s20 + $0x7a] sm:$0xff]  ;;  %v274_v5 = vld [vmem:[%s4923_s20 + $0x82] sm:$0xff]  ;;  %v5051_v6 = vpack.i.bf16 %v278_v0, %v277_v63  ;;  %v5053_v8 = vpack.i.bf16 %v276_v2, %v275_v1  ;;  %v283_v10 = vld [vmem:[%s4923_s20 + $0xf2] sm:$0xff] }
  0x22   : > { %v5055_v9 = vpack.i.bf16 %v274_v5, %v273_v4  ;;  %v284_v11 = vld [vmem:[%s4923_s20 + $0xfa] sm:$0xff]  ;;  %v282_v13 = vld [vmem:[%s4923_s20 + $0xe2] sm:$0xff]  ;;  %v280_v18 = vld [vmem:[%s4923_s20 + $0xca] sm:$0xff] }
  0x23   : > { %8099 = vst [vmem:[#allocation2_spill] sm:$0xff] %v5051_v6  ;;  %v281_v12 = vld [vmem:[%s4923_s20 + $0xda] sm:$0xff]  ;;  %v279_v14 = vld [vmem:[%s4923_s20 + $0xc2] sm:$0xff]  ;;  %v5069_v19 = vpack.i.bf16 %v284_v11, %v283_v10  ;;  %v288_v28 = vld [vmem:[%s4923_s20 + $0x12a] sm:$0xff] }
  0x24   : > { %4258 = vrot.lane.b32.xlu2 %v4964_v24, %s4873_s21  ;;  %8100 = vst [vmem:[#allocation3_spill] sm:$0xff] %v5053_v8  ;;  %v5071_v20 = vpack.i.bf16 %v282_v13, %v281_v12  ;;  %v5073_v21 = vpack.i.bf16 %v280_v18, %v279_v14  ;;  %v289_v22 = vld [vmem:[%s4923_s20 + $0x13a] sm:$0xff]  ;;  %v290_v23 = vld [vmem:[%s4923_s20 + $0x142] sm:$0xff]  ;;  %v285_v29 = vld [vmem:[%s4923_s20 + $0x10a] sm:$0xff] }
  0x25   : > { %4253 = vrot.lane.b32.xlu1 %v4966_v25, %s4873_s21  ;;  %4248 = vrot.lane.b32.xlu0 %v4968_v26, %s4873_s21  ;;  %8101 = vst [vmem:[#allocation4_spill] sm:$0xff] %v5069_v19  ;;  %v287_v27 = vld [vmem:[%s4923_s20 + $0x122] sm:$0xff]  ;;  %v286_v30 = vld [vmem:[%s4923_s20 + $0x112] sm:$0xff]  ;;  %v4362_v31 = vpack.i.bf16 %v290_v23, %v289_v22 }
  0x26   : > { %8102 = vst [vmem:[#allocation5_spill] sm:$0xff] %v5071_v20  ;;  %v4357_v32 = vpack.i.bf16 %v288_v28, %v287_v27  ;;  %v5087_v36 = vpack.i.bf16 %v286_v30, %v285_v29  ;;  %v5091_v37 = vld [vmem:[%s4923_s20 + $0x18] sm:$0xff]  ;;  %v5097_v38 = vld [vmem:[%s4923_s20 + $0x20] sm:$0xff]  ;;  %v293_v39 = vld [vmem:[%s4923_s20 + $0x16a] sm:$0xff] }
  0x27   : > { %v294_v40 = vld [vmem:[%s4923_s20 + $0x172] sm:$0xff]  ;;  %v292_v45 = vld [vmem:[%s4923_s20 + $0x15a] sm:$0xff]  ;;  %v4377_v46 = vpack.i.bf16 %v5097_v38, %v5091_v37  ;;  %v3954_v50 = vld [vmem:[%s4923_s20 + $0x68] sm:$0xff] }
  0x28   : > { %8103 = vst [vmem:[#allocation6_spill] sm:$0xff] %v5087_v36  ;;  %v291_v41 = vld [vmem:[%s4923_s20 + $0x152] sm:$0xff]  ;;  %v4372_v47 = vpack.i.bf16 %v294_v40, %v293_v39  ;;  %v3953_v49 = vld [vmem:[%s4923_s20 + $0x60] sm:$0xff]  ;;  %v5132_v63 = vld [vmem:[%s4923_s20 + $0xa8] sm:$0xff] }
  0x29   : > { %v4367_v48 = vpack.i.bf16 %v292_v45, %v291_v41  ;;  %v5114_v54 = vld [vmem:[%s4923_s20 + $0x50] sm:$0xff]  ;;  %v5120_v56 = vld [vmem:[%s4923_s20 + $0x38] sm:$0xff]  ;;  %v4392_v57 = vpack.i.bf16 %v3954_v50, %v3953_v49  ;;  %v3956_v10 = vld [vmem:[%s4923_s20 + $0x80] sm:$0xff] }
  0x2a   : > { %v5117_v55 = vld [vmem:[%s4923_s20 + $0x30] sm:$0xff]  ;;  %v5145_v4 = vld [vmem:[%s4923_s20 + $0x98] sm:$0xff]  ;;  %v3962_v39 = vld [vmem:[%s4923_s20 + $0xc8] sm:$0xff] }
  0x2b   : > { %v5128_v59 = vpack.i.bf16 %v5120_v56, %v5117_v55  ;;  %v5139_v0 = vld [vmem:[%s4923_s20 + $0xb0] sm:$0xff]  ;;  %v3955_v5 = vld [vmem:[%s4923_s20 + $0x78] sm:$0xff] }
  0x2c   : > { %4273 = vrot.lane.b32.xlu2 %v4982_v33, %s4873_s21  ;;  %v5142_v1 = vld [vmem:[%s4923_s20 + $0x90] sm:$0xff]  ;;  %v4407_v13 = vpack.i.bf16 %v5139_v0, %v5132_v63  ;;  %v4397_v23 = vpack.i.bf16 %v3956_v10, %v3955_v5  ;;  %v5166_v28 = vld [vmem:[%s4923_s20 + $0xf8] sm:$0xff] }
  0x2d   : > { %4268 = vrot.lane.b32.xlu1 %v4984_v34, %s4873_s21  ;;  %4263 = vrot.lane.b32.xlu0 %v4986_v35, %s4873_s21  ;;  %8105 = vst [vmem:[#allocation8_spill] sm:$0xff] %v5128_v59  ;;  %v4402_v22 = vpack.i.bf16 %v5145_v4, %v5142_v1  ;;  %v5161_v27 = vld [vmem:[%s4923_s20 + $0xf0] sm:$0xff]  ;;  %v5169_v29 = vld [vmem:[%s4923_s20 + $0xd8] sm:$0xff] }
  0x2e   : > { %v5178_v45 = vpack.i.bf16 %v5166_v28, %v5161_v27 }
  0x30   : > { %8106 = vst [vmem:[#allocation9_spill] sm:$0xff] %v5178_v45 }
  0x34   : > { %4288 = vrot.lane.b32.xlu2 %v5000_v42, %s4873_s21 }
  0x35   : > { %4283 = vrot.lane.b32.xlu1 %v5002_v43, %s4873_s21  ;;  %4278 = vrot.lane.b32.xlu0 %v5004_v44, %s4873_s21 }
  0x3c   : > { %4303 = vrot.lane.b32.xlu2 %v5018_v51, %s4874_s22 }
  0x3d   : > { %4298 = vrot.lane.b32.xlu1 %v4297_v52, %s4874_s22  ;;  %4293 = vrot.lane.b32.xlu0 %v5020_v53, %s4873_s21  ;;  %v5111_v52 = vld [vmem:[%s4923_s20 + $0x48] sm:$0xff] }
  0x3e   : > { %v5124_v58 = vpack.i.bf16 %v5114_v54, %v5111_v52 }
  0x40   : > { %8104 = vst [vmem:[#allocation7_spill] sm:$0xff] %v5124_v58 }
  0x44   : > { %4318 = vrot.lane.b32.xlu2 %v5033_v60, %s4874_s22 }
  0x45   : > { %4313 = vrot.lane.b32.xlu1 %v5035_v61, %s4874_s22  ;;  %4308 = vrot.lane.b32.xlu0 %v5037_v62, %s4874_s22 }
  0x4c   : > { %4333 = vrot.lane.b32.xlu2 %v5051_v6, %s4874_s22 }
  0x4d   : > { %4328 = vrot.lane.b32.xlu1 %v5053_v8, %s4874_s22  ;;  %4323 = vrot.lane.b32.xlu0 %v5055_v9, %s4874_s22 }
  0x54   : > { %4348 = vrot.lane.b32.xlu2 %v5069_v19, %s4874_s22 }
  0x55   : > { %4343 = vrot.lane.b32.xlu1 %v5071_v20, %s4874_s22  ;;  %4338 = vrot.lane.b32.xlu0 %v5073_v21, %s4874_s22 }
  0x5c   : > { %4363 = vrot.lane.b32.xlu2 %v4362_v31, %s4874_s22  ;;  %v5172_v31 = vld [vmem:[%s4923_s20 + $0xe0] sm:$0xff] }
  0x5d   : > { %4358 = vrot.lane.b32.xlu1 %v4357_v32, %s4874_s22  ;;  %4353 = vrot.lane.b32.xlu0 %v5087_v36, %s4874_s22  ;;  %v3961_v32 = vld [vmem:[%s4923_s20 + $0xc0] sm:$0xff]  ;;  %v3974_v36 = vld [vmem:[%s4923_s20 + $0x158] sm:$0xff] }
  0x64   : > { %4378 = vrot.lane.b32.xlu2 %v4377_v46, %s4875_s23 }
  0x65   : > { %4373 = vrot.lane.b32.xlu1 %v4372_v47, %s4874_s22  ;;  %4368 = vrot.lane.b32.xlu0 %v4367_v48, %s4874_s22  ;;  %v4417_v48 = vpack.i.bf16 %v5172_v31, %v5169_v29 }
  0x6c   : > { %4393 = vrot.lane.b32.xlu2 %v4392_v57, %s4875_s23  ;;  %v5196_v57 = vld [vmem:[%s4923_s20 + $0x140] sm:$0xff] }
  0x6d   : > { %4388 = vrot.lane.b32.xlu1 %v5124_v58, %s4875_s23  ;;  %4383 = vrot.lane.b32.xlu0 %v5128_v59, %s4875_s23 }
  0x6e   : > { %v4239_v2 = vpop.permute.xlu2 %4238 }
  0x6f   : > { %v4241_v11 = vunpack.i.h.bf16 %v4239_v2  ;;  %v4240_v12 = vunpack.i.l.bf16 %v4239_v2  ;;  %v5199_v2 = vld [vmem:[%s4923_s20 + $0x120] sm:$0xff] }
  0x70   : > { %8107 = vst [vmem:[#allocation10_spill] sm:$0xff] %v5199_v2 }
  0x71   : > { %v5152_v14 = vsel %vm1513_vm0, %v3953_v49, %v4240_v12  ;;  %v5155_v18 = vsel %vm1513_vm0, %v3954_v50, %v4241_v11  ;;  %v4412_v49 = vpack.i.bf16 %v3962_v39, %v3961_v32  ;;  %v5191_v50 = vld [vmem:[%s4923_s20 + $0x138] sm:$0xff]  ;;  %v3967_v11 = vld [vmem:[%s4923_s20 + $0x108] sm:$0xff]  ;;  %v3968_v12 = vld [vmem:[%s4923_s20 + $0x110] sm:$0xff] }
  0x74   : > { %4408 = vrot.lane.b32.xlu2 %v4407_v13, %s4875_s23 }
  0x75   : > { %4403 = vrot.lane.b32.xlu1 %v4402_v22, %s4875_s23  ;;  %4398 = vrot.lane.b32.xlu0 %v4397_v23, %s4875_s23  ;;  %v5208_v23 = vpack.i.bf16 %v5196_v57, %v5191_v50 }
  0x76   : > { %v4244_v30 = vpop.permute.xlu2 %4243 }
  0x77   : > { %v4246_v40 = vunpack.i.h.bf16 %v4244_v30  ;;  %v4245_v41 = vunpack.i.l.bf16 %v4244_v30  ;;  %8109 = vst [vmem:[#allocation12_spill] sm:$0xff] %v5208_v23 }
  0x79   : > { %v5181_v46 = vsel %vm1513_vm0, %v3955_v5, %v4245_v41  ;;  %v5184_v47 = vsel %vm1513_vm0, %v3956_v10, %v4246_v40  ;;  %v5202_v10 = vld [vmem:[%s4923_s20 + $0x128] sm:$0xff] }
  0x7a   : > { %8108 = vst [vmem:[#allocation11_spill] sm:$0xff] %v5202_v10  ;;  %v5218_v41 = vpack.i.bf16 %v5202_v10, %v5199_v2 }
  0x7c   : > { %4423 = vrot.lane.b32.xlu2 %v5178_v45, %s4875_s23  ;;  %8110 = vst [vmem:[#allocation13_spill] sm:$0xff] %v5218_v41 }
  0x7d   : > { %4418 = vrot.lane.b32.xlu1 %v4417_v48, %s4875_s23  ;;  %4413 = vrot.lane.b32.xlu0 %v4412_v49, %s4875_s23  ;;  %v5220_v48 = vpack.i.bf16 %v3968_v12, %v3967_v11  ;;  %v3977_v49 = vld [vmem:[%s4923_s20 + $0x180] sm:$0xff] }
  0x7e   : > { %v4259_v5 = vpop.permute.xlu2 %4258 }
  0x7f   : > { %v4261_v13 = vunpack.i.h.bf16 %v4259_v5  ;;  %v4260_v22 = vunpack.i.l.bf16 %v4259_v5  ;;  %8111 = vst [vmem:[#allocation14_spill] sm:$0xff] %v5220_v48  ;;  %v5231_v5 = vld [vmem:[%s4923_s20 + $0x168] sm:$0xff] }
  0x81   : > { %v5211_v30 = vsel %vm1513_vm0, %v3961_v32, %v4260_v22  ;;  %v5214_v40 = vsel %vm1513_vm0, %v3962_v39, %v4261_v13  ;;  %v3978_v32 = vld [vmem:[%s4923_s20 + $0x188] sm:$0xff]  ;;  %v5234_v13 = vld [vmem:[%s4923_s20 + $0x170] sm:$0xff] }
  0x82   : > { %v3973_v22 = vld [vmem:[%s4923_s20 + $0x150] sm:$0xff]  ;;  %v4452_v10 = vpack.i.bf16 %v3978_v32, %v3977_v49  ;;  %v4447_v2 = vpack.i.bf16 %v5234_v13, %v5231_v5 }
  0x83   : > { %v5248_v8 = vpack.i.bf16 %v3974_v36, %v3973_v22 }
  0x84   : > { %4438 = vrot.lane.b32.xlu2 %v5208_v23, %s4875_s23 }
  0x85   : > { %4433 = vrot.lane.b32.xlu1 %v5218_v41, %s4875_s23  ;;  %4428 = vrot.lane.b32.xlu0 %v5220_v48, %s4875_s23 }
  0x86   : > { %v4274_v39 = vpop.permute.xlu2 %4273 }
  0x87   : > { %v4276_v58 = vunpack.i.h.bf16 %v4274_v39  ;;  %v4275_v59 = vunpack.i.l.bf16 %v4274_v39  ;;  %v4229_v20 = vpop.permute.xlu1 %4228  ;;  %v5238_v19 = vpop.permute.xlu0 %4218 }
  0x88   : > { %v4231_v23 = vunpack.i.h.bf16 %v4229_v20  ;;  %v4230_v45 = vunpack.i.l.bf16 %v4229_v20 }
  0x89   : > { %v5241_v41 = vsel %vm1513_vm0, %v3967_v11, %v4275_v59  ;;  %v5244_v48 = vsel %vm1513_vm0, %v3968_v12, %v4276_v58 }
  0x8a   : > { %v5252_v39 = vsel %vm1513_vm0, %v5117_v55, %v4230_v45  ;;  %v5256_v6 = vsel %vm1513_vm0, %v5120_v56, %v4231_v23 }
  0x8c   : > { %4453 = vrot.lane.b32.xlu2 %v4452_v10, %s4875_s23 }
  0x8d   : > { %4448 = vrot.lane.b32.xlu1 %v4447_v2, %s4875_s23  ;;  %4443 = vrot.lane.b32.xlu0 %v5248_v8, %s4875_s23 }
  0x8e   : > { %v4289_v20 = vpop.permute.xlu2 %4288 }
  0x8f   : > { %v4291_v58 = vunpack.i.h.bf16 %v4289_v20  ;;  %v4290_v59 = vunpack.i.l.bf16 %v4289_v20  ;;  %v5262_v11 = vpop.permute.xlu1 %4233  ;;  %v4224_v12 = vpop.permute.xlu0 %4223 }
  0x90   : > { %v4226_v56 = vunpack.i.h.bf16 %v4224_v12  ;;  %v4225_v23 = vunpack.i.l.bf16 %v4224_v12 }
  0x91   : > { %v5265_v55 = vsel %vm1513_vm0, %v3973_v22, %v4290_v59  ;;  %v5268_v45 = vsel %vm1513_vm0, %v3974_v36, %v4291_v58 }
  0x92   : > { %v1516_v36 = vsel %vm1513_vm0, %v5091_v37, %v4225_v23  ;;  %v1517_v20 = vsel %vm1513_vm0, %v5097_v38, %v4226_v56 }
  0x94   : > { %4468 = vrot.lane.b32.xlu2 %v4948_v16, %s4876_s24 }
  0x95   : > { %4463 = vrot.lane.b32.xlu1 %v4933_v7, %s4876_s24  ;;  %4458 = vrot.lane.b32.xlu0 %v4950_v17, %s4876_s24 }
  0x96   : > { %v4304_v2 = vpop.permute.xlu2 %4303 }
  0x97   : > { %v4306_v10 = vunpack.i.h.bf16 %v4304_v2  ;;  %v4305_v49 = vunpack.i.l.bf16 %v4304_v2  ;;  %v4254_v32 = vpop.permute.xlu1 %4253  ;;  %v5276_v22 = vpop.permute.xlu0 %4248 }
  0x98   : > { %v4255_v23 = vunpack.i.l.bf16 %v4254_v32 }
  0x99   : > { %v5283_v16 = vsel %vm1546_vm1, %v1516_v36, %v4305_v49  ;;  %v5286_v7 = vsel %vm1546_vm1, %v1517_v20, %v4306_v10  ;;  %v4221_v36 = vunpack.i.h.bf16 %v5238_v19  ;;  %v4220_v20 = vunpack.i.l.bf16 %v5238_v19 }
  0x9c   : > { %4483 = vrot.lane.b32.xlu2 %v4968_v26, %s4876_s24  ;;  %v4256_v26 = vunpack.i.h.bf16 %v4254_v32 }
  0x9d   : > { %4478 = vrot.lane.b32.xlu1 %v4946_v15, %s4876_s24  ;;  %4473 = vrot.lane.b32.xlu0 %v4928_v3, %s4876_s24 }
  0x9e   : > { %v4319_v17 = vpop.permute.xlu2 %4318 }
  0x9f   : > { %v4321_v37 = vunpack.i.h.bf16 %v4319_v17  ;;  %v4320_v58 = vunpack.i.l.bf16 %v4319_v17  ;;  %v4269_v59 = vpop.permute.xlu1 %4268  ;;  %v5294_v38 = vpop.permute.xlu0 %4263 }
  0xa0   : > { %v4270_v32 = vunpack.i.l.bf16 %v4269_v59 }
  0xa1   : > { %v5298_v12 = vsel %vm1546_vm1, %v5152_v14, %v4320_v58  ;;  %v5302_v56 = vsel %vm1546_vm1, %v5155_v18, %v4321_v37  ;;  %v1528_v18 = vsel %vm1513_vm0, %v5132_v63, %v4255_v23  ;;  %v199_v63 = vld [vmem:[%s4923_s20] sm:$0xff] }
  0xa4   : > { %4498 = vrot.lane.b32.xlu2 %v4986_v35, %s4876_s24  ;;  %v1529_v35 = vsel %vm1513_vm0, %v5139_v0, %v4256_v26  ;;  %v200_v0 = vld [vmem:[%s4923_s20 + $0x8] sm:$0xff] }
  0xa5   : > { %4493 = vrot.lane.b32.xlu1 %v4964_v24, %s4876_s24  ;;  %4488 = vrot.lane.b32.xlu0 %v4966_v25, %s4876_s24  ;;  %v4271_v25 = vunpack.i.h.bf16 %v4269_v59 }
  0xa6   : > { %v4334_v3 = vpop.permute.xlu2 %4333 }
  0xa7   : > { %v4336_v15 = vunpack.i.h.bf16 %v4334_v3  ;;  %v4335_v14 = vunpack.i.l.bf16 %v4334_v3  ;;  %v4284_v2 = vpop.permute.xlu1 %4283  ;;  %v5310_v10 = vpop.permute.xlu0 %4278  ;;  %v1535_v19 = vsel %vm1513_vm0, %v5166_v28, %v4271_v25 }
  0xa8   : > { %v4286_v25 = vunpack.i.h.bf16 %v4284_v2 }
  0xa9   : > { %v5317_v49 = vsel %vm1546_vm1, %v1528_v18, %v4335_v14  ;;  %v5320_v24 = vsel %vm1546_vm1, %v1529_v35, %v4336_v15  ;;  %v1515_v15 = vsel %vm1513_vm0, %v200_v0, %v4221_v36  ;;  %v4235_v35 = vunpack.i.l.bf16 %v5262_v11  ;;  %v4009_v0 = vld [vmem:[%s4923_s20 + $0x181] sm:$0xff] }
  0xab   : > { %v1520_v36 = vsel %vm1513_vm0, %v5111_v52, %v4235_v35 }
  0xac   : > { %4513 = vrot.lane.b32.xlu2 %v5004_v44, %s4876_s24  ;;  %v1534_v44 = vsel %vm1513_vm0, %v5161_v27, %v4270_v32  ;;  %v4285_v32 = vunpack.i.l.bf16 %v4284_v2 }
  0xad   : > { %4508 = vrot.lane.b32.xlu1 %v4982_v33, %s4876_s24  ;;  %4503 = vrot.lane.b32.xlu0 %v4984_v34, %s4876_s24  ;;  %v1514_v33 = vsel %vm1513_vm0, %v199_v63, %v4220_v20  ;;  %v4236_v20 = vunpack.i.h.bf16 %v5262_v11 }
  0xae   : > { %v4349_v17 = vpop.permute.xlu2 %4348  ;;  %v1540_v2 = vsel %vm1513_vm0, %v5191_v50, %v4285_v32 }
  0xaf   : > { %v4351_v37 = vunpack.i.h.bf16 %v4349_v17  ;;  %v4350_v58 = vunpack.i.l.bf16 %v4349_v17  ;;  %v4299_v26 = vpop.permute.xlu1 %4298  ;;  %v5332_v59 = vpop.permute.xlu0 %4293  ;;  %v4010_v17 = vld [vmem:[%s4923_s20 + $0x189] sm:$0xff]  ;;  %v1521_v52 = vsel %vm1513_vm0, %v5114_v54, %v4236_v20  ;;  %v4251_v54 = vunpack.i.h.bf16 %v5276_v22 }
  0xb0   : > { %v4301_v23 = vunpack.i.h.bf16 %v4299_v26  ;;  %v4300_v3 = vunpack.i.l.bf16 %v4299_v26  ;;  %v5372_v50 = vpack.i.bf16 %v4010_v17, %v4009_v0 }
  0xb1   : > { %v5341_v14 = vsel %vm1546_vm1, %v1534_v44, %v4350_v58  ;;  %v5344_v18 = vsel %vm1546_vm1, %v1535_v19, %v4351_v37 }
  0xb2   : > { %v1547_v27 = vsel %vm1546_vm1, %v1514_v33, %v4300_v3  ;;  %v1548_v28 = vsel %vm1546_vm1, %v1515_v15, %v4301_v23 }
  0xb4   : > { %4528 = vrot.lane.b32.xlu2 %v5020_v53, %s4876_s24  ;;  %v1541_v53 = vsel %vm1513_vm0, %v5196_v57, %v4286_v25  ;;  %v4250_v25 = vunpack.i.l.bf16 %v5276_v22  ;;  %v1527_v22 = vsel %vm1513_vm0, %v5145_v4, %v4251_v54  ;;  %v4266_v4 = vunpack.i.h.bf16 %v5294_v38 }
  0xb5   : > { %4523 = vrot.lane.b32.xlu1 %v5000_v42, %s4876_s24  ;;  %4518 = vrot.lane.b32.xlu0 %v5002_v43, %s4876_s24 }
  0xb6   : > { %v4364_v63 = vpop.permute.xlu2 %4363 }
  0xb7   : > { %v4366_v37 = vunpack.i.h.bf16 %v4364_v63  ;;  %v4365_v11 = vunpack.i.l.bf16 %v4364_v63  ;;  %v4314_v58 = vpop.permute.xlu1 %4313  ;;  %v4309_v26 = vpop.permute.xlu0 %4308 }
  0xb8   : > { %v4316_v42 = vunpack.i.h.bf16 %v4314_v58  ;;  %v4315_v44 = vunpack.i.l.bf16 %v4314_v58  ;;  %v4311_v19 = vunpack.i.h.bf16 %v4309_v26  ;;  %v4310_v43 = vunpack.i.l.bf16 %v4309_v26 }
  0xb9   : > { %v5367_v23 = vsel %vm1546_vm1, %v1540_v2, %v4365_v11  ;;  %v5370_v3 = vsel %vm1546_vm1, %v1541_v53, %v4366_v37  ;;  %v1526_v53 = vsel %vm1513_vm0, %v5142_v1, %v4250_v25 }
  0xba   : > { %v1553_v57 = vsel %vm1546_vm1, %v1520_v36, %v4315_v44  ;;  %v1554_v33 = vsel %vm1546_vm1, %v1521_v52, %v4316_v42  ;;  %v5378_v15 = vsel %vm1546_vm1, %v5252_v39, %v4310_v43  ;;  %v5382_v35 = vsel %vm1546_vm1, %v5256_v6, %v4311_v19 }
  0xbc   : > { %4543 = vrot.lane.b32.xlu2 %v5037_v62, %s4877_s25 }
  0xbd   : > { %4538 = vrot.lane.b32.xlu1 %v5018_v51, %s4877_s25  ;;  %4533 = vrot.lane.b32.xlu0 %v5372_v50, %s4876_s24 }
  0xbe   : > { %v4379_v39 = vpop.permute.xlu2 %4378 }
  0xbf   : > { %v4381_v32 = vunpack.i.h.bf16 %v4379_v39  ;;  %v4380_v20 = vunpack.i.l.bf16 %v4379_v39  ;;  %v4329_v6 = vpop.permute.xlu1 %4328  ;;  %v4324_v36 = vpop.permute.xlu0 %4323 }
  0xc0   : > { %v4331_v63 = vunpack.i.h.bf16 %v4329_v6  ;;  %v4330_v0 = vunpack.i.l.bf16 %v4329_v6  ;;  %v4326_v17 = vunpack.i.h.bf16 %v4324_v36  ;;  %v4325_v2 = vunpack.i.l.bf16 %v4324_v36 }
  0xc1   : > { %v5397_v51 = vsel %vm1579_vm2, %v1547_v27, %v4380_v20  ;;  %v5400_v37 = vsel %vm1579_vm2, %v1548_v28, %v4381_v32  ;;  %v4265_v27 = vunpack.i.l.bf16 %v5294_v38  ;;  %v1533_v38 = vsel %vm1513_vm0, %v5172_v31, %v4266_v4  ;;  %v8113_v20 = vld [vmem:[#allocation3_spill] sm:$0xff] }
  0xc2   : > { %v1559_v11 = vsel %vm1546_vm1, %v1526_v53, %v4330_v0  ;;  %v1560_v58 = vsel %vm1546_vm1, %v1527_v22, %v4331_v63  ;;  %v5406_v26 = vsel %vm1546_vm1, %v5181_v46, %v4325_v2  ;;  %v5410_v1 = vsel %vm1546_vm1, %v5184_v47, %v4326_v17  ;;  %v8115_v4 = vld [vmem:[#allocation11_spill] sm:$0xff] }
  0xc3   : > { %v4281_v31 = vunpack.i.h.bf16 %v5310_v10 }
  0xc4   : > { %4558 = vrot.lane.b32.xlu2 %v5055_v9, %s4877_s25  ;;  %v1532_v9 = vsel %vm1513_vm0, %v5169_v29, %v4265_v27 }
  0xc5   : > { %4553 = vrot.lane.b32.xlu1 %v5033_v60, %s4877_s25  ;;  %4548 = vrot.lane.b32.xlu0 %v5035_v61, %s4877_s25 }
  0xc6   : > { %v4394_v28 = vpop.permute.xlu2 %4393 }
  0xc7   : > { %v4396_v46 = vunpack.i.h.bf16 %v4394_v28  ;;  %v4395_v42 = vunpack.i.l.bf16 %v4394_v28  ;;  %v4344_v44 = vpop.permute.xlu1 %4343  ;;  %v4339_v19 = vpop.permute.xlu0 %4338 }
  0xc8   : > { %v4346_v47 = vunpack.i.h.bf16 %v4344_v44  ;;  %v4345_v43 = vunpack.i.l.bf16 %v4344_v44  ;;  %v4341_v52 = vunpack.i.h.bf16 %v4339_v19  ;;  %v4340_v54 = vunpack.i.l.bf16 %v4339_v19 }
  0xc9   : > { %v5425_v60 = vsel %vm1579_vm2, %v1553_v57, %v4395_v42  ;;  %v5428_v61 = vsel %vm1579_vm2, %v1554_v33, %v4396_v46  ;;  %v4280_v57 = vunpack.i.l.bf16 %v5310_v10  ;;  %v8112_v33 = vld [vmem:[#allocation2_spill] sm:$0xff]  ;;  %v1539_v10 = vsel %vm1513_vm0, %v8115_v4, %v4281_v31 }
  0xca   : > { %v1565_v25 = vsel %vm1546_vm1, %v1532_v9, %v4345_v43  ;;  %v1566_v39 = vsel %vm1546_vm1, %v1533_v38, %v4346_v47  ;;  %v5434_v32 = vsel %vm1546_vm1, %v5211_v30, %v4340_v54  ;;  %v5438_v29 = vsel %vm1546_vm1, %v5214_v40, %v4341_v52  ;;  %v8116_v47 = vld [vmem:[#allocation9_spill] sm:$0xff]  ;;  %v8117_v43 = vld [vmem:[#allocation4_spill] sm:$0xff] }
  0xcb   : > { %v8118_v52 = vld [vmem:[#allocation5_spill] sm:$0xff] }
  0xcc   : > { %4573 = vrot.lane.b32.xlu2 %v5073_v21, %s4877_s25  ;;  %v8114_v21 = vld [vmem:[#allocation10_spill] sm:$0xff] }
  0xcd   : > { %4568 = vrot.lane.b32.xlu1 %v8112_v33, %s4877_s25  ;;  %4563 = vrot.lane.b32.xlu0 %v8113_v20, %s4877_s25  ;;  %v1538_v22 = vsel %vm1513_vm0, %v8114_v21, %v4280_v57 }
  0xce   : > { %v4409_v6 = vpop.permute.xlu2 %4408 }
  0xcf   : > { %v4411_v30 = vunpack.i.h.bf16 %v4409_v6  ;;  %v4410_v36 = vunpack.i.l.bf16 %v4409_v6  ;;  %v4359_v63 = vpop.permute.xlu1 %4358  ;;  %v4354_v0 = vpop.permute.xlu0 %4353 }
  0xd0   : > { %v4361_v40 = vunpack.i.h.bf16 %v4359_v63  ;;  %v4360_v17 = vunpack.i.l.bf16 %v4359_v63  ;;  %v4356_v2 = vunpack.i.h.bf16 %v4354_v0  ;;  %v4355_v53 = vunpack.i.l.bf16 %v4354_v0 }
  0xd1   : > { %v5453_v27 = vsel %vm1579_vm2, %v1559_v11, %v4410_v36  ;;  %v5456_v28 = vsel %vm1579_vm2, %v1560_v58, %v4411_v30  ;;  %v4296_v11 = vunpack.i.h.bf16 %v5332_v59  ;;  %v4295_v58 = vunpack.i.l.bf16 %v5332_v59 }
  0xd2   : > { %v1571_v46 = vsel %vm1546_vm1, %v1538_v22, %v4360_v17  ;;  %v1572_v42 = vsel %vm1546_vm1, %v1539_v10, %v4361_v40  ;;  %v5462_v44 = vsel %vm1546_vm1, %v5241_v41, %v4355_v53  ;;  %v5466_v19 = vsel %vm1546_vm1, %v5244_v48, %v4356_v2  ;;  %v4076_v17 = vld [vmem:[%s4923_s20 + $0x39] sm:$0xff] }
  0xd3   : > { %v1544_v59 = vsel %vm1513_vm0, %v5231_v5, %v4295_v58  ;;  %v1545_v6 = vsel %vm1513_vm0, %v5234_v13, %v4296_v11  ;;  %v8119_v13 = vld [vmem:[#allocation8_spill] sm:$0xff] }
  0xd4   : > { %4588 = vrot.lane.b32.xlu2 %v8116_v47, %s4878_s26 }
  0xd5   : > { %4583 = vrot.lane.b32.xlu1 %v8117_v43, %s4877_s25  ;;  %4578 = vrot.lane.b32.xlu0 %v8118_v52, %s4877_s25 }
  0xd6   : > { %v4424_v41 = vpop.permute.xlu2 %4423 }
  0xd7   : > { %v4426_v54 = vunpack.i.h.bf16 %v4424_v41  ;;  %v4425_v9 = vunpack.i.l.bf16 %v4424_v41  ;;  %v4374_v38 = vpop.permute.xlu1 %4373  ;;  %v4369_v48 = vpop.permute.xlu0 %4368 }
  0xd8   : > { %v4376_v31 = vunpack.i.h.bf16 %v4374_v38  ;;  %v4375_v57 = vunpack.i.l.bf16 %v4374_v38  ;;  %v4371_v33 = vunpack.i.h.bf16 %v4369_v48  ;;  %v4370_v20 = vunpack.i.l.bf16 %v4369_v48 }
  0xd9   : > { %v5481_v30 = vsel %vm1579_vm2, %v1565_v25, %v4425_v9  ;;  %v5484_v36 = vsel %vm1579_vm2, %v1566_v39, %v4426_v54  ;;  %v4075_v39 = vld [vmem:[%s4923_s20 + $0x31] sm:$0xff] }
  0xda   : > { %v1577_v63 = vsel %vm1546_vm1, %v1544_v59, %v4375_v57  ;;  %v1578_v0 = vsel %vm1546_vm1, %v1545_v6, %v4376_v31  ;;  %v5490_v40 = vsel %vm1546_vm1, %v5265_v55, %v4370_v20  ;;  %v5494_v5 = vsel %vm1546_vm1, %v5268_v45, %v4371_v33  ;;  %v4094_v54 = vld [vmem:[%s4923_s20 + $0x111] sm:$0xff] }
  0xdc   : > { %4603 = vrot.lane.b32.xlu2 %v8119_v13, %s4878_s26 }
  0xdd   : > { %4598 = vrot.lane.b32.xlu1 %v8117_v43, %s4879_s27  ;;  %4593 = vrot.lane.b32.xlu0 %v4984_v34, %s4880_s28  ;;  %v4607_v34 = vpack.i.bf16 %v4076_v17, %v4075_v39  ;;  %v4077_v17 = vld [vmem:[%s4923_s20 + $0x49] sm:$0xff] }
  0xde   : > { %v4439_v25 = vpop.permute.xlu2 %4438 }
  0xdf   : > { %v4441_v55 = vunpack.i.h.bf16 %v4439_v25  ;;  %v4440_v2 = vunpack.i.l.bf16 %v4439_v25  ;;  %v4389_v53 = vpop.permute.xlu1 %4388  ;;  %v4384_v21 = vpop.permute.xlu0 %4383 }
  0xe0   : > { %v4391_v45 = vunpack.i.h.bf16 %v4389_v53  ;;  %v4390_v22 = vunpack.i.l.bf16 %v4389_v53  ;;  %v4386_v4 = vunpack.i.h.bf16 %v4384_v21  ;;  %v4385_v10 = vunpack.i.l.bf16 %v4384_v21 }
  0xe1   : > { %v5505_v47 = vsel %vm1579_vm2, %v1571_v46, %v4440_v2  ;;  %v5508_v11 = vsel %vm1579_vm2, %v1572_v42, %v4441_v55  ;;  %v8120_v46 = vld [vmem:[#allocation14_spill] sm:$0xff]  ;;  %v4093_v42 = vld [vmem:[%s4923_s20 + $0x109] sm:$0xff]  ;;  %v4078_v55 = vld [vmem:[%s4923_s20 + $0x51] sm:$0xff] }
  0xe2   : > { %v1584_v58 = vsel %vm1579_vm2, %v5378_v15, %v4390_v22  ;;  %v1585_v43 = vsel %vm1579_vm2, %v5382_v35, %v4391_v45  ;;  %v5516_v52 = vsel %vm1579_vm2, %v5283_v16, %v4385_v10  ;;  %v5520_v41 = vsel %vm1579_vm2, %v5286_v7, %v4386_v4 }
  0xe3   : > { %v4622_v20 = vpack.i.bf16 %v4094_v54, %v4093_v42 }
  0xe4   : > { %4618 = vrot.lane.b32.xlu2 %v8120_v46, %s4878_s26 }
  0xe5   : > { %4613 = vrot.lane.b32.xlu1 %v5037_v62, %s4879_s27  ;;  %4608 = vrot.lane.b32.xlu0 %v4607_v34, %s4880_s28 }
  0xe6   : > { %v4454_v15 = vpop.permute.xlu2 %4453 }
  0xe7   : > { %v4456_v35 = vunpack.i.h.bf16 %v4454_v15  ;;  %v4455_v9 = vunpack.i.l.bf16 %v4454_v15  ;;  %v4404_v38 = vpop.permute.xlu1 %4403  ;;  %v4399_v16 = vpop.permute.xlu0 %4398  ;;  %v4637_v15 = vpack.i.bf16 %v4078_v55, %v4077_v17 }
  0xe8   : > { %v4406_v48 = vunpack.i.h.bf16 %v4404_v38  ;;  %v4405_v31 = vunpack.i.l.bf16 %v4404_v38  ;;  %v4401_v7 = vunpack.i.h.bf16 %v4399_v16  ;;  %v4400_v57 = vunpack.i.l.bf16 %v4399_v16  ;;  %v4096_v38 = vld [vmem:[%s4923_s20 + $0x129] sm:$0xff] }
  0xe9   : > { %v5530_v33 = vsel %vm1579_vm2, %v1577_v63, %v4455_v9  ;;  %v5533_v62 = vsel %vm1579_vm2, %v1578_v0, %v4456_v35  ;;  %v8121_v63 = vld [vmem:[#allocation7_spill] sm:$0xff]  ;;  %v8122_v0 = vld [vmem:[#allocation6_spill] sm:$0xff] }
  0xea   : > { %v1590_v59 = vsel %vm1579_vm2, %v5406_v26, %v4405_v31  ;;  %v1591_v6 = vsel %vm1579_vm2, %v5410_v1, %v4406_v48  ;;  %v5541_v13 = vsel %vm1579_vm2, %v5298_v12, %v4400_v57  ;;  %v5545_v25 = vsel %vm1579_vm2, %v5302_v56, %v4401_v7  ;;  %v4109_v26 = vld [vmem:[%s4923_s20 + $0x4a] sm:$0xff]  ;;  %v4110_v1 = vld [vmem:[%s4923_s20 + $0x52] sm:$0xff] }
  0xeb   : > { %v4642_v46 = vpack.i.bf16 %v4110_v1, %v4109_v26  ;;  %v4128_v9 = vld [vmem:[%s4923_s20 + $0x12a] sm:$0xff] }
  0xec   : > { %4633 = vrot.lane.b32.xlu2 %v8121_v63, %s4878_s26 }
  0xed   : > { %4628 = vrot.lane.b32.xlu1 %v8122_v0, %s4879_s27  ;;  %4623 = vrot.lane.b32.xlu0 %v4622_v20, %s4880_s28 }
  0xee   : > { %v4469_v39 = vpop.permute.xlu2 %4468 }
  0xef   : > { %v4471_v12 = vunpack.i.h.bf16 %v4469_v39  ;;  %v4470_v2 = vunpack.i.l.bf16 %v4469_v39  ;;  %v4419_v53 = vpop.permute.xlu1 %4418  ;;  %v4414_v56 = vpop.permute.xlu0 %4413 }
  0xf0   : > { %v4421_v21 = vunpack.i.h.bf16 %v4419_v53  ;;  %v4420_v45 = vunpack.i.l.bf16 %v4419_v53  ;;  %v4416_v22 = vunpack.i.h.bf16 %v4414_v56  ;;  %v4415_v4 = vunpack.i.l.bf16 %v4414_v56  ;;  %v4047_v56 = vld [vmem:[%s4923_s20 + $0x60] sm:$0xff] }
  0xf1   : > { %v5557_v10 = vsel %vm1612_vm3, %v1584_v58, %v4470_v2  ;;  %v5560_v34 = vsel %vm1612_vm3, %v1585_v43, %v4471_v12  ;;  %v4127_v43 = vld [vmem:[%s4923_s20 + $0x122] sm:$0xff]  ;;  %v8123_v2 = vld [vmem:[#allocation13_spill] sm:$0xff] }
  0xf2   : > { %v5564_v42 = vsel %vm1579_vm2, %v5434_v32, %v4420_v45  ;;  %v5568_v54 = vsel %vm1579_vm2, %v5438_v29, %v4421_v21  ;;  %v5572_v35 = vsel %vm1579_vm2, %v5317_v49, %v4415_v4  ;;  %v5576_v58 = vsel %vm1579_vm2, %v5320_v24, %v4416_v22  ;;  %v4095_v29 = vld [vmem:[%s4923_s20 + $0x121] sm:$0xff] }
  0xf3   : > { %v4662_v24 = vpack.i.bf16 %v4128_v9, %v4127_v43  ;;  %v4657_v39 = vpack.i.bf16 %v4096_v38, %v4095_v29 }
  0xf4   : > { %4648 = vrot.lane.b32.xlu2 %v8122_v0, %s4877_s25 }
  0xf5   : > { %4643 = vrot.lane.b32.xlu1 %v4642_v46, %s4879_s27  ;;  %4638 = vrot.lane.b32.xlu0 %v4637_v15, %s4880_s28 }
  0xf6   : > { %v4484_v32 = vpop.permute.xlu2 %4483 }
  0xf7   : > { %v4486_v16 = vunpack.i.h.bf16 %v4484_v32  ;;  %v4485_v48 = vunpack.i.l.bf16 %v4484_v32  ;;  %v4434_v49 = vpop.permute.xlu1 %4433  ;;  %v4429_v31 = vpop.permute.xlu0 %4428 }
  0xf8   : > { %v4436_v7 = vunpack.i.h.bf16 %v4434_v49  ;;  %v4435_v57 = vunpack.i.l.bf16 %v4434_v49  ;;  %v4431_v20 = vunpack.i.h.bf16 %v4429_v31  ;;  %v4430_v63 = vunpack.i.l.bf16 %v4429_v31  ;;  %v4098_v49 = vld [vmem:[%s4923_s20 + $0x141] sm:$0xff] }
  0xf9   : > { %v5587_v0 = vsel %vm1612_vm3, %v1590_v59, %v4485_v48  ;;  %v5590_v26 = vsel %vm1612_vm3, %v1591_v6, %v4486_v16  ;;  %v4111_v59 = vld [vmem:[%s4923_s20 + $0x62] sm:$0xff]  ;;  %v4112_v6 = vld [vmem:[%s4923_s20 + $0x6a] sm:$0xff]  ;;  %v4097_v48 = vld [vmem:[%s4923_s20 + $0x139] sm:$0xff] }
  0xfa   : > { %v1602_v1 = vsel %vm1579_vm2, %v5462_v44, %v4435_v57  ;;  %v1603_v17 = vsel %vm1579_vm2, %v5466_v19, %v4436_v7  ;;  %v5598_v55 = vsel %vm1579_vm2, %v5341_v14, %v4430_v63  ;;  %v5602_v12 = vsel %vm1579_vm2, %v5344_v18, %v4431_v20  ;;  %v4079_v44 = vld [vmem:[%s4923_s20 + $0x61] sm:$0xff]  ;;  %v4080_v19 = vld [vmem:[%s4923_s20 + $0x69] sm:$0xff] }
  0xfb   : > { %v4048_v14 = vld [vmem:[%s4923_s20 + $0x68] sm:$0xff]  ;;  %v4677_v45 = vpack.i.bf16 %v4112_v6, %v4111_v59  ;;  %v4672_v43 = vpack.i.bf16 %v4080_v19, %v4079_v44  ;;  %v4692_v57 = vpack.i.bf16 %v4098_v49, %v4097_v48 }
  0xfc   : > { %4663 = vrot.lane.b32.xlu2 %v4662_v24, %s4879_s27  ;;  %v4667_v9 = vpack.i.bf16 %v4048_v14, %v4047_v56  ;;  %v8124_v14 = vld [vmem:[#allocation12_spill] sm:$0xff] }
  0xfd   : > { %4658 = vrot.lane.b32.xlu1 %v4657_v39, %s4880_s28  ;;  %4653 = vrot.lane.b32.xlu0 %v8123_v2, %s4878_s26 }
  0xfe   : > { %v5611_v53 = vpop.permute.xlu2 %4498 }
  0xff   : > { %v4449_v21 = vpop.permute.xlu1 %4448  ;;  %v4444_v18 = vpop.permute.xlu0 %4443 }
 0x100   : > { %v4451_v22 = vunpack.i.h.bf16 %v4449_v21  ;;  %v4450_v4 = vunpack.i.l.bf16 %v4449_v21  ;;  %v4446_v46 = vunpack.i.h.bf16 %v4444_v18  ;;  %v4445_v15 = vunpack.i.l.bf16 %v4444_v18  ;;  %v4050_v21 = vld [vmem:[%s4923_s20 + $0x80] sm:$0xff] }
 0x101   : > { %v4129_v18 = vld [vmem:[%s4923_s20 + $0x13a] sm:$0xff] }
 0x102   : > { %v1608_v32 = vsel %vm1579_vm2, %v5490_v40, %v4450_v4  ;;  %v1609_v29 = vsel %vm1579_vm2, %v5494_v5, %v4451_v22  ;;  %v5622_v38 = vsel %vm1579_vm2, %v5367_v23, %v4445_v15  ;;  %v5626_v16 = vsel %vm1579_vm2, %v5370_v3, %v4446_v46 }
 0x104   : > { %4678 = vrot.lane.b32.xlu2 %v4677_v45, %s4879_s27  ;;  %v4130_v45 = vld [vmem:[%s4923_s20 + $0x142] sm:$0xff] }
 0x105   : > { %4673 = vrot.lane.b32.xlu1 %v4672_v43, %s4880_s28  ;;  %4668 = vrot.lane.b32.xlu0 %v4667_v9, %s4878_s26 }
 0x106   : > { %v4514_v40 = vpop.permute.xlu2 %4513 }
 0x107   : > { %v4516_v31 = vunpack.i.h.bf16 %v4514_v40  ;;  %v4515_v5 = vunpack.i.l.bf16 %v4514_v40  ;;  %v4464_v7 = vpop.permute.xlu1 %4463  ;;  %v4459_v23 = vpop.permute.xlu0 %4458 }
 0x108   : > { %v4466_v20 = vunpack.i.h.bf16 %v4464_v7  ;;  %v4465_v3 = vunpack.i.l.bf16 %v4464_v7  ;;  %v4461_v63 = vunpack.i.h.bf16 %v4459_v23  ;;  %v4460_v39 = vunpack.i.l.bf16 %v4459_v23 }
 0x109   : > { %v5634_v59 = vsel %vm1612_vm3, %v1602_v1, %v4515_v5  ;;  %v5637_v6 = vsel %vm1612_vm3, %v1603_v17, %v4516_v31  ;;  %v4081_v1 = vld [vmem:[%s4923_s20 + $0x79] sm:$0xff]  ;;  %v4082_v17 = vld [vmem:[%s4923_s20 + $0x81] sm:$0xff]  ;;  %v4697_v31 = vpack.i.bf16 %v4130_v45, %v4129_v18  ;;  %v4099_v45 = vld [vmem:[%s4923_s20 + $0x151] sm:$0xff] }
 0x10a   : > { %v5641_v2 = vsel %vm1612_vm3, %v5516_v52, %v4465_v3  ;;  %v5645_v44 = vsel %vm1612_vm3, %v5520_v41, %v4466_v20  ;;  %v5649_v19 = vsel %vm1612_vm3, %v5397_v51, %v4460_v39  ;;  %v5653_v56 = vsel %vm1612_vm3, %v5400_v37, %v4461_v63  ;;  %v4049_v52 = vld [vmem:[%s4923_s20 + $0x78] sm:$0xff] }
 0x10b   : > { %v4707_v37 = vpack.i.bf16 %v4082_v17, %v4081_v1  ;;  %v4702_v40 = vpack.i.bf16 %v4050_v21, %v4049_v52  ;;  %v4131_v21 = vld [vmem:[%s4923_s20 + $0x152] sm:$0xff] }
 0x10c   : > { %4693 = vrot.lane.b32.xlu2 %v4692_v57, %s4880_s28 }
 0x10d   : > { %4688 = vrot.lane.b32.xlu1 %v8124_v14, %s4878_s26  ;;  %4683 = vrot.lane.b32.xlu0 %v4662_v24, %s4877_s25 }
 0x10e   : > { %v4529_v41 = vpop.permute.xlu2 %4528 }
 0x10f   : > { %v4531_v51 = vunpack.i.h.bf16 %v4529_v41  ;;  %v4530_v22 = vunpack.i.l.bf16 %v4529_v41  ;;  %v4479_v4 = vpop.permute.xlu1 %4478  ;;  %v4474_v46 = vpop.permute.xlu0 %4473  ;;  %v4051_v41 = vld [vmem:[%s4923_s20 + $0x90] sm:$0xff] }
 0x110   : > { %v4481_v15 = vunpack.i.h.bf16 %v4479_v4  ;;  %v4480_v43 = vunpack.i.l.bf16 %v4479_v4  ;;  %v4476_v9 = vunpack.i.h.bf16 %v4474_v46  ;;  %v4475_v48 = vunpack.i.l.bf16 %v4474_v46 }
 0x111   : > { %v5666_v49 = vsel %vm1612_vm3, %v1608_v32, %v4530_v22  ;;  %v5669_v24 = vsel %vm1612_vm3, %v1609_v29, %v4531_v51  ;;  %v4114_v29 = vld [vmem:[%s4923_s20 + $0x82] sm:$0xff] }
 0x112   : > { %v1621_v5 = vsel %vm1612_vm3, %v5541_v13, %v4480_v43  ;;  %v1622_v7 = vsel %vm1612_vm3, %v5545_v25, %v4481_v15  ;;  %v5677_v23 = vsel %vm1612_vm3, %v5425_v60, %v4475_v48  ;;  %v5681_v57 = vsel %vm1612_vm3, %v5428_v61, %v4476_v9  ;;  %v4113_v13 = vld [vmem:[%s4923_s20 + $0x7a] sm:$0xff] }
 0x113   : > { %v4712_v39 = vpack.i.bf16 %v4114_v29, %v4113_v13  ;;  %v4115_v13 = vld [vmem:[%s4923_s20 + $0x92] sm:$0xff]  ;;  %v4116_v29 = vld [vmem:[%s4923_s20 + $0x9a] sm:$0xff] }
 0x114   : > { %4708 = vrot.lane.b32.xlu2 %v4707_v37, %s4880_s28 }
 0x115   : > { %4703 = vrot.lane.b32.xlu1 %v4702_v40, %s4878_s26  ;;  %4698 = vrot.lane.b32.xlu0 %v4697_v31, %s4879_s27 }
 0x116   : > { %v5686_v32 = vpop.permute.xlu2 %4543 }
 0x117   : > { %v4494_v25 = vpop.permute.xlu1 %4493  ;;  %v4489_v60 = vpop.permute.xlu0 %4488 }
 0x118   : > { %v4496_v20 = vunpack.i.h.bf16 %v4494_v25  ;;  %v4495_v3 = vunpack.i.l.bf16 %v4494_v25  ;;  %v4491_v61 = vunpack.i.h.bf16 %v4489_v60  ;;  %v4490_v63 = vunpack.i.l.bf16 %v4489_v60  ;;  %v4083_v25 = vld [vmem:[%s4923_s20 + $0x91] sm:$0xff] }
 0x119   : > { %v4747_v60 = vpack.i.bf16 %v4116_v29, %v4115_v13  ;;  %v4101_v13 = vld [vmem:[%s4923_s20 + $0x169] sm:$0xff] }
 0x11a   : > { %v1627_v1 = vsel %vm1612_vm3, %v5572_v35, %v4495_v3  ;;  %v1628_v17 = vsel %vm1612_vm3, %v5576_v58, %v4496_v20  ;;  %v5696_v14 = vsel %vm1612_vm3, %v5453_v27, %v4490_v63  ;;  %v5700_v52 = vsel %vm1612_vm3, %v5456_v28, %v4491_v61  ;;  %v4052_v35 = vld [vmem:[%s4923_s20 + $0x98] sm:$0xff]  ;;  %v4190_v29 = vld [vmem:[%s7922_s1 + $0x8] sm:$0xff] }
 0x11b   : > { %v4132_v58 = vld [vmem:[%s4923_s20 + $0x15a] sm:$0xff]  ;;  %v4737_v37 = vpack.i.bf16 %v4052_v35, %v4051_v41 }
 0x11c   : > { %4723 = vrot.lane.b32.xlu2 %v5248_v8, %s4878_s26  ;;  %v4100_v27 = vld [vmem:[%s4923_s20 + $0x159] sm:$0xff]  ;;  %v4732_v9 = vpack.i.bf16 %v4132_v58, %v4131_v21 }
 0x11d   : > { %4718 = vrot.lane.b32.xlu1 %v4697_v31, %s4877_s25  ;;  %4713 = vrot.lane.b32.xlu0 %v4712_v39, %s4879_s27  ;;  %v4727_v48 = vpack.i.bf16 %v4100_v27, %v4099_v45 }
 0x11e   : > { %v4559_v18 = vpop.permute.xlu2 %4558 }
 0x11f   : > { %v4561_v51 = vunpack.i.h.bf16 %v4559_v18  ;;  %v4560_v22 = vunpack.i.l.bf16 %v4559_v18  ;;  %v4509_v28 = vpop.permute.xlu1 %4508  ;;  %v5712_v4 = vpop.permute.xlu0 %4503 }
 0x120   : > { %v4511_v8 = vunpack.i.h.bf16 %v4509_v28  ;;  %v4510_v46 = vunpack.i.l.bf16 %v4509_v28 }
 0x121   : > { %v5715_v15 = vsel %vm1645_vm4, %v1621_v5, %v4560_v22  ;;  %v5718_v43 = vsel %vm1645_vm4, %v1622_v7, %v4561_v51  ;;  %v4084_v5 = vld [vmem:[%s4923_s20 + $0x99] sm:$0xff]  ;;  %v1797_v7 = vld [vmem:[%s7922_s1 + $0x10] sm:$0x3] }
 0x122   : > { %v5722_v40 = vsel %vm1612_vm3, %v5598_v55, %v4510_v46  ;;  %v5726_v31 = vsel %vm1612_vm3, %v5602_v12, %v4511_v8  ;;  %v2059_v55 = vld [vmem:[%s7923_s2 + $0x10] sm:$0x3]  ;;  %v1807_v20 = vunpack.c.l.b16 %v1797_v7  ;;  %v4742_v41 = vpack.i.bf16 %v4084_v5, %v4083_v25  ;;  %v4069_v25 = vld [vmem:[%s4923_s20 + $0x168] sm:$0xff] }
 0x123   : > { %v2069_v35 = vunpack.c.l.b16 %v2059_v55  ;;  %v4070_v5 = vld [vmem:[%s4923_s20 + $0x170] sm:$0xff] }
 0x124   : > { %4738 = vrot.lane.b32.xlu2 %v4737_v37, %s4878_s26  ;;  %v1810_v22 = vpack.c.b16 %v1807_v20, %v1807_v20 }
 0x125   : > { %4733 = vrot.lane.b32.xlu1 %v4732_v9, %s4879_s27  ;;  %4728 = vrot.lane.b32.xlu0 %v4727_v48, %s4880_s28  ;;  %v2072_v37 = vpack.c.b16 %v2069_v35, %v2069_v35  ;;  %v4134_v48 = vld [vmem:[%s4923_s20 + $0x172] sm:$0xff]  ;;  %v4191_v35 = vld [vmem:[%s7923_s2] sm:$0xff] }
 0x126   : > { %v4574_v12 = vpop.permute.xlu2 %4573 }
 0x127   : > { %v4576_v3 = vunpack.i.h.bf16 %v4574_v12  ;;  %v4575_v61 = vunpack.i.l.bf16 %v4574_v12  ;;  %v4524_v63 = vpop.permute.xlu1 %4523  ;;  %v4519_v39 = vpop.permute.xlu0 %4518 }
 0x128   : > { %v4526_v21 = vunpack.i.h.bf16 %v4524_v63  ;;  %v4525_v18 = vunpack.i.l.bf16 %v4524_v63  ;;  %v4521_v58 = vunpack.i.h.bf16 %v4519_v39  ;;  %v4520_v45 = vunpack.i.l.bf16 %v4519_v39  ;;  %v4189_v63 = vld [vmem:[%s7922_s1] sm:$0xff] }
 0x129   : > { %v5742_v27 = vsel %vm1645_vm4, %v1627_v1, %v4575_v61  ;;  %v5745_v51 = vsel %vm1645_vm4, %v1628_v17, %v4576_v3  ;;  %v1864_v17 = vsel %vm1862_vm5, %v1810_v22, 0  ;;  %v4757_v61 = vpack.i.bf16 %v4070_v5, %v4069_v25  ;;  %v4054_v22 = vld [vmem:[%s4923_s20 + $0xb0] sm:$0xff] }
 0x12a   : > { %v5749_v28 = vsel %vm1612_vm3, %v5622_v38, %v4525_v18  ;;  %v5753_v8 = vsel %vm1612_vm3, %v5626_v16, %v4526_v21  ;;  %v5757_v46 = vsel %vm1612_vm3, %v5505_v47, %v4520_v45  ;;  %v5761_v1 = vsel %vm1612_vm3, %v5508_v11, %v4521_v58  ;;  %v4133_v38 = vld [vmem:[%s4923_s20 + $0x16a] sm:$0xff]  ;;  %4193 = vmatpush.bf16.msra.mxu2 %v1864_v17 }
 0x12b   : > { %v4102_v16 = vld [vmem:[%s4923_s20 + $0x171] sm:$0xff]  ;;  %v2076_v47 = vsel %vm1862_vm5, %v2072_v37, 0  ;;  %1871 = vmatpush.bf16.msra.mxu0 %v1864_v17  ;;  %v4767_v20 = vpack.i.bf16 %v4134_v48, %v4133_v38  ;;  %v4085_v18 = vld [vmem:[%s4923_s20 + $0xa9] sm:$0xff] }
 0x12c   : > { %4753 = vrot.lane.b32.xlu2 %v4732_v9, %s4877_s25  ;;  %4196 = vmatpush.bf16.msra.mxu3 %v2076_v47  ;;  %v4192_v9 = vld [vmem:[%s7923_s2 + $0x8] sm:$0xff]  ;;  %v4762_v3 = vpack.i.bf16 %v4102_v16, %v4101_v13 }
 0x12d   : > { %4748 = vrot.lane.b32.xlu1 %v4747_v60, %s4879_s27  ;;  %4743 = vrot.lane.b32.xlu0 %v4742_v41, %s4880_s28  ;;  %v4117_v21 = vld [vmem:[%s4923_s20 + $0xaa] sm:$0xff] }
 0x12e   : > { %v5773_v11 = vpop.permute.xlu2 %4588  ;;  %2083 = vmatpush.bf16.msra.mxu1 %v2076_v47  ;;  %4194 = vmatpush.bf16.msra.mxu2 %v4190_v29  ;;  %v4053_v45 = vld [vmem:[%s4923_s20 + $0xa8] sm:$0xff] }
 0x12f   : > { %v5780_v7 = vpop.permute.xlu1 %4538  ;;  %v4534_v55 = vpop.permute.xlu0 %4533  ;;  %1872 = vmatpush.bf16.msra.mxu0 %v4190_v29  ;;  %v4772_v47 = vpack.i.bf16 %v4054_v22, %v4053_v45  ;;  %v4135_v22 = vld [vmem:[%s4923_s20 + $0x182] sm:$0xff] }
 0x130   : > { %v4536_v12 = vunpack.i.h.bf16 %v4534_v55  ;;  %v4535_v60 = vunpack.i.l.bf16 %v4534_v55  ;;  %4197 = vmatpush.bf16.msra.mxu3 %v4192_v9  ;;  %v4072_v55 = vld [vmem:[%s4923_s20 + $0x188] sm:$0xff] }
 0x132   : > { %v5787_v39 = vsel %vm1612_vm3, %v5530_v33, %v4535_v60  ;;  %v5791_v41 = vsel %vm1612_vm3, %v5533_v62, %v4536_v12  ;;  %2084 = vmatpush.bf16.msra.mxu1 %v4192_v9  ;;  %4195 = vmatpush.bf16.msra.mxu2 %v4189_v63  ;;  %v4118_v33 = vld [vmem:[%s4923_s20 + $0xb2] sm:$0xff]  ;;  %v4071_v9 = vld [vmem:[%s4923_s20 + $0x180] sm:$0xff] }
 0x133   : > { %v4086_v62 = vld [vmem:[%s4923_s20 + $0xb1] sm:$0xff]  ;;  %1873 = vmatpush.bf16.msra.mxu0 %v4189_v63  ;;  %v4782_v13 = vpack.i.bf16 %v4118_v33, %v4117_v21  ;;  %v4792_v63 = vpack.i.bf16 %v4072_v55, %v4071_v9 }
 0x134   : > { %4768 = vrot.lane.b32.xlu2 %v4767_v20, %s4879_s27  ;;  %4198 = vmatpush.bf16.msra.mxu3 %v4191_v35  ;;  %v4777_v16 = vpack.i.bf16 %v4086_v62, %v4085_v18  ;;  %v4087_v62 = vld [vmem:[%s4923_s20 + $0xc1] sm:$0xff]  ;;  %v4073_v55 = vld [vmem:[%s4923_s20 + $0x198] sm:$0xff] }
 0x135   : > { %4763 = vrot.lane.b32.xlu1 %v4762_v3, %s4880_s28  ;;  %4758 = vrot.lane.b32.xlu0 %v4757_v61, %s4878_s26 }
 0x136   : > { %v5802_v58 = vpop.permute.xlu2 %4603  ;;  %2085 = vmatpush.bf16.msra.mxu1 %v4191_v35 }
 0x137   : > { %v4554_v17 = vpop.permute.xlu1 %4553  ;;  %v5807_v37 = vpop.permute.xlu0 %4548 }
 0x138   : > { %v4556_v38 = vunpack.i.h.bf16 %v4554_v17  ;;  %v4555_v48 = vunpack.i.l.bf16 %v4554_v17  ;;  %v4136_v17 = vld [vmem:[%s4923_s20 + $0x18a] sm:$0xff] }
 0x13a   : > { %v5811_v29 = vsel %vm1645_vm4, %v5677_v23, %v4555_v48  ;;  %v5815_v25 = vsel %vm1645_vm4, %v5681_v57, %v4556_v38 }
 0x13c   : > { %4783 = vrot.lane.b32.xlu2 %v4782_v13, %s4879_s27  ;;  %v4500_v13 = vunpack.i.l.bf16 %v5611_v53 }
 0x13d   : > { %4778 = vrot.lane.b32.xlu1 %v4777_v16, %s4880_s28  ;;  %4773 = vrot.lane.b32.xlu0 %v4772_v47, %s4878_s26 }
 0x13e   : > { %v5820_v5 = vpop.permute.xlu2 %4618 }
 0x13f   : > { %v4569_v12 = vpop.permute.xlu1 %4568  ;;  %v4564_v23 = vpop.permute.xlu0 %4563 }
 0x140   : > { %v4571_v60 = vunpack.i.h.bf16 %v4569_v12  ;;  %v4570_v3 = vunpack.i.l.bf16 %v4569_v12  ;;  %v4566_v57 = vunpack.i.h.bf16 %v4564_v23  ;;  %v4565_v61 = vunpack.i.l.bf16 %v4564_v23  ;;  %v4074_v12 = vld [vmem:[%s4923_s20 + $0x1a0] sm:$0xff] }
 0x141   : > { %v1629_v23 = vsel %vm1612_vm3, %v5564_v42, %v4500_v13  ;;  %v4541_v13 = vunpack.i.h.bf16 %v5780_v7 }
 0x142   : > { %v5826_v35 = vsel %vm1645_vm4, %v5696_v14, %v4570_v3  ;;  %v5830_v21 = vsel %vm1645_vm4, %v5700_v52, %v4571_v60  ;;  %v5834_v33 = vsel %vm1645_vm4, %v5587_v0, %v4565_v61  ;;  %v5838_v18 = vsel %vm1645_vm4, %v5590_v26, %v4566_v57  ;;  %v4088_v14 = vld [vmem:[%s4923_s20 + $0xc9] sm:$0xff]  ;;  %v4055_v52 = vld [vmem:[%s4923_s20 + $0xc0] sm:$0xff] }
 0x143   : > { %v4056_v0 = vld [vmem:[%s4923_s20 + $0xc8] sm:$0xff]  ;;  %v4812_v48 = vpack.i.bf16 %v4088_v14, %v4087_v62  ;;  %v4591_v3 = vunpack.i.h.bf16 %v5773_v11 }
 0x144   : > { %4798 = vrot.lane.b32.xlu2 %v5372_v50, %s4880_s28  ;;  %v4501_v50 = vunpack.i.h.bf16 %v5611_v53  ;;  %v4807_v16 = vpack.i.bf16 %v4056_v0, %v4055_v52  ;;  %v4590_v53 = vunpack.i.l.bf16 %v5773_v11  ;;  %v4120_v62 = vld [vmem:[%s4923_s20 + $0xca] sm:$0xff]  ;;  %v4827_v52 = vpack.i.bf16 %v4074_v12, %v4073_v55 }
 0x145   : > { %4793 = vrot.lane.b32.xlu1 %v4792_v63, %s4878_s26  ;;  %4788 = vrot.lane.b32.xlu0 %v4767_v20, %s4877_s25  ;;  %v4802_v20 = vpack.i.bf16 %v4136_v17, %v4135_v22  ;;  %v4119_v63 = vld [vmem:[%s4923_s20 + $0xc2] sm:$0xff] }
 0x146   : > { %v5847_v45 = vpop.permute.xlu2 %4633  ;;  %v1630_v60 = vsel %vm1612_vm3, %v5568_v54, %v4501_v50  ;;  %v4817_v50 = vpack.i.bf16 %v4120_v62, %v4119_v63  ;;  %v4106_v63 = vld [vmem:[%s4923_s20 + $0x1a1] sm:$0xff] }
 0x147   : > { %v5852_v38 = vpop.permute.xlu1 %4583  ;;  %v4579_v26 = vpop.permute.xlu0 %4578  ;;  %v4137_v62 = vld [vmem:[%s4923_s20 + $0x19a] sm:$0xff] }
 0x148   : > { %v4581_v47 = vunpack.i.h.bf16 %v4579_v26  ;;  %v4580_v9 = vunpack.i.l.bf16 %v4579_v26 }
 0x14a   : > { %v1662_v57 = vsel %vm1645_vm4, %v1629_v23, %v4580_v9  ;;  %v1663_v61 = vsel %vm1645_vm4, %v1630_v60, %v4581_v47  ;;  %v4540_v9 = vunpack.i.l.bf16 %v5780_v7  ;;  %v4057_v60 = vld [vmem:[%s4923_s20 + $0xd8] sm:$0xff] }
 0x14b   : > { %v1695_v26 = vsel %vm1678_vm6, %v1662_v57, %v4590_v53  ;;  %v4606_v53 = vunpack.i.h.bf16 %v5802_v58  ;;  %v4605_v57 = vunpack.i.l.bf16 %v5802_v58  ;;  %v4105_v7 = vld [vmem:[%s4923_s20 + $0x199] sm:$0xff]  ;;  %v1647_v58 = vsel %vm1645_vm4, %v5653_v56, %v4541_v13 }
 0x14c   : > { %4813 = vrot.lane.b32.xlu2 %v4812_v48, %s4880_s28  ;;  %v1696_v48 = vsel %vm1678_vm6, %v1663_v61, %v4591_v3  ;;  %v4058_v3 = vld [vmem:[%s4923_s20 + $0xe0] sm:$0xff]  ;;  %v4506_v61 = vunpack.i.h.bf16 %v5712_v4 }
 0x14d   : > { %4808 = vrot.lane.b32.xlu1 %v4807_v16, %s4878_s26  ;;  %4803 = vrot.lane.b32.xlu0 %v4802_v20, %s4879_s27 }
 0x14e   : > { %v5871_v54 = vpop.permute.xlu2 %4648 }
 0x14f   : > { %v4599_v14 = vpop.permute.xlu1 %4598  ;;  %v4594_v42 = vpop.permute.xlu0 %4593 }
 0x150   : > { %v4601_v0 = vunpack.i.h.bf16 %v4599_v14  ;;  %v4600_v11 = vunpack.i.l.bf16 %v4599_v14  ;;  %v4596_v22 = vunpack.i.h.bf16 %v4594_v42  ;;  %v4595_v17 = vunpack.i.l.bf16 %v4594_v42  ;;  %v4138_v14 = vld [vmem:[%s4923_s20 + $0x1a2] sm:$0xff] }
 0x151   : > { %v4505_v42 = vunpack.i.l.bf16 %v5712_v4  ;;  %v4586_v4 = vunpack.i.h.bf16 %v5852_v38 }
 0x152   : > { %v1728_v16 = vsel %vm1711_vm7, %v1695_v26, %v4595_v17  ;;  %v1729_v47 = vsel %vm1711_vm7, %v1696_v48, %v4596_v22 }
 0x153   : > { %v1761_v55 = vsel %vm1744_vm8, %v1728_v16, %v4600_v11  ;;  %v1762_v12 = vsel %vm1744_vm8, %v1729_v47, %v4601_v0  ;;  %v4842_v11 = vpack.i.bf16 %v4058_v3, %v4057_v60  ;;  %v1680_v16 = vsel %vm1678_vm6, %v1647_v58, %v4606_v53 }
 0x154   : > { %4828 = vrot.lane.b32.xlu2 %v4827_v52, %s4878_s26  ;;  %v1785_v23 = vpack.c.bf16 %v1762_v12, %v1761_v55  ;;  %v1646_v52 = vsel %vm1645_vm4, %v5649_v19, %v4540_v9  ;;  %v4832_v47 = vpack.i.bf16 %v4106_v63, %v4105_v7  ;;  %v4837_v55 = vpack.i.bf16 %v4138_v14, %v4137_v62  ;;  %v4089_v7 = vld [vmem:[%s4923_s20 + $0xd9] sm:$0xff] }
 0x155   : > { %4823 = vrot.lane.b32.xlu1 %v4802_v20, %s4877_s25  ;;  %4818 = vrot.lane.b32.xlu0 %v4817_v50, %s4879_s27  ;;  %v1679_v50 = vsel %vm1678_vm6, %v1646_v52, %v4605_v57  ;;  %v4585_v19 = vunpack.i.l.bf16 %v5852_v38  ;;  %v1631_v3 = vsel %vm1612_vm3, %v5481_v30, %v4505_v42  ;;  %v1632_v38 = vsel %vm1612_vm3, %v5484_v36, %v4506_v61  ;;  %v4090_v30 = vld [vmem:[%s4923_s20 + $0xe1] sm:$0xff] }
 0x156   : > { %4155 = vmatmul.msk.bf16.vlgmr.msra.gmra.mxu2 %vm1813_vm9, %v1785_v23  ;;  %4179 = vmatmul.msk.bf16.vlgmr.msra.gmra.mxu3 %vm1813_vm9, %v1785_v23  ;;  %v5904_v9 = vpop.permute.xlu2 %4663  ;;  %v4621_v53 = vunpack.i.h.bf16 %v5820_v5  ;;  %v4620_v57 = vunpack.i.l.bf16 %v5820_v5  ;;  %v1665_v62 = vsel %vm1645_vm4, %v1632_v38, %v4586_v4  ;;  %v4121_v14 = vld [vmem:[%s4923_s20 + $0xda] sm:$0xff]  ;;  %v4122_v36 = vld [vmem:[%s4923_s20 + $0xe2] sm:$0xff] }
 0x157   : > { %v4614_v20 = vpop.permute.xlu1 %4613  ;;  %v4609_v0 = vpop.permute.xlu0 %4608  ;;  %v1664_v63 = vsel %vm1645_vm4, %v1631_v3, %v4585_v19 }
 0x158   : > { %v4616_v22 = vunpack.i.h.bf16 %v4614_v20  ;;  %v4615_v17 = vunpack.i.l.bf16 %v4614_v20  ;;  %v4611_v26 = vunpack.i.h.bf16 %v4609_v0  ;;  %v4610_v48 = vunpack.i.l.bf16 %v4609_v0 }
 0x159   : > { %v1697_v0 = vsel %vm1678_vm6, %v1664_v63, %v4620_v57 }
 0x15a   : > { %v1712_v56 = vsel %vm1711_vm7, %v1679_v50, %v4610_v48  ;;  %v1713_v13 = vsel %vm1711_vm7, %v1680_v16, %v4611_v26  ;;  %v4546_v50 = vunpack.i.h.bf16 %v5686_v32  ;;  %v4545_v16 = vunpack.i.l.bf16 %v5686_v32 }
 0x15b   : > { %v1745_v12 = vsel %vm1744_vm8, %v1712_v56, %v4615_v17  ;;  %v1746_v23 = vsel %vm1744_vm8, %v1713_v13, %v4616_v22  ;;  %v4847_v22 = vpack.i.bf16 %v4090_v30, %v4089_v7  ;;  %v4852_v17 = vpack.i.bf16 %v4122_v36, %v4121_v14 }
 0x15c   : > { %4843 = vrot.lane.b32.xlu2 %v4842_v11, %s4878_s26  ;;  %v1777_v60 = vpack.c.bf16 %v1746_v23, %v1745_v12  ;;  %v1698_v11 = vsel %vm1678_vm6, %v1665_v62, %v4621_v53  ;;  %v4636_v56 = vunpack.i.h.bf16 %v5847_v45  ;;  %v4635_v13 = vunpack.i.l.bf16 %v5847_v45 }
 0x15d   : > { %4833 = vrot.lane.b32.xlu0 %v4832_v47, %s4880_s28  ;;  %4838 = vrot.lane.b32.xlu1 %v4837_v55, %s4879_s27  ;;  %v1648_v32 = vsel %vm1645_vm4, %v5641_v2, %v4545_v16  ;;  %v1649_v12 = vsel %vm1645_vm4, %v5645_v44, %v4546_v50  ;;  %v4651_v44 = vunpack.i.h.bf16 %v5871_v54  ;;  %v4650_v36 = vunpack.i.l.bf16 %v5871_v54 }
 0x15e   : > { %4147 = vmatmul.msk.bf16.vlgmr.msra.gmra.mxu0 %vm1813_vm9, %v1777_v60  ;;  %4171 = vmatmul.msk.bf16.vlgmr.msra.gmra.mxu1 %vm1813_vm9, %v1777_v60  ;;  %v5935_v4 = vpop.permute.xlu2 %4678  ;;  %v1681_v57 = vsel %vm1678_vm6, %v1648_v32, %v4635_v13  ;;  %v1682_v7 = vsel %vm1678_vm6, %v1649_v12, %v4636_v56 }
 0x15f   : > { %v4629_v61 = vpop.permute.xlu1 %4628  ;;  %v4624_v42 = vpop.permute.xlu0 %4623  ;;  %v1667_v54 = vsel %vm1645_vm4, %v5726_v31, %v4651_v44  ;;  %v4681_v56 = vunpack.i.h.bf16 %v5935_v4  ;;  %v4680_v31 = vunpack.i.l.bf16 %v5935_v4 }
 0x160   : > { %v4631_v52 = vunpack.i.h.bf16 %v4629_v61  ;;  %v4630_v5 = vunpack.i.l.bf16 %v4629_v61  ;;  %v4626_v58 = vunpack.i.h.bf16 %v4624_v42  ;;  %v4625_v20 = vunpack.i.l.bf16 %v4624_v42 }
 0x161   : > { %v4666_v42 = vunpack.i.h.bf16 %v5904_v9 }
 0x162   : > { %v1730_v26 = vsel %vm1711_vm7, %v1697_v0, %v4625_v20  ;;  %v1731_v48 = vsel %vm1711_vm7, %v1698_v11, %v4626_v58 }
 0x163   : > { %v1763_v47 = vsel %vm1744_vm8, %v1730_v26, %v4630_v5  ;;  %v1764_v55 = vsel %vm1744_vm8, %v1731_v48, %v4631_v52  ;;  %v4665_v52 = vunpack.i.l.bf16 %v5904_v9 }
 0x164   : > { %v1786_v19 = vpack.c.bf16 %v1764_v55, %v1763_v47  ;;  %v4551_v55 = vunpack.i.h.bf16 %v5807_v37 }
 0x165   : > { %4848 = vrot.lane.b32.xlu0 %v4847_v22, %s4880_s28  ;;  %4853 = vrot.lane.b32.xlu1 %v4852_v17, %s4879_s27  ;;  %v1666_v17 = vsel %vm1645_vm4, %v5722_v40, %v4650_v36 }
 0x166   : > { %4156 = vmatmul.msk.bf16.gmra.mxu2 %vm1813_vm9, %v1786_v19  ;;  %4180 = vmatmul.msk.bf16.gmra.mxu3 %vm1813_vm9, %v1786_v19  ;;  %v5955_v61 = vpop.permute.xlu2 %4693  ;;  %v4550_v19 = vunpack.i.l.bf16 %v5807_v37  ;;  %v1651_v37 = vsel %vm1645_vm4, %v5560_v34, %v4551_v55 }
 0x167   : > { %v4644_v23 = vpop.permute.xlu1 %4643  ;;  %v4639_v60 = vpop.permute.xlu0 %4638 }
 0x168   : > { %v4646_v3 = vunpack.i.h.bf16 %v4644_v23  ;;  %v4645_v38 = vunpack.i.l.bf16 %v4644_v23  ;;  %v4641_v53 = vunpack.i.h.bf16 %v4639_v60  ;;  %v4640_v45 = vunpack.i.l.bf16 %v4639_v60 }
 0x16a   : > { %v1714_v63 = vsel %vm1711_vm7, %v1681_v57, %v4640_v45  ;;  %v1715_v62 = vsel %vm1711_vm7, %v1682_v7, %v4641_v53  ;;  %v1650_v53 = vsel %vm1645_vm4, %v5557_v10, %v4550_v19 }
 0x16b   : > { %v1747_v30 = vsel %vm1744_vm8, %v1714_v63, %v4645_v38  ;;  %v1748_v2 = vsel %vm1744_vm8, %v1715_v62, %v4646_v3 }
 0x16c   : > { %v1778_v14 = vpack.c.bf16 %v1748_v2, %v1747_v30 }
 0x16e   : > { %4148 = vmatmul.msk.bf16.gmra.mxu0 %vm1813_vm9, %v1778_v14  ;;  %4172 = vmatmul.msk.bf16.gmra.mxu1 %vm1813_vm9, %v1778_v14  ;;  %v4709_v12 = vpop.permute.xlu2 %4708 }
 0x16f   : > { %v4659_v5 = vpop.permute.xlu1 %4658  ;;  %v4654_v58 = vpop.permute.xlu0 %4653  ;;  %v4711_v55 = vunpack.i.h.bf16 %v4709_v12  ;;  %v4710_v19 = vunpack.i.l.bf16 %v4709_v12 }
 0x170   : > { %v4661_v20 = vunpack.i.h.bf16 %v4659_v5  ;;  %v4660_v0 = vunpack.i.l.bf16 %v4659_v5  ;;  %v4656_v11 = vunpack.i.h.bf16 %v4654_v58  ;;  %v4655_v22 = vunpack.i.l.bf16 %v4654_v58 }
 0x171   : > { %v4696_v58 = vunpack.i.h.bf16 %v5955_v61 }
 0x172   : > { %v1699_v26 = vsel %vm1678_vm6, %v1666_v17, %v4655_v22  ;;  %v1700_v48 = vsel %vm1678_vm6, %v1667_v54, %v4656_v11 }
 0x173   : > { %v1732_v50 = vsel %vm1711_vm7, %v1699_v26, %v4660_v0  ;;  %v1733_v9 = vsel %vm1711_vm7, %v1700_v48, %v4661_v20  ;;  %v4695_v20 = vunpack.i.l.bf16 %v5955_v61 }
 0x174   : > { %v1765_v16 = vsel %vm1744_vm8, %v1732_v50, %v4665_v52  ;;  %v1766_v47 = vsel %vm1744_vm8, %v1733_v9, %v4666_v42 }
 0x175   : > { %v1787_v40 = vpack.c.bf16 %v1766_v47, %v1765_v16 }
 0x176   : > { %v4724_v44 = vpop.permute.xlu2 %4723 }
 0x177   : > { %v4674_v13 = vpop.permute.xlu1 %4673  ;;  %v4669_v32 = vpop.permute.xlu0 %4668  ;;  %4157 = vmatmul.msk.bf16.gmra.mxu2 %vm1813_vm9, %v1787_v40  ;;  %4181 = vmatmul.msk.bf16.gmra.mxu3 %vm1813_vm9, %v1787_v40 }
 0x178   : > { %v4676_v23 = vunpack.i.h.bf16 %v4674_v13  ;;  %v4675_v60 = vunpack.i.l.bf16 %v4674_v13  ;;  %v4671_v3 = vunpack.i.h.bf16 %v4669_v32  ;;  %v4670_v38 = vunpack.i.l.bf16 %v4669_v32 }
 0x17a   : > { %v1683_v45 = vsel %vm1678_vm6, %v1650_v53, %v4670_v38  ;;  %v1684_v4 = vsel %vm1678_vm6, %v1651_v37, %v4671_v3 }
 0x17b   : > { %v1716_v57 = vsel %vm1711_vm7, %v1683_v45, %v4675_v60  ;;  %v1717_v7 = vsel %vm1711_vm7, %v1684_v4, %v4676_v23  ;;  %v4726_v4 = vunpack.i.h.bf16 %v4724_v44 }
 0x17c   : > { %v1749_v63 = vsel %vm1744_vm8, %v1716_v57, %v4680_v31  ;;  %v1750_v62 = vsel %vm1744_vm8, %v1717_v7, %v4681_v56 }
 0x17d   : > { %v1779_v30 = vpack.c.bf16 %v1750_v62, %v1749_v63 }
 0x17e   : > { %v4739_v61 = vpop.permute.xlu2 %4738 }
 0x17f   : > { %v4689_v2 = vpop.permute.xlu1 %4688  ;;  %v4684_v14 = vpop.permute.xlu0 %4683  ;;  %4149 = vmatmul.msk.bf16.gmra.mxu0 %vm1813_vm9, %v1779_v30  ;;  %4173 = vmatmul.msk.bf16.gmra.mxu1 %vm1813_vm9, %v1779_v30 }
 0x180   : > { %v4686_v10 = vunpack.i.h.bf16 %v4684_v14  ;;  %v4685_v34 = vunpack.i.l.bf16 %v4684_v14  ;;  %v4691_v36 = vunpack.i.h.bf16 %v4689_v2  ;;  %v4690_v42 = vunpack.i.l.bf16 %v4689_v2 }
 0x182   : > { %v1668_v52 = vsel %vm1645_vm4, %v5634_v59, %v4685_v34  ;;  %v1669_v5 = vsel %vm1645_vm4, %v5637_v6, %v4686_v10 }
 0x183   : > { %v1701_v0 = vsel %vm1678_vm6, %v1668_v52, %v4690_v42  ;;  %v1702_v11 = vsel %vm1678_vm6, %v1669_v5, %v4691_v36 }
 0x184   : > { %v1734_v48 = vsel %vm1711_vm7, %v1701_v0, %v4695_v20  ;;  %v1735_v50 = vsel %vm1711_vm7, %v1702_v11, %v4696_v58  ;;  %v4740_v58 = vunpack.i.l.bf16 %v4739_v61 }
 0x187   : > { %v4704_v22 = vpop.permute.xlu1 %4703  ;;  %v4699_v17 = vpop.permute.xlu0 %4698 }
 0x188   : > { %v4701_v54 = vunpack.i.h.bf16 %v4699_v17  ;;  %v4700_v26 = vunpack.i.l.bf16 %v4699_v17  ;;  %v4706_v59 = vunpack.i.h.bf16 %v4704_v22  ;;  %v4705_v9 = vunpack.i.l.bf16 %v4704_v22 }
 0x18a   : > { %v1767_v6 = vsel %vm1744_vm8, %v1734_v48, %v4700_v26  ;;  %v1768_v16 = vsel %vm1744_vm8, %v1735_v50, %v4701_v54  ;;  %v1685_v40 = vsel %vm1678_vm6, %v5811_v29, %v4705_v9  ;;  %v1686_v56 = vsel %vm1678_vm6, %v5815_v25, %v4706_v59  ;;  %v4754_v25 = vpop.permute.xlu2 %4753 }
 0x18b   : > { %v1788_v47 = vpack.c.bf16 %v1768_v16, %v1767_v6  ;;  %v1718_v60 = vsel %vm1711_vm7, %v1685_v40, %v4710_v19  ;;  %v1719_v3 = vsel %vm1711_vm7, %v1686_v56, %v4711_v55  ;;  %v4725_v29 = vunpack.i.l.bf16 %v4724_v44 }
 0x18c   : > { %v1687_v48 = vsel %vm1678_vm6, %v5715_v15, %v4740_v58  ;;  %v4755_v55 = vunpack.i.l.bf16 %v4754_v25 }
 0x18d   : > { %4158 = vmatmul.msk.bf16.gmra.mxu2 %vm1813_vm9, %v1788_v47  ;;  %4182 = vmatmul.msk.bf16.gmra.mxu3 %vm1813_vm9, %v1788_v47 }
 0x18f   : > { %v4719_v31 = vpop.permute.xlu1 %4718  ;;  %v4714_v13 = vpop.permute.xlu0 %4713 }
 0x190   : > { %v4716_v32 = vunpack.i.h.bf16 %v4714_v13  ;;  %v4715_v23 = vunpack.i.l.bf16 %v4714_v13  ;;  %v4721_v38 = vunpack.i.h.bf16 %v4719_v31  ;;  %v4720_v12 = vunpack.i.l.bf16 %v4719_v31 }
 0x192   : > { %v1751_v53 = vsel %vm1744_vm8, %v1718_v60, %v4715_v23  ;;  %v1752_v37 = vsel %vm1744_vm8, %v1719_v3, %v4716_v32  ;;  %v1670_v57 = vsel %vm1645_vm4, %v5757_v46, %v4720_v12  ;;  %v1671_v7 = vsel %vm1645_vm4, %v5761_v1, %v4721_v38  ;;  %v4769_v11 = vpop.permute.xlu2 %4768 }
 0x193   : > { %v1780_v45 = vpack.c.bf16 %v1752_v37, %v1751_v53  ;;  %v1703_v34 = vsel %vm1678_vm6, %v1670_v57, %v4725_v29  ;;  %v1704_v44 = vsel %vm1678_vm6, %v1671_v7, %v4726_v4  ;;  %v4741_v1 = vunpack.i.h.bf16 %v4739_v61 }
 0x194   : > { %v4756_v61 = vunpack.i.h.bf16 %v4754_v25  ;;  %v4771_v19 = vunpack.i.h.bf16 %v4769_v11  ;;  %v4770_v15 = vunpack.i.l.bf16 %v4769_v11  ;;  %v1672_v23 = vsel %vm1645_vm4, %v5749_v28, %v4755_v55 }
 0x195   : > { %4150 = vmatmul.msk.bf16.gmra.mxu0 %vm1813_vm9, %v1780_v45  ;;  %4174 = vmatmul.msk.bf16.gmra.mxu1 %vm1813_vm9, %v1780_v45  ;;  %v1688_v50 = vsel %vm1678_vm6, %v5718_v43, %v4741_v1 }
 0x196   : > { %v1673_v60 = vsel %vm1645_vm4, %v5753_v8, %v4756_v61 }
 0x197   : > { %v4734_v63 = vpop.permute.xlu1 %4733  ;;  %v4729_v62 = vpop.permute.xlu0 %4728 }
 0x198   : > { %v4736_v30 = vunpack.i.h.bf16 %v4734_v63  ;;  %v4735_v2 = vunpack.i.l.bf16 %v4734_v63  ;;  %v4731_v14 = vunpack.i.h.bf16 %v4729_v62  ;;  %v4730_v10 = vunpack.i.l.bf16 %v4729_v62 }
 0x19a   : > { %v1736_v36 = vsel %vm1711_vm7, %v1703_v34, %v4730_v10  ;;  %v1737_v42 = vsel %vm1711_vm7, %v1704_v44, %v4731_v14  ;;  %v4784_v3 = vpop.permute.xlu2 %4783 }
 0x19b   : > { %v1769_v52 = vsel %vm1744_vm8, %v1736_v36, %v4735_v2  ;;  %v1770_v46 = vsel %vm1744_vm8, %v1737_v42, %v4736_v30  ;;  %v4786_v25 = vunpack.i.h.bf16 %v4784_v3  ;;  %v4785_v57 = vunpack.i.l.bf16 %v4784_v3 }
 0x19c   : > { %v1789_v5 = vpack.c.bf16 %v1770_v46, %v1769_v52 }
 0x19e   : > { %4159 = vmatmul.msk.bf16.gmra.mxu2 %vm1813_vm9, %v1789_v5  ;;  %4183 = vmatmul.msk.bf16.gmra.mxu3 %vm1813_vm9, %v1789_v5 }
 0x19f   : > { %v4749_v20 = vpop.permute.xlu1 %4748  ;;  %v4744_v0 = vpop.permute.xlu0 %4743 }
 0x1a0   : > { %v4751_v22 = vunpack.i.h.bf16 %v4749_v20  ;;  %v4750_v17 = vunpack.i.l.bf16 %v4749_v20  ;;  %v4746_v54 = vunpack.i.h.bf16 %v4744_v0  ;;  %v4745_v26 = vunpack.i.l.bf16 %v4744_v0 }
 0x1a2   : > { %v1720_v59 = vsel %vm1711_vm7, %v1687_v48, %v4745_v26  ;;  %v1721_v9 = vsel %vm1711_vm7, %v1688_v50, %v4746_v54  ;;  %v4799_v44 = vpop.permute.xlu2 %4798 }
 0x1a3   : > { %v1753_v6 = vsel %vm1744_vm8, %v1720_v59, %v4750_v17  ;;  %v1754_v16 = vsel %vm1744_vm8, %v1721_v9, %v4751_v22  ;;  %v4801_v11 = vunpack.i.h.bf16 %v4799_v44  ;;  %v4800_v22 = vunpack.i.l.bf16 %v4799_v44 }
 0x1a4   : > { %v1781_v47 = vpack.c.bf16 %v1754_v16, %v1753_v6 }
 0x1a6   : > { %4151 = vmatmul.msk.bf16.gmra.mxu0 %vm1813_vm9, %v1781_v47  ;;  %4175 = vmatmul.msk.bf16.gmra.mxu1 %vm1813_vm9, %v1781_v47 }
 0x1a7   : > { %v4764_v40 = vpop.permute.xlu1 %4763  ;;  %v4759_v56 = vpop.permute.xlu0 %4758 }
 0x1a8   : > { %v4766_v43 = vunpack.i.h.bf16 %v4764_v40  ;;  %v4765_v31 = vunpack.i.l.bf16 %v4764_v40  ;;  %v4761_v13 = vunpack.i.h.bf16 %v4759_v56  ;;  %v4760_v32 = vunpack.i.l.bf16 %v4759_v56 }
 0x1aa   : > { %v1705_v38 = vsel %vm1678_vm6, %v1672_v23, %v4760_v32  ;;  %v1706_v12 = vsel %vm1678_vm6, %v1673_v60, %v4761_v13  ;;  %v4814_v17 = vpop.permute.xlu2 %4813 }
 0x1ab   : > { %v1738_v53 = vsel %vm1711_vm7, %v1705_v38, %v4765_v31  ;;  %v1739_v37 = vsel %vm1711_vm7, %v1706_v12, %v4766_v43 }
 0x1ac   : > { %v1771_v45 = vsel %vm1744_vm8, %v1738_v53, %v4770_v15  ;;  %v1772_v4 = vsel %vm1744_vm8, %v1739_v37, %v4771_v19  ;;  %v4816_v19 = vunpack.i.h.bf16 %v4814_v17  ;;  %v4815_v15 = vunpack.i.l.bf16 %v4814_v17 }
 0x1ad   : > { %v1790_v29 = vpack.c.bf16 %v1772_v4, %v1771_v45 }
 0x1af   : > { %v4779_v28 = vpop.permute.xlu1 %4778  ;;  %v4774_v7 = vpop.permute.xlu0 %4773  ;;  %4160 = vmatmul.msk.bf16.gmra.mxu2 %vm1813_vm9, %v1790_v29  ;;  %4184 = vmatmul.msk.bf16.gmra.mxu3 %vm1813_vm9, %v1790_v29 }
 0x1b0   : > { %v4781_v8 = vunpack.i.h.bf16 %v4779_v28  ;;  %v4780_v63 = vunpack.i.l.bf16 %v4779_v28  ;;  %v4776_v62 = vunpack.i.h.bf16 %v4774_v7  ;;  %v4775_v30 = vunpack.i.l.bf16 %v4774_v7 }
 0x1b2   : > { %v1689_v2 = vsel %vm1678_vm6, %v5834_v33, %v4775_v30  ;;  %v1690_v14 = vsel %vm1678_vm6, %v5838_v18, %v4776_v62  ;;  %v4829_v13 = vpop.permute.xlu2 %4828 }
 0x1b3   : > { %v1722_v10 = vsel %vm1711_vm7, %v1689_v2, %v4780_v63  ;;  %v1723_v34 = vsel %vm1711_vm7, %v1690_v14, %v4781_v8  ;;  %v4830_v4 = vunpack.i.l.bf16 %v4829_v13 }
 0x1b4   : > { %v1755_v36 = vsel %vm1744_vm8, %v1722_v10, %v4785_v57  ;;  %v1756_v42 = vsel %vm1744_vm8, %v1723_v34, %v4786_v25 }
 0x1b5   : > { %v1782_v52 = vpack.c.bf16 %v1756_v42, %v1755_v36 }
 0x1b7   : > { %v4794_v46 = vpop.permute.xlu1 %4793  ;;  %v4789_v5 = vpop.permute.xlu0 %4788  ;;  %4152 = vmatmul.msk.bf16.gmra.mxu0 %vm1813_vm9, %v1782_v52  ;;  %4176 = vmatmul.msk.bf16.gmra.mxu1 %vm1813_vm9, %v1782_v52 }
 0x1b8   : > { %v4791_v33 = vunpack.i.h.bf16 %v4789_v5  ;;  %v4790_v1 = vunpack.i.l.bf16 %v4789_v5  ;;  %v4796_v58 = vunpack.i.h.bf16 %v4794_v46  ;;  %v4795_v18 = vunpack.i.l.bf16 %v4794_v46 }
 0x1ba   : > { %v1674_v20 = vsel %vm1645_vm4, %v5666_v49, %v4790_v1  ;;  %v1675_v0 = vsel %vm1645_vm4, %v5669_v24, %v4791_v33  ;;  %v4844_v2 = vpop.permute.xlu2 %4843 }
 0x1bb   : > { %v1707_v54 = vsel %vm1678_vm6, %v1674_v20, %v4795_v18  ;;  %v1708_v26 = vsel %vm1678_vm6, %v1675_v0, %v4796_v58  ;;  %v4846_v44 = vunpack.i.h.bf16 %v4844_v2  ;;  %v4845_v36 = vunpack.i.l.bf16 %v4844_v2  ;;  %v6094_v58 = vld [vmem:[%s7924_s3 + $0x2] ss:$0 sm:$0xff] }
 0x1bc   : > { %v1740_v6 = vsel %vm1711_vm7, %v1707_v54, %v4800_v22  ;;  %v1741_v16 = vsel %vm1711_vm7, %v1708_v26, %v4801_v11 }
 0x1bd   : > { %v1693_v18 = vsel %vm1678_vm6, %v5742_v27, %v4845_v36  ;;  %v1694_v20 = vsel %vm1678_vm6, %v5745_v51, %v4846_v44  ;;  %v6108_v27 = vld [vmem:[%s7924_s3 + $0x3] ss:$0 sm:$0xff] }
 0x1bf   : > { %v4809_v48 = vpop.permute.xlu1 %4808  ;;  %v4804_v50 = vpop.permute.xlu0 %4803 }
 0x1c0   : > { %v4806_v59 = vunpack.i.h.bf16 %v4804_v50  ;;  %v4805_v9 = vunpack.i.l.bf16 %v4804_v50  ;;  %v4811_v47 = vunpack.i.h.bf16 %v4809_v48  ;;  %v4810_v49 = vunpack.i.l.bf16 %v4809_v48 }
 0x1c2   : > { %v1773_v61 = vsel %vm1744_vm8, %v1740_v6, %v4805_v9  ;;  %v1774_v24 = vsel %vm1744_vm8, %v1741_v16, %v4806_v59  ;;  %v1691_v40 = vsel %vm1678_vm6, %v5826_v35, %v4810_v49  ;;  %v1692_v56 = vsel %vm1678_vm6, %v5830_v21, %v4811_v47  ;;  %v6117_v47 = vld [vmem:[%s7924_s3] ss:$0 sm:$0xff] }
 0x1c3   : > { %v1791_v55 = vpack.c.bf16 %v1774_v24, %v1773_v61  ;;  %v1724_v60 = vsel %vm1711_vm7, %v1691_v40, %v4815_v15  ;;  %v1725_v3 = vsel %vm1711_vm7, %v1692_v56, %v4816_v19  ;;  %v4831_v35 = vunpack.i.h.bf16 %v4829_v13 }
 0x1c4   : > { %v2267_v6 = vlaneseq }
 0x1c5   : > { %4161 = vmatmul.msk.bf16.gmra.mxu2 %vm1813_vm9, %v1791_v55  ;;  %4185 = vmatmul.msk.bf16.gmra.mxu3 %vm1813_vm9, %v1791_v55 }
 0x1c6   : > { %v6121_v19 = vshrl.u32 %v2267_v6, 7 }
 0x1c7   : > { %v4824_v43 = vpop.permute.xlu1 %4823  ;;  %v4819_v31 = vpop.permute.xlu0 %4818 }
 0x1c8   : > { %v4821_v32 = vunpack.i.h.bf16 %v4819_v31  ;;  %v4820_v23 = vunpack.i.l.bf16 %v4819_v31  ;;  %v4826_v38 = vunpack.i.h.bf16 %v4824_v43  ;;  %v4825_v12 = vunpack.i.l.bf16 %v4824_v43  ;;  %8125 = vst [vmem:[#allocation2_spill] sm:$0xff] %v6121_v19 }
 0x1c9   : > { %vm3084_vm10 = vcmp.lt.s32.totalorder %v6121_v19, 7  ;;  %vm3245_vm12 = vcmp.lt.s32.totalorder %v6121_v19, 6 }
 0x1ca   : > { %v1757_v53 = vsel %vm1744_vm8, %v1724_v60, %v4820_v23  ;;  %v1758_v37 = vsel %vm1744_vm8, %v1725_v3, %v4821_v32  ;;  %v1676_v21 = vsel %vm1645_vm4, %v5787_v39, %v4825_v12  ;;  %v1677_v29 = vsel %vm1645_vm4, %v5791_v41, %v4826_v38  ;;  %v6129_v32 = vld [vmem:[%s7924_s3 + $0x1] ss:$0 sm:$0xff] }
 0x1cb   : > { %v1783_v45 = vpack.c.bf16 %v1758_v37, %v1757_v53  ;;  %v1709_v62 = vsel %vm1678_vm6, %v1676_v21, %v4830_v4  ;;  %v1710_v30 = vsel %vm1678_vm6, %v1677_v29, %v4831_v35  ;;  %v2285_v29 = vadd.s32 136, %v6121_v19 }
 0x1cd   : > { %4153 = vmatmul.msk.bf16.gmra.mxu0 %vm1813_vm9, %v1783_v45  ;;  %4177 = vmatmul.msk.bf16.gmra.mxu1 %vm1813_vm9, %v1783_v45  ;;  %v6168_v36 = vand.u32 15, %v2285_v29 }
 0x1cf   : > { %v4834_v25 = vpop.permute.xlu0 %4833  ;;  %v4839_v57 = vpop.permute.xlu1 %4838  ;;  %8131 = vst [vmem:[#allocation5_spill] sm:$0xff] %v6168_v36  ;;  %vm3134_vm11 = vcmp.lt.s32.totalorder %v6168_v36, 15  ;;  %vm3295_vm14 = vcmp.lt.s32.totalorder %v6168_v36, 14 }
 0x1d0   : > { %v4836_v28 = vunpack.i.h.bf16 %v4834_v25  ;;  %v4835_v7 = vunpack.i.l.bf16 %v4834_v25  ;;  %v4841_v8 = vunpack.i.h.bf16 %v4839_v57  ;;  %v4840_v63 = vunpack.i.l.bf16 %v4839_v57 }
 0x1d2   : > { %v1742_v14 = vsel %vm1711_vm7, %v1709_v62, %v4835_v7  ;;  %v1743_v10 = vsel %vm1711_vm7, %v1710_v30, %v4836_v28 }
 0x1d3   : > { %v1775_v39 = vsel %vm1744_vm8, %v1742_v14, %v4840_v63  ;;  %v1776_v34 = vsel %vm1744_vm8, %v1743_v10, %v4841_v8  ;;  %v2269_v14 = vadd.s32 8, %v6121_v19 }
 0x1d4   : > { %v1792_v41 = vpack.c.bf16 %v1776_v34, %v1775_v39 }
 0x1d6   : > { %4162 = vmatmul.msk.bf16.gmra.mxu2 %vm1813_vm9, %v1792_v41  ;;  %4186 = vmatmul.msk.bf16.gmra.mxu3 %vm1813_vm9, %v1792_v41 }
 0x1d7   : > { %v4849_v42 = vpop.permute.xlu0 %4848  ;;  %v4854_v52 = vpop.permute.xlu1 %4853 }
 0x1d8   : > { %v4851_v46 = vunpack.i.h.bf16 %v4849_v42  ;;  %v4850_v5 = vunpack.i.l.bf16 %v4849_v42  ;;  %v4856_v33 = vunpack.i.h.bf16 %v4854_v52  ;;  %v4855_v1 = vunpack.i.l.bf16 %v4854_v52 }
 0x1d9   : > { %v1915_v0 = vpop.f32.mrf.mxu2  ;;  %v2127_v11 = vpop.f32.mrf.mxu3 }
 0x1da   : > { %v1726_v22 = vsel %vm1711_vm7, %v1693_v18, %v4850_v5  ;;  %v1727_v17 = vsel %vm1711_vm7, %v1694_v20, %v4851_v46  ;;  %v2185_v59 = vmul.f32 %v6094_v58, %v2127_v11  ;;  %v1973_v13 = vmul.f32 %v6117_v47, %v1915_v0 }
 0x1db   : > { %v1875_v54 = vpop.f32.mrf.mxu0  ;;  %v2087_v26 = vpop.f32.mrf.mxu1  ;;  %v1759_v48 = vsel %vm1744_vm8, %v1726_v22, %v4855_v1  ;;  %v1760_v50 = vsel %vm1744_vm8, %v1727_v17, %v4856_v33  ;;  %v6182_v20 = vand.u32 15, %v2269_v14 }
 0x1dc   : > { %v2169_v51 = vmul.f32 %v6094_v58, %v2087_v26  ;;  %v1784_v9 = vpack.c.bf16 %v1760_v50, %v1759_v48  ;;  %v2219_v16 = vadd.f32 %v6108_v27, %v2185_v59  ;;  %v1957_v38 = vmul.f32 %v6117_v47, %v1875_v54 }
 0x1dd   : > { %v6142_v45 = vadd.f32 %v6129_v32, %v1973_v13  ;;  %8133 = vst [vmem:[#allocation14_spill] sm:$0xff] %v6182_v20  ;;  %vm3118_vm13 = vcmp.lt.s32.totalorder %v6182_v20, 15  ;;  %vm3279_vm15 = vcmp.lt.s32.totalorder %v6182_v20, 14 }
 0x1de   : > { %4154 = vmatmul.msk.bf16.gmra.mxu0 %vm1813_vm9, %v1784_v9  ;;  %4178 = vmatmul.msk.bf16.gmra.mxu1 %vm1813_vm9, %v1784_v9  ;;  %v2203_v49 = vadd.f32 %v6108_v27, %v2169_v51  ;;  %v2251_v56 = vmax.f32 %v2219_v16, 0.0  ;;  %v1991_v8 = vadd.f32 %v6129_v32, %v1957_v38 }
 0x1df   : > { %8127 = vst [vmem:[#allocation10_spill] sm:$0xff] %v6142_v45  ;;  %v7944_v52 = vmax.f32 %v6142_v45, 0.0 }
 0x1e0   : > { %v2235_v23 = vmax.f32 %v2203_v49, 0.0  ;;  %v6136_v12 = vrot.slane %v2251_v56, 1  ;;  %v2023_v0 = vmax.f32 %v1991_v8, 0.0 }
 0x1e1   : > { %v1917_v61 = vpop.f32.mrf.mxu2  ;;  %v2129_v24 = vpop.f32.mrf.mxu3 }
 0x1e2   : > { %v2186_v55 = vmul.f32 %v6094_v58, %v2129_v24  ;;  %8126 = vst [vmem:[#allocation3_spill] sm:$0xff] %v6136_v12  ;;  %v6144_v35 = vrot.slane %v2235_v23, 1  ;;  %v1974_v63 = vmul.f32 %v6117_v47, %v1917_v61 }
 0x1e3   : > { %v1877_v15 = vpop.f32.mrf.mxu0  ;;  %v2089_v40 = vpop.f32.mrf.mxu1 }
 0x1e4   : > { %v2220_v43 = vadd.f32 %v6108_v27, %v2186_v55  ;;  %v2170_v31 = vmul.f32 %v6094_v58, %v2089_v40  ;;  %8128 = vst [vmem:[#allocation11_spill] sm:$0xff] %v6144_v35  ;;  %v6177_v1 = vadd.f32 %v6129_v32, %v1974_v63  ;;  %v1958_v54 = vmul.f32 %v6117_v47, %v1877_v15 }
 0x1e6   : > { %v6131_v60 = vmax.f32 %v2220_v43, 0.0  ;;  %v2204_v3 = vadd.f32 %v6108_v27, %v2170_v31  ;;  %8132 = vst [vmem:[#allocation8_spill] sm:$0xff] %v6177_v1  ;;  %v7943_v16 = vmax.f32 %v6177_v1, 0.0  ;;  %v1992_v13 = vadd.f32 %v6129_v32, %v1958_v54 }
 0x1e8   : > { %v3069_v53 = vrot.slane %v6131_v60, 1  ;;  %v6139_v37 = vmax.f32 %v2204_v3, 0.0  ;;  %v2024_v63 = vmax.f32 %v1992_v13, 0.0 }
 0x1e9   : > { %v1920_v4 = vpop.f32.mrf.mxu2  ;;  %v2132_v21 = vpop.f32.mrf.mxu3 }
 0x1ea   : > { %v3099_v25 = vsel %vm3084_vm10, %v6136_v12, %v3069_v53  ;;  %v3053_v57 = vrot.slane %v6139_v37, 1  ;;  %v1975_v28 = vmul.f32 %v6117_v47, %v1920_v4  ;;  %v2187_v7 = vmul.f32 %v6094_v58, %v2132_v21 }
 0x1eb   : > { %v6155_v62 = vmax.f32 %v2251_v56, %v3099_v25  ;;  %v1880_v30 = vpop.f32.mrf.mxu0  ;;  %v2092_v2 = vpop.f32.mrf.mxu1 }
 0x1ec   : > { %v3115_v10 = vsel %vm3084_vm10, %v6144_v35, %v3053_v57  ;;  %v6162_v39 = vadd.f32 %v6129_v32, %v1975_v28  ;;  %v2221_v34 = vadd.f32 %v6108_v27, %v2187_v7  ;;  %v1959_v41 = vmul.f32 %v6117_v47, %v1880_v30 }
 0x1ed   : > { %8129 = vst [vmem:[#allocation9_spill] sm:$0xff] %v6155_v62  ;;  %v6166_v44 = vmax.f32 %v2235_v23, %v3115_v10  ;;  %v2171_v42 = vmul.f32 %v6094_v58, %v2092_v2  ;;  %v7941_v31 = vrot.slane %v6155_v62, 2  ;;  %v2287_v28 = vadd.s32 152, %v6121_v19 }
 0x1ee   : > { %v2041_v46 = vmax.f32 %v6162_v39, 0.0  ;;  %v2253_v5 = vmax.f32 %v2221_v34, 0.0  ;;  %v6174_v33 = vadd.f32 %v6129_v32, %v1959_v41 }
 0x1ef   : > { %8130 = vst [vmem:[#allocation4_spill] sm:$0xff] %v6166_v44  ;;  %v6180_v18 = vadd.f32 %v6108_v27, %v2171_v42  ;;  %v7942_v10 = vrot.slane %v6166_v44, 2  ;;  %v2271_v42 = vadd.s32 24, %v6121_v19 }
 0x1f0   : > { %v6188_v11 = vmax.f32 %v7944_v52, %v2041_v46  ;;  %v3070_v22 = vrot.slane %v2253_v5, 1  ;;  %v2025_v17 = vmax.f32 %v6174_v33, 0.0 }
 0x1f1   : > { %v2237_v26 = vmax.f32 %v6180_v18, 0.0  ;;  %v1922_v48 = vpop.f32.mrf.mxu2  ;;  %v2134_v50 = vpop.f32.mrf.mxu3 }
 0x1f2   : > { %8134 = vst [vmem:[#allocation7_spill] sm:$0xff] %v6188_v11  ;;  %v3098_v59 = vsel %vm3084_vm10, %v3069_v53, %v3070_v22  ;;  %v6199_v51 = vmax.f32 %v2023_v0, %v2025_v17  ;;  %v1976_v9 = vmul.f32 %v6117_v47, %v1922_v48  ;;  %v2188_v6 = vmul.f32 %v6094_v58, %v2134_v50 }
 0x1f3   : > { %v3166_v49 = vmax.f32 %v6131_v60, %v3098_v59  ;;  %v3054_v61 = vrot.slane %v2237_v26, 1  ;;  %v1882_v24 = vpop.f32.mrf.mxu0  ;;  %v2094_v55 = vpop.f32.mrf.mxu1 }
 0x1f4   : > { %8135 = vst [vmem:[#allocation6_spill] sm:$0xff] %v6199_v51  ;;  %v6207_v15 = vadd.f32 %v6129_v32, %v1976_v9  ;;  %v2222_v40 = vadd.f32 %v6108_v27, %v2188_v6  ;;  %v1960_v56 = vmul.f32 %v6117_v47, %v1882_v24  ;;  %v2172_v43 = vmul.f32 %v6094_v58, %v2094_v55 }
 0x1f5   : > { %v3198_v23 = vsel %vm3134_vm11, %v3166_v49, %v6131_v60  ;;  %v3114_v3 = vsel %vm3084_vm10, %v3053_v57, %v3054_v61 }
 0x1f6   : > { %v3230_v38 = vrot.slane %v3198_v23, 2  ;;  %v3150_v53 = vmax.f32 %v6139_v37, %v3114_v3  ;;  %v2042_v4 = vmax.f32 %v6207_v15, 0.0  ;;  %v6221_v21 = vmax.f32 %v2222_v40, 0.0 }
 0x1f7   : > { %v6224_v29 = vadd.f32 %v6129_v32, %v1960_v56  ;;  %v2206_v25 = vadd.f32 %v6108_v27, %v2172_v43  ;;  %v6279_v3 = vand.u32 15, %v2271_v42 }
 0x1f8   : > { %v3260_v60 = vsel %vm3245_vm12, %v7941_v31, %v3230_v38  ;;  %v6235_v57 = vsel %vm3118_vm13, %v3150_v53, %v6139_v37  ;;  %v6241_v7 = vmax.f32 %v7943_v16, %v2042_v4  ;;  %v3071_v8 = vrot.slane %v6221_v21, 1 }
 0x1f9   : > { %v3214_v30 = vrot.slane %v6235_v57, 2  ;;  %v2026_v2 = vmax.f32 %v6224_v29, 0.0  ;;  %v6246_v14 = vmax.f32 %v2206_v25, 0.0  ;;  %v6253_v18 = vmax.f32 %v6155_v62, %v3260_v60  ;;  %8140 = vst [vmem:[#allocation17_spill] sm:$0xff] %v6279_v3 }
 0x1fa   : > { %8136 = vst [vmem:[#allocation13_spill] sm:$0xff] %v6241_v7  ;;  %v3097_v37 = vsel %vm3084_vm10, %v3070_v22, %v3071_v8  ;;  %v1925_v34 = vpop.f32.mrf.mxu2  ;;  %v2137_v41 = vpop.f32.mrf.mxu3  ;;  %v6264_v22 = vand.u32 15, %v2287_v28  ;;  %vm3120_vm1 = vcmp.lt.s32.totalorder %v6279_v3, 15  ;;  %v2289_v29 = vadd.s32 168, %v6121_v19 }
 0x1fb   : > { %8137 = vst [vmem:[#allocation12_spill] sm:$0xff] %v6253_v18  ;;  %v6255_v0 = vmax.f32 %v2253_v5, %v3097_v37  ;;  %v6259_v54 = vmax.f32 %v2024_v63, %v2026_v2  ;;  %v3055_v48 = vrot.slane %v6246_v14, 1  ;;  %v1977_v50 = vmul.f32 %v6117_v47, %v1925_v34 }
 0x1fc   : > { %v2189_v59 = vmul.f32 %v6094_v58, %v2137_v41  ;;  %8139 = vst [vmem:[#allocation16_spill] sm:$0xff] %v6264_v22  ;;  %v1885_v9 = vpop.f32.mrf.mxu0  ;;  %v2097_v6 = vpop.f32.mrf.mxu1  ;;  %v3276_v5 = vsel %vm3245_vm12, %v7942_v10, %v3214_v30  ;;  %vm3136_vm0 = vcmp.lt.s32.totalorder %v6264_v22, 15  ;;  %vm3297_vm2 = vcmp.lt.s32.totalorder %v6264_v22, 14 }
 0x1fd   : > { %8138 = vst [vmem:[#allocation15_spill] sm:$0xff] %v6259_v54  ;;  %v3231_v49 = vrot.slane %v6255_v0, 2  ;;  %v3113_v24 = vsel %vm3084_vm10, %v3054_v61, %v3055_v48  ;;  %v6274_v55 = vadd.f32 %v6129_v32, %v1977_v50  ;;  %v1961_v40 = vmul.f32 %v6117_v47, %v1885_v9 }
 0x1fe   : > { %v3151_v56 = vmax.f32 %v2237_v26, %v3113_v24  ;;  %v2223_v43 = vadd.f32 %v6108_v27, %v2189_v59  ;;  %v2173_v13 = vmul.f32 %v6094_v58, %v2097_v6  ;;  %v6300_v34 = vmax.f32 %v6166_v44, %v3276_v5 }
 0x1ff   : > { %v3259_v53 = vsel %vm3245_vm12, %v3230_v38, %v3231_v49  ;;  %v2043_v25 = vmax.f32 %v6274_v55, 0.0  ;;  %v6285_v28 = vadd.f32 %v6129_v32, %v1961_v40  ;;  %v6397_v10 = vand.u32 15, %v2289_v29 }
 0x200   : > { %v3327_v61 = vmax.f32 %v3198_v23, %v3259_v53  ;;  %v3215_v60 = vrot.slane %v3151_v56, 2  ;;  %v2255_v63 = vmax.f32 %v2223_v43, 0.0  ;;  %v6289_v26 = vadd.f32 %v6108_v27, %v2173_v13  ;;  %8142 = vst [vmem:[#allocation19_spill] sm:$0xff] %v6300_v34 }
 0x201   : > { %v6295_v37 = vmax.f32 %v2041_v46, %v2043_v25  ;;  %v2027_v38 = vmax.f32 %v6285_v28, 0.0  ;;  %8148 = vst [vmem:[#allocation25_spill] sm:$0xff] %v6397_v10  ;;  %vm3138_vm3 = vcmp.lt.s32.totalorder %v6397_v10, 15  ;;  %vm3281_vm5 = vcmp.lt.s32.totalorder %v6279_v3, 14 }
 0x202   : > { %v3275_v41 = vsel %vm3245_vm12, %v3214_v30, %v3215_v60  ;;  %v3072_v42 = vrot.slane %v2255_v63, 1  ;;  %v7950_v50 = vmax.f32 %v6289_v26, 0.0  ;;  %v1927_v59 = vpop.f32.mrf.mxu2  ;;  %v2139_v9 = vpop.f32.mrf.mxu3  ;;  %v6305_v6 = vsel %vm3295_vm14, %v3327_v61, %v3198_v23 }
 0x203   : > { %8141 = vst [vmem:[#allocation18_spill] sm:$0xff] %v6295_v37  ;;  %v3311_v39 = vmax.f32 %v6235_v57, %v3275_v41  ;;  %v6312_v46 = vmax.f32 %v2025_v17, %v2027_v38  ;;  %v1978_v5 = vmul.f32 %v6117_v47, %v1927_v59  ;;  %v2190_v24 = vmul.f32 %v6094_v58, %v2139_v9 }
 0x204   : > { %8143 = vst [vmem:[#allocation20_spill] sm:$0xff] %v6305_v6  ;;  %v3096_v30 = vsel %vm3084_vm10, %v3071_v8, %v3072_v42  ;;  %v6321_v23 = vrot.slane %v7950_v50, 1  ;;  %v1887_v40 = vpop.f32.mrf.mxu0  ;;  %vm3299_vm9 = vcmp.lt.s32.totalorder %v6397_v10, 14 }
 0x205   : > { %8144 = vst [vmem:[#allocation21_spill] sm:$0xff] %v6312_v46  ;;  %v3168_v43 = vmax.f32 %v6221_v21, %v3096_v30  ;;  %v6325_v33 = vadd.f32 %v6129_v32, %v1978_v5  ;;  %v2224_v17 = vadd.f32 %v6108_v27, %v2190_v24  ;;  %v1962_v13 = vmul.f32 %v6117_v47, %v1887_v40  ;;  %v2099_v5 = vpop.f32.mrf.mxu1 }
 0x206   : > { %v3112_v8 = vsel %vm3084_vm10, %v3055_v48, %v6321_v23  ;;  %v6336_v53 = vsel %vm3279_vm15, %v3311_v39, %v6235_v57  ;;  %vm3406_vm15 = vcmp.lt.s32.totalorder %v6121_v19, 4 }
 0x207   : > { %v3200_v61 = vsel %vm3136_vm0, %v3168_v43, %v6221_v21  ;;  %v3152_v41 = vmax.f32 %v6246_v14, %v3112_v8  ;;  %v7949_v59 = vmax.f32 %v6325_v33, 0.0  ;;  %v6341_v9 = vmax.f32 %v2224_v17, 0.0 }
 0x208   : > { %v3232_v24 = vrot.slane %v3200_v61, 2  ;;  %v6344_v30 = vadd.f32 %v6129_v32, %v1962_v13  ;;  %v2174_v17 = vmul.f32 %v6094_v58, %v2099_v5 }
 0x209   : > { %v6347_v48 = vsel %vm3120_vm1, %v3152_v41, %v6246_v14  ;;  %v6353_v57 = vmax.f32 %v2042_v4, %v7949_v59  ;;  %v3073_v21 = vrot.slane %v6341_v9, 1 }
 0x20a   : > { %v3258_v39 = vsel %vm3245_vm12, %v3231_v49, %v3232_v24  ;;  %v7947_v40 = vrot.slane %v6347_v48, 2  ;;  %v7948_v43 = vmax.f32 %v6344_v30, 0.0 }
 0x20b   : > { %8145 = vst [vmem:[#allocation22_spill] sm:$0xff] %v6353_v57  ;;  %v3095_v14 = vsel %vm3084_vm10, %v3072_v42, %v3073_v21  ;;  %v6364_v13 = vmax.f32 %v6255_v0, %v3258_v39  ;;  %v2208_v0 = vadd.f32 %v6108_v27, %v2174_v17 }
 0x20c   : > { %v6366_v15 = vmax.f32 %v2255_v63, %v3095_v14  ;;  %v6372_v4 = vmax.f32 %v2026_v2, %v7948_v43  ;;  %v3274_v49 = vsel %vm3245_vm12, %v3215_v60, %v7947_v40 }
 0x20d   : > { %8146 = vst [vmem:[#allocation23_spill] sm:$0xff] %v6364_v13  ;;  %v6378_v8 = vmax.f32 %v3151_v56, %v3274_v49  ;;  %v6388_v56 = vmax.f32 %v2208_v0, 0.0 }
 0x20e   : > { %8147 = vst [vmem:[#allocation24_spill] sm:$0xff] %v6372_v4  ;;  %v3233_v42 = vrot.slane %v6366_v15, 2 }
 0x210   : > { %v3257_v63 = vsel %vm3245_vm12, %v3232_v24, %v3233_v42  ;;  %v1930_v41 = vpop.f32.mrf.mxu2  ;;  %v2142_v5 = vpop.f32.mrf.mxu3 }
 0x211   : > { %v3329_v2 = vmax.f32 %v3200_v61, %v3257_v63  ;;  %v1979_v39 = vmul.f32 %v6117_v47, %v1930_v41  ;;  %v2191_v14 = vmul.f32 %v6094_v58, %v2142_v5 }
 0x212   : > { %v1890_v60 = vpop.f32.mrf.mxu0  ;;  %v2102_v49 = vpop.f32.mrf.mxu1 }
 0x213   : > { %v6391_v17 = vadd.f32 %v6129_v32, %v1979_v39  ;;  %v6394_v24 = vadd.f32 %v6108_v27, %v2191_v14  ;;  %v1963_v31 = vmul.f32 %v6117_v47, %v1890_v60  ;;  %v2175_v63 = vmul.f32 %v6094_v58, %v2102_v49 }
 0x214   : > { %v6400_v41 = vsel %vm3297_vm2, %v3329_v2, %v3200_v61  ;;  %v3057_v39 = vrot.slane %v6388_v56, 1  ;;  %v2273_v60 = vadd.s32 40, %v6121_v19 }
 0x215   : > { %8149 = vst [vmem:[#allocation26_spill] sm:$0xff] %v6400_v41  ;;  %v7946_v5 = vmax.f32 %v6391_v17, 0.0  ;;  %v7945_v0 = vmax.f32 %v6394_v24, 0.0  ;;  %v6405_v16 = vadd.f32 %v6129_v32, %v1963_v31  ;;  %v6409_v14 = vadd.f32 %v6108_v27, %v2175_v63 }
 0x216   : > { %v6440_v40 = vand.u32 15, %v2273_v60 }
 0x217   : > { %v6416_v61 = vmax.f32 %v2043_v25, %v7946_v5  ;;  %v3074_v29 = vrot.slane %v7945_v0, 1  ;;  %v7951_v2 = vmax.f32 %v6405_v16, 0.0  ;;  %v2241_v31 = vmax.f32 %v6409_v14, 0.0 }
 0x218   : > { %v1932_v49 = vpop.f32.mrf.mxu2  ;;  %v2144_v63 = vpop.f32.mrf.mxu3  ;;  %v3111_v14 = vsel %vm3084_vm10, %v6321_v23, %v3057_v39  ;;  %8151 = vst [vmem:[#allocation28_spill] sm:$0xff] %v6440_v40  ;;  %vm3122_vm4 = vcmp.lt.s32.totalorder %v6440_v40, 15  ;;  %vm3283_vm7 = vcmp.lt.s32.totalorder %v6440_v40, 14 }
 0x219   : > { %v6425_v52 = vmax.f32 %v6188_v11, %v6416_v61  ;;  %v3094_v55 = vsel %vm3084_vm10, %v3073_v21, %v3074_v29  ;;  %v6433_v25 = vmax.f32 %v2027_v38, %v7951_v2  ;;  %v1980_v0 = vmul.f32 %v6117_v47, %v1932_v49 }
 0x21a   : > { %v3170_v5 = vmax.f32 %v6341_v9, %v3094_v55  ;;  %v2192_v43 = vmul.f32 %v6094_v58, %v2144_v63  ;;  %v1892_v59 = vpop.f32.mrf.mxu0  ;;  %v2104_v21 = vpop.f32.mrf.mxu1  ;;  %v3058_v60 = vrot.slane %v2241_v31, 1  ;;  %v8152_v55 = vmax.f32 %v6289_v26, 0.0 }
 0x21b   : > { %8150 = vst [vmem:[#allocation27_spill] sm:$0xff] %v6425_v52  ;;  %v6446_v28 = vadd.f32 %v6129_v32, %v1980_v0  ;;  %v1964_v38 = vmul.f32 %v6117_v47, %v1892_v59  ;;  %v2176_v49 = vmul.f32 %v6094_v58, %v2104_v21 }
 0x21c   : > { %v6453_v23 = vsel %vm3138_vm3, %v3170_v5, %v6341_v9  ;;  %v2226_v63 = vadd.f32 %v6108_v27, %v2192_v43  ;;  %v6458_v2 = vmax.f32 %v8152_v55, %v3111_v14  ;;  %v8153_v43 = vmax.f32 %v6325_v33, 0.0 }
 0x21d   : > { %v7954_v50 = vrot.slane %v6453_v23, 2  ;;  %v7953_v0 = vmax.f32 %v6446_v28, 0.0  ;;  %v6463_v59 = vadd.f32 %v6129_v32, %v1964_v38  ;;  %v2210_v9 = vadd.f32 %v6108_v27, %v2176_v49 }
 0x21e   : > { %v6466_v21 = vmax.f32 %v2226_v63, 0.0  ;;  %v2291_v38 = vadd.s32 184, %v6121_v19  ;;  %v3110_v63 = vsel %vm3084_vm10, %v3057_v39, %v3058_v60 }
 0x21f   : > { %v3256_v26 = vsel %vm3245_vm12, %v3233_v42, %v7954_v50  ;;  %v6477_v5 = vmax.f32 %v8153_v43, %v7953_v0  ;;  %v7959_v14 = vmax.f32 %v6463_v59, 0.0  ;;  %v6483_v55 = vmax.f32 %v2210_v9, 0.0 }
 0x220   : > { %v3075_v43 = vrot.slane %v6466_v21, 1  ;;  %v8155_v0 = vmax.f32 %v6344_v30, 0.0  ;;  %v3154_v44 = vmax.f32 %v6388_v56, %v3110_v63 }
 0x221   : > { %v6490_v33 = vmax.f32 %v6241_v7, %v6477_v5  ;;  %v1935_v39 = vpop.f32.mrf.mxu2  ;;  %v2147_v9 = vpop.f32.mrf.mxu3  ;;  %v7962_v49 = vrot.slane %v6483_v55, 1  ;;  %v8158_v7 = vrot.slane %v6347_v48, 2 }
 0x222   : > { %v6497_v50 = vmax.f32 %v8155_v0, %v7959_v14  ;;  %v1981_v62 = vmul.f32 %v6117_v47, %v1935_v39  ;;  %v2193_v42 = vmul.f32 %v6094_v58, %v2147_v9  ;;  %v2275_v14 = vadd.s32 56, %v6121_v19 }
 0x223   : > { %8154 = vst [vmem:[#allocation29_spill] sm:$0xff] %v6490_v33  ;;  %v6506_v33 = vand.u32 15, %v2291_v38  ;;  %v1895_v30 = vpop.f32.mrf.mxu0  ;;  %v2107_v0 = vpop.f32.mrf.mxu1  ;;  %v3109_v39 = vsel %vm3084_vm10, %v3058_v60, %v7962_v49  ;;  %v8157_v38 = vrot.slane %v6458_v2, 2  ;;  %v3093_v1 = vsel %vm3084_vm10, %v3074_v29, %v3075_v43 }
 0x224   : > { %8156 = vst [vmem:[#allocation30_spill] sm:$0xff] %v6497_v50  ;;  %v6514_v9 = vadd.f32 %v6129_v32, %v1981_v62  ;;  %v6517_v12 = vadd.f32 %v6108_v27, %v2193_v42  ;;  %v1965_v63 = vmul.f32 %v6117_v47, %v1895_v30  ;;  %v2177_v60 = vmul.f32 %v6094_v58, %v2107_v0 }
 0x225   : > { %v3273_v54 = vsel %vm3245_vm12, %v8158_v7, %v8157_v38  ;;  %v6531_v42 = vmax.f32 %v2241_v31, %v3109_v39  ;;  %v6541_v7 = vsel %vm3122_vm4, %v3154_v44, %v6388_v56  ;;  %vm3140_vm6 = vcmp.lt.s32.totalorder %v6506_v33, 15 }
 0x226   : > { %v7964_v30 = vmax.f32 %v6514_v9, 0.0  ;;  %v7965_v49 = vmax.f32 %v6517_v12, 0.0  ;;  %v6536_v35 = vadd.f32 %v6129_v32, %v1965_v63  ;;  %v6545_v29 = vadd.f32 %v6108_v27, %v2177_v60 }
 0x227   : > { %v6547_v0 = vand.u32 15, %v2275_v14  ;;  %v6550_v31 = vmax.f32 %v6366_v15, %v3256_v26  ;;  %v8160_v39 = vmax.f32 %v6391_v17, 0.0  ;;  %v3313_v14 = vmax.f32 %v6347_v48, %v3273_v54 }
 0x228   : > { %v6560_v44 = vrot.slane %v7965_v49, 1  ;;  %v8161_v60 = vmax.f32 %v6394_v24, 0.0  ;;  %v7972_v26 = vmax.f32 %v6545_v29, 0.0  ;;  %v8163_v54 = vmax.f32 %v6536_v35, 0.0 }
 0x229   : > { %8159 = vst [vmem:[#allocation31_spill] sm:$0xff] %v6550_v31  ;;  %v6556_v63 = vmax.f32 %v8160_v39, %v7964_v30  ;;  %v1937_v62 = vpop.f32.mrf.mxu2  ;;  %v2149_v17 = vpop.f32.mrf.mxu3  ;;  %v3218_v30 = vrot.slane %v6541_v7, 2  ;;  %v8164_v24 = vmax.f32 %v6405_v16, 0.0  ;;  %vm3124_vm8 = vcmp.lt.s32.totalorder %v6547_v0, 15 }
 0x22a   : > { %v6567_v15 = vmax.f32 %v8161_v60, %v3093_v1  ;;  %v3092_v60 = vsel %vm3084_vm10, %v3075_v43, %v6560_v44  ;;  %v3060_v39 = vrot.slane %v7972_v26, 1  ;;  %v1982_v38 = vmul.f32 %v6117_v47, %v1937_v62 }
 0x22b   : > { %v6575_v56 = vmax.f32 %v6295_v37, %v6556_v63  ;;  %v6581_v1 = vmax.f32 %v8164_v24, %v8163_v54  ;;  %v2194_v49 = vmul.f32 %v6094_v58, %v2149_v17  ;;  %v1897_v22 = vpop.f32.mrf.mxu0  ;;  %v2109_v36 = vpop.f32.mrf.mxu1  ;;  %v2293_v17 = vadd.s32 200, %v6121_v19 }
 0x22c   : > { %v1966_v54 = vmul.f32 %v6117_v47, %v1897_v22  ;;  %v2178_v24 = vmul.f32 %v6094_v58, %v2109_v36  ;;  %v3235_v20 = vrot.slane %v6567_v15, 2  ;;  %v6599_v26 = vadd.f32 %v6129_v32, %v1982_v38 }
 0x22d   : > { %8162 = vst [vmem:[#allocation32_spill] sm:$0xff] %v6575_v56  ;;  %v2228_v62 = vadd.f32 %v6108_v27, %v2194_v49  ;;  %v8165_v51 = vrot.slane %v6531_v42, 2  ;;  %v3172_v36 = vmax.f32 %v6466_v21, %v3092_v60  ;;  %v8166_v38 = vrot.slane %v6483_v55, 1 }
 0x22e   : > { %v6610_v16 = vadd.f32 %v6129_v32, %v1966_v54  ;;  %v2212_v43 = vadd.f32 %v6108_v27, %v2178_v24  ;;  %v8167_v37 = vrot.slane %v6458_v2, 2  ;;  %v2277_v24 = vadd.s32 72, %v6121_v19 }
 0x22f   : > { %v3271_v22 = vsel %vm3245_vm12, %v3218_v30, %v8165_v51  ;;  %v3108_v49 = vsel %vm3084_vm10, %v8166_v38, %v3060_v39  ;;  %v6618_v52 = vmax.f32 %v2228_v62, 0.0  ;;  %v6631_v11 = vsel %vm3281_vm5, %v3313_v14, %v6347_v48 }
 0x230   : > { %v3272_v51 = vsel %vm3245_vm12, %v8167_v37, %v3218_v30  ;;  %v6625_v54 = vmax.f32 %v2212_v43, 0.0  ;;  %v8168_v38 = vrot.slane %v6453_v23, 2  ;;  %v3315_v46 = vmax.f32 %v6541_v7, %v3271_v22 }
 0x231   : > { %v8169_v37 = vmax.f32 %v6599_v26, 0.0  ;;  %v8170_v30 = vmax.f32 %v6446_v28, 0.0  ;;  %v6644_v60 = vand.u32 15, %v2293_v17  ;;  %v6649_v48 = vsel %vm3140_vm6, %v3172_v36, %v6466_v21 }
 0x232   : > { %v3255_v62 = vsel %vm3245_vm12, %v8168_v38, %v3235_v20  ;;  %v3156_v14 = vmax.f32 %v6483_v55, %v3108_v49  ;;  %v8172_v3 = vmax.f32 %v6610_v16, 0.0  ;;  %v8173_v38 = vmax.f32 %v6463_v59, 0.0  ;;  %v1940_v56 = vpop.f32.mrf.mxu2  ;;  %v2152_v45 = vpop.f32.mrf.mxu3 }
 0x233   : > { %v6642_v43 = vmax.f32 %v8170_v30, %v8169_v37  ;;  %v6659_v28 = vmax.f32 %v6458_v2, %v3272_v51  ;;  %v3077_v21 = vrot.slane %v6618_v52, 1  ;;  %v3061_v36 = vrot.slane %v6625_v54, 1 }
 0x234   : > { %v6656_v22 = vmax.f32 %v8173_v38, %v8172_v3  ;;  %v2195_v49 = vmul.f32 %v6094_v58, %v2152_v45  ;;  %v3331_v37 = vmax.f32 %v6453_v23, %v3255_v62  ;;  %v1900_v59 = vpop.f32.mrf.mxu0  ;;  %v2112_v30 = vpop.f32.mrf.mxu1  ;;  %v6671_v38 = vand.u32 15, %v2277_v24 }
 0x235   : > { %8171 = vst [vmem:[#allocation33_spill] sm:$0xff] %v6642_v43  ;;  %v6663_v17 = vmax.f32 %v6353_v57, %v6642_v43  ;;  %v3236_v51 = vrot.slane %v6649_v48, 2  ;;  %vm3142_vm11 = vcmp.lt.s32.totalorder %v6644_v60, 15  ;;  %v6682_v45 = vsel %vm3283_vm7, %v3315_v46, %v6541_v7 }
 0x236   : > { %8174 = vst [vmem:[#allocation34_spill] sm:$0xff] %v6656_v22  ;;  %v6676_v57 = vadd.f32 %v6108_v27, %v2195_v49  ;;  %v6687_v62 = vsel %vm3124_vm8, %v3156_v14, %v6483_v55  ;;  %v2179_v24 = vmul.f32 %v6094_v58, %v2112_v30  ;;  %v3091_v49 = vsel %vm3084_vm10, %v6560_v44, %v3077_v21 }
 0x237   : > { %8175 = vst [vmem:[#allocation35_spill] sm:$0xff] %v6659_v28  ;;  %v3107_v4 = vsel %vm3084_vm10, %v3060_v39, %v3061_v36  ;;  %v1983_v46 = vmul.f32 %v6117_v47, %v1940_v56  ;;  %v1967_v55 = vmul.f32 %v6117_v47, %v1900_v59  ;;  %vm3126_vm13 = vcmp.lt.s32.totalorder %v6671_v38, 15 }
 0x238   : > { %8176 = vst [vmem:[#allocation36_spill] sm:$0xff] %v6663_v17  ;;  %v2261_v7 = vmax.f32 %v6676_v57, 0.0  ;;  %v6701_v14 = vadd.f32 %v6108_v27, %v2179_v24  ;;  %v6707_v30 = vsel %vm3299_vm9, %v3331_v37, %v6453_v23  ;;  %v3254_v39 = vsel %vm3245_vm12, %v3235_v20, %v3236_v51 }
 0x239   : > { %8177 = vst [vmem:[#allocation37_spill] sm:$0xff] %v6682_v45  ;;  %v3220_v56 = vrot.slane %v6687_v62, 2  ;;  %v2295_v59 = vadd.s32 216, %v6121_v19  ;;  %v8179_v24 = vmax.f32 %v6517_v12, 0.0  ;;  %v8180_v2 = vmax.f32 %v6545_v29, 0.0 }
 0x23a   : > { %8178 = vst [vmem:[#allocation38_spill] sm:$0xff] %v6707_v30  ;;  %v3078_v57 = vrot.slane %v2261_v7, 1  ;;  %v2245_v23 = vmax.f32 %v6701_v14, 0.0  ;;  %v1942_v37 = vpop.f32.mrf.mxu2  ;;  %v2154_v44 = vpop.f32.mrf.mxu3  ;;  %v2279_v22 = vadd.s32 88, %v6121_v19  ;;  %v6725_v20 = vadd.f32 %v6129_v32, %v1983_v46 }
 0x23b   : > { %v6716_v3 = vmax.f32 %v8179_v24, %v3091_v49  ;;  %v6720_v17 = vmax.f32 %v8180_v2, %v3107_v4  ;;  %v1984_v12 = vmul.f32 %v6117_v47, %v1942_v37  ;;  %v2196_v49 = vmul.f32 %v6094_v58, %v2154_v44 }
 0x23c   : > { %v3090_v43 = vsel %vm3084_vm10, %v3077_v21, %v3078_v57  ;;  %v6733_v4 = vadd.f32 %v6129_v32, %v1967_v55  ;;  %v3062_v2 = vrot.slane %v2245_v23, 1  ;;  %v1902_v14 = vpop.f32.mrf.mxu0  ;;  %v2114_v24 = vpop.f32.mrf.mxu1  ;;  %v6736_v10 = vmax.f32 %v6567_v15, %v3254_v39 }
 0x23d   : > { %v3174_v29 = vmax.f32 %v6618_v52, %v3090_v43  ;;  %v6739_v46 = vadd.f32 %v6129_v32, %v1984_v12  ;;  %v2230_v21 = vadd.f32 %v6108_v27, %v2196_v49  ;;  %v1968_v37 = vmul.f32 %v6117_v47, %v1902_v14 }
 0x23e   : > { %8181 = vst [vmem:[#allocation39_spill] sm:$0xff] %v6736_v10  ;;  %v2180_v44 = vmul.f32 %v6094_v58, %v2114_v24  ;;  %v3237_v43 = vrot.slane %v6716_v3, 2  ;;  %v3221_v55 = vrot.slane %v6720_v17, 2  ;;  %v3106_v15 = vsel %vm3084_vm10, %v3061_v36, %v3062_v2 }
 0x23f   : > { %8182 = vst [vmem:[#allocation40_spill] sm:$0xff] %v6739_v46  ;;  %v6749_v40 = vsel %vm3142_vm11, %v3174_v29, %v6618_v52  ;;  %v3158_v12 = vmax.f32 %v6625_v54, %v3106_v15  ;;  %v7999_v49 = vmax.f32 %v6739_v46, 0.0  ;;  %v6756_v14 = vmax.f32 %v2230_v21, 0.0 }
 0x240   : > { %vm3285_vm14 = vcmp.lt.s32.totalorder %v6547_v0, 14  ;;  %v6761_v24 = vadd.f32 %v6129_v32, %v1968_v37  ;;  %v2214_v52 = vadd.f32 %v6108_v27, %v2180_v44  ;;  %v6764_v29 = vand.u32 15, %v2295_v59 }
 0x241   : > { %v6766_v36 = vand.u32 15, %v2279_v22  ;;  %vm3301_vm0 = vcmp.lt.s32.totalorder %v6506_v33, 14  ;;  %v3238_v15 = vrot.slane %v6749_v40, 2  ;;  %v8185_v39 = vmax.f32 %v6599_v26, 0.0 }
 0x242   : > { %8183 = vst [vmem:[#allocation41_spill] sm:$0xff] %v6761_v24  ;;  %v8001_v37 = vrot.slane %v6756_v14, 1  ;;  %v3253_v59 = vsel %vm3245_vm12, %v3236_v51, %v3237_v43  ;;  %v3269_v22 = vsel %vm3245_vm12, %v3220_v56, %v3221_v55  ;;  %v8000_v44 = vmax.f32 %v6761_v24, 0.0 }
 0x243   : > { %8184 = vst [vmem:[#allocation42_spill] sm:$0xff] %v6766_v36  ;;  %v6775_v28 = vmax.f32 %v8185_v39, %v7999_v49  ;;  %v6783_v34 = vmax.f32 %v2214_v52, 0.0  ;;  %v8187_v21 = vmax.f32 %v6725_v20, 0.0  ;;  %v8188_v46 = vmax.f32 %v6514_v9, 0.0 }
 0x244   : > { %v6794_v26 = vsel %vm3126_vm13, %v3158_v12, %v6625_v54  ;;  %v3089_v39 = vsel %vm3084_vm10, %v3078_v57, %v8001_v37  ;;  %vm3303_vm1 = vcmp.lt.s32.totalorder %v6644_v60, 14  ;;  %v8190_v9 = vmax.f32 %v6610_v16, 0.0 }
 0x245   : > { %8186 = vst [vmem:[#allocation43_spill] sm:$0xff] %v6775_v28  ;;  %v6789_v45 = vmax.f32 %v8188_v46, %v8187_v21  ;;  %v6798_v51 = vmax.f32 %v6477_v5, %v6775_v28  ;;  %v6805_v52 = vmax.f32 %v2261_v7, %v3089_v39  ;;  %v8004_v54 = vrot.slane %v6783_v34, 1 }
 0x246   : > { %v6811_v46 = vmax.f32 %v8190_v9, %v8000_v44  ;;  %v8192_v5 = vrot.slane %v6531_v42, 2  ;;  %v3317_v21 = vmax.f32 %v6687_v62, %v3269_v22  ;;  %v3252_v57 = vsel %vm3245_vm12, %v3237_v43, %v3238_v15 }
 0x247   : > { %8189 = vst [vmem:[#allocation44_spill] sm:$0xff] %v6798_v51  ;;  %v8193_v7 = vmax.f32 %v6733_v4, 0.0  ;;  %v8194_v39 = vmax.f32 %v6536_v35, 0.0  ;;  %v8003_v16 = vrot.slane %v6707_v30, 4  ;;  %v3222_v9 = vrot.slane %v6794_v26, 2 }
 0x248   : > { %8191 = vst [vmem:[#allocation45_spill] sm:$0xff] %v6811_v46  ;;  %v3270_v12 = vsel %vm3245_vm12, %v8192_v5, %v3220_v56  ;;  %v8002_v44 = vrot.slane %v6805_v52, 2  ;;  %v3105_v43 = vsel %vm3084_vm10, %v3062_v2, %v8004_v54  ;;  %v3333_v22 = vmax.f32 %v6649_v48, %v3253_v59  ;;  %v1945_v56 = vpop.f32.mrf.mxu2  ;;  %v2157_v37 = vpop.f32.mrf.mxu3 }
 0x249   : > { %v6825_v49 = vmax.f32 %v8194_v39, %v8193_v7  ;;  %v6839_v35 = vmax.f32 %v6416_v61, %v6789_v45  ;;  %v6841_v5 = vmax.f32 %v2245_v23, %v3105_v43  ;;  %v6844_v7 = vmax.f32 %v6531_v42, %v3270_v12 }
 0x24a   : > { %v3251_v39 = vsel %vm3245_vm12, %v3238_v15, %v8002_v44  ;;  %vm3287_vm2 = vcmp.lt.s32.totalorder %v6671_v38, 14  ;;  %v8195_v2 = vrot.slane %v6550_v31, 4  ;;  %v8198_v23 = vrot.slane %v6400_v41, 4  ;;  %v2117_v54 = vpop.f32.mrf.mxu1 }
 0x24b   : > { %v6868_v15 = vmax.f32 %v6716_v3, %v3252_v57  ;;  %v8007_v12 = vrot.slane %v6841_v5, 2  ;;  %v1985_v43 = vmul.f32 %v6117_v47, %v1945_v56  ;;  %v2197_v44 = vmul.f32 %v6094_v58, %v2157_v37 }
 0x24c   : > { %v6857_v61 = vsel %vm3406_vm15, %v8195_v2, %v8003_v16  ;;  %v8197_v42 = vmov %v8195_v2  ;;  %vm3144_vm3 = vcmp.lt.s32.totalorder %v6764_v29, 15  ;;  %v1905_v16 = vpop.f32.mrf.mxu0  ;;  %v2297_v50 = vadd.s32 232, %v6121_v19 }
 0x24d   : > { %8196 = vst [vmem:[#allocation46_spill] sm:$0xff] %v6857_v61  ;;  %v6865_v59 = vsel %vm3406_vm15, %v8198_v23, %v8197_v42  ;;  %v3268_v42 = vsel %vm3245_vm12, %v3221_v55, %v3222_v9  ;;  %v6882_v3 = vsel %vm3285_vm14, %v3317_v21, %v6687_v62  ;;  %v3335_v57 = vmax.f32 %v6749_v40, %v3251_v39 }
 0x24e   : > { %8199 = vst [vmem:[#allocation47_spill] sm:$0xff] %v6865_v59  ;;  %v6886_v37 = vadd.f32 %v6108_v27, %v2197_v44  ;;  %v6891_v56 = vsel %vm3301_vm0, %v3333_v22, %v6649_v48  ;;  %v3267_v55 = vsel %vm3245_vm12, %v3222_v9, %v8007_v12  ;;  %v6899_v62 = vadd.f32 %v6129_v32, %v1985_v43 }
 0x24f   : > { %8200 = vst [vmem:[#allocation48_spill] sm:$0xff] %v6868_v15  ;;  %v1969_v21 = vmul.f32 %v6117_v47, %v1905_v16  ;;  %v2181_v44 = vmul.f32 %v6094_v58, %v2117_v54  ;;  %vm3128_vm4 = vcmp.lt.s32.totalorder %v6766_v36, 15  ;;  %v3398_v39 = vrot.slane %v6868_v15, 4 }
 0x250   : > { %8201 = vst [vmem:[#allocation49_spill] sm:$0xff] %v6891_v56  ;;  %v2263_v48 = vmax.f32 %v6886_v37, 0.0  ;;  %v6907_v22 = vmax.f32 %v6720_v17, %v3268_v42  ;;  %v8202_v2 = vmov %v8198_v23  ;;  %v8203_v9 = vrot.slane %v6364_v13, 4  ;;  %v1947_v46 = vpop.f32.mrf.mxu2  ;;  %v2159_v51 = vpop.f32.mrf.mxu3 }
 0x251   : > { %v6918_v16 = vadd.f32 %v6129_v32, %v1969_v21  ;;  %v6921_v54 = vadd.f32 %v6108_v27, %v2181_v44  ;;  %v6923_v23 = vand.u32 15, %v2297_v50  ;;  %v3397_v37 = vrot.slane %v6891_v56, 4 }
 0x252   : > { %v6915_v43 = vsel %vm3406_vm15, %v8203_v9, %v8202_v2  ;;  %v6929_v17 = vsel %vm3303_vm1, %v3335_v57, %v6749_v40  ;;  %v3319_v42 = vmax.f32 %v6794_v26, %v3267_v55  ;;  %v3080_v12 = vrot.slane %v2263_v48, 1 }
 0x253   : > { %8204 = vst [vmem:[#allocation50_spill] sm:$0xff] %v6915_v43  ;;  %v8207_v2 = vmov %v8203_v9  ;;  %v8208_v21 = vrot.slane %v6305_v6, 4  ;;  %v3381_v40 = vrot.slane %v6882_v3, 4  ;;  %v3396_v57 = vrot.slane %v6736_v10, 4 }
 0x254   : > { %8205 = vst [vmem:[#allocation51_spill] sm:$0xff] %v6923_v23  ;;  %v8209_v55 = vrot.slane %v6756_v14, 1  ;;  %v2198_v24 = vmul.f32 %v6094_v58, %v2159_v51  ;;  %v8211_v56 = vmax.f32 %v6921_v54, 0.0  ;;  %v1907_v31 = vpop.f32.mrf.mxu0  ;;  %v8213_v50 = vmax.f32 %v6899_v62, 0.0 }
 0x255   : > { %8206 = vst [vmem:[#allocation52_spill] sm:$0xff] %v6929_v17  ;;  %v6938_v44 = vsel %vm3406_vm15, %v8208_v21, %v8207_v2  ;;  %v3382_v2 = vrot.slane %v6907_v22, 4  ;;  %v6952_v21 = vsel %vm3406_vm15, %v3397_v37, %v3398_v39  ;;  %vm3305_vm5 = vcmp.lt.s32.totalorder %v6764_v29, 14 }
 0x256   : > { %v3088_v28 = vsel %vm3084_vm10, %v8209_v55, %v3080_v12  ;;  %8210 = vst [vmem:[#allocation53_spill] sm:$0xff] %v6952_v21  ;;  %v6959_v10 = vrot.slane %v8211_v56, 1  ;;  %v2119_v55 = vpop.f32.mrf.mxu1  ;;  %v2232_v51 = vadd.f32 %v6108_v27, %v2198_v24  ;;  %v6966_v21 = vsel %vm3287_vm2, %v3319_v42, %v6794_v26 }
 0x257   : > { %v3176_v9 = vmax.f32 %v6756_v14, %v3088_v28  ;;  %v2182_v61 = vmul.f32 %v6094_v58, %v2119_v55  ;;  %v6970_v28 = vsel %vm3406_vm15, %v3396_v57, %v3397_v37  ;;  %v8214_v56 = vmax.f32 %v6725_v20, 0.0 }
 0x258   : > { %8212 = vst [vmem:[#allocation54_spill] sm:$0xff] %v6970_v28  ;;  %v8215_v58 = vrot.slane %v6783_v34, 1  ;;  %v8216_v42 = vrot.slane %v6707_v30, 4  ;;  %v8229_v30 = vrot.slane %v6378_v8, 4  ;;  %vm3146_vm6 = vcmp.lt.s32.totalorder %v6923_v23, 15 }
 0x259   : > { %v6976_v15 = vmax.f32 %v8214_v56, %v8213_v50  ;;  %v3208_v24 = vsel %vm3144_vm3, %v3176_v9, %v6756_v14  ;;  %v1986_v50 = vmul.f32 %v6117_v47, %v1947_v46  ;;  %v6994_v56 = vmax.f32 %v2232_v51, 0.0  ;;  %v1950_v36 = vpop.f32.mrf.mxu2 }
 0x25a   : > { %v3104_v26 = vsel %vm3084_vm10, %v8215_v58, %v6959_v10  ;;  %v6990_v37 = vsel %vm3406_vm15, %v8216_v42, %v3396_v57  ;;  %v3240_v55 = vrot.slane %v3208_v24, 2  ;;  %v8218_v14 = vmax.f32 %v6918_v16, 0.0 }
 0x25b   : > { %8217 = vst [vmem:[#allocation55_spill] sm:$0xff] %v6990_v37  ;;  %v3160_v20 = vmax.f32 %v6783_v34, %v3104_v26  ;;  %v8219_v9 = vmax.f32 %v6733_v4, 0.0  ;;  %v2216_v28 = vadd.f32 %v6108_v27, %v2182_v61  ;;  %v8220_v42 = vrot.slane %v6929_v17, 4 }
 0x25c   : > { %v3081_v51 = vrot.slane %v6994_v56, 1  ;;  %v8223_v4 = vrot.slane %v6305_v6, 4  ;;  %v7027_v61 = vsel %vm3406_vm15, %v3381_v40, %v3382_v2  ;;  %v1970_v57 = vmul.f32 %v6117_v47, %v1907_v31 }
 0x25d   : > { %v7001_v58 = vmax.f32 %v8219_v9, %v8218_v14  ;;  %v7009_v26 = vsel %vm3406_vm15, %v3398_v39, %v8220_v42  ;;  %v7014_v46 = vsel %vm3128_vm4, %v3160_v20, %v6783_v34  ;;  %v8224_v14 = vrot.slane %v6253_v18, 4 }
 0x25e   : > { %8221 = vst [vmem:[#allocation56_spill] sm:$0xff] %v7009_v26  ;;  %v7031_v39 = vmax.f32 %v6556_v63, %v6976_v15  ;;  %v8225_v34 = vrot.slane %v6805_v52, 2  ;;  %v8024_v9 = vrot.slane %v7014_v46, 2  ;;  %v7038_v42 = vmax.f32 %v2216_v28, 0.0  ;;  %v2162_v63 = vpop.f32.mrf.mxu3  ;;  %v7077_v28 = vld [vmem:[%s7924_s3 + $0x2] ss:$0 sm:$0xff] }
 0x25f   : > { %8222 = vst [vmem:[#allocation57_spill] sm:$0xff] %v7014_v46  ;;  %v7023_v27 = vsel %vm3406_vm15, %v8224_v14, %v8223_v4  ;;  %v7041_v4 = vadd.f32 %v6129_v32, %v1986_v50  ;;  %v3087_v14 = vsel %vm3084_vm10, %v3080_v12, %v3081_v51  ;;  %v8228_v26 = vrot.slane %v6631_v11, 4 }
 0x260   : > { %v3250_v20 = vsel %vm3245_vm12, %v8225_v34, %v3240_v55  ;;  %8226 = vst [vmem:[#allocation58_spill] sm:$0xff] %v7038_v42  ;;  %v8230_v50 = vrot.slane %v6841_v5, 2  ;;  %v7062_v12 = vmax.f32 %v2263_v48, %v3087_v14  ;;  %v8231_v37 = vrot.slane %v6966_v21, 4 }
 0x261   : > { %8227 = vst [vmem:[#allocation59_spill] sm:$0xff] %v7041_v4  ;;  %v7052_v34 = vsel %vm3406_vm15, %v8229_v30, %v8228_v26  ;;  %v7071_v30 = vmax.f32 %v6805_v52, %v3250_v20  ;;  %v1987_v26 = vmul.f32 %v6117_v47, %v1950_v36  ;;  %v8234_v48 = vrot.slane %v6844_v7, 4 }
 0x262   : > { %v3266_v31 = vsel %vm3245_vm12, %v8230_v50, %v8024_v9  ;;  %v7068_v41 = vsel %vm3406_vm15, %v3382_v2, %v8231_v37  ;;  %8233 = vst [vmem:[#allocation61_spill] sm:$0xff] %v7077_v28  ;;  %v2199_v50 = vmul.f32 %v7077_v28, %v2162_v63  ;;  %v3241_v47 = vrot.slane %v7062_v12, 2  ;;  %v1910_v37 = vpop.f32.mrf.mxu0 }
 0x263   : > { %8232 = vst [vmem:[#allocation60_spill] sm:$0xff] %v7071_v30  ;;  %v7085_v2 = vsel %vm3406_vm15, %v8234_v48, %v3381_v40  ;;  %v7088_v52 = vmax.f32 %v6841_v5, %v3266_v31  ;;  %v8236_v20 = vrot.slane %v6378_v8, 4  ;;  %v8237_v14 = vrot.slane %v6336_v53, 4  ;;  %v7108_v31 = vld [vmem:[%s7924_s3 + $0x3] ss:$0 sm:$0xff] }
 0x264   : > { %v7102_v40 = vadd.f32 %v6129_v32, %v1970_v57  ;;  %v2021_v5 = vadd.f32 %v6129_v32, %v1987_v26  ;;  %8239 = vst [vmem:[#allocation64_spill] sm:$0xff] %v7108_v31  ;;  %v7111_v48 = vadd.f32 %v7108_v31, %v2199_v50  ;;  %v3249_v36 = vsel %vm3245_vm12, %v3240_v55, %v3241_v47  ;;  %v8243_v26 = vld [vmem:[#allocation37_spill] sm:$0xff]  ;;  %v8246_v31 = vld [vmem:[#allocation19_spill] sm:$0xff] }
 0x265   : > { %8235 = vst [vmem:[#allocation62_spill] sm:$0xff] %v7088_v52  ;;  %v7098_v63 = vsel %vm3406_vm15, %v8237_v14, %v8236_v20  ;;  %v7118_v20 = vld [vmem:[%s7924_s3] ss:$0 sm:$0xff]  ;;  %v8242_v32 = vrot.slane %v6844_v7, 4  ;;  %v8244_v14 = vrot.slane %v8243_v26, 4  ;;  %v8245_v50 = vrot.slane %v6336_v53, 4 }
 0x266   : > { %8238 = vst [vmem:[#allocation63_spill] sm:$0xff] %v7102_v40  ;;  %v1971_v57 = vmul.f32 %v7118_v20, %v1910_v37  ;;  %v8247_v28 = vrot.slane %v8246_v31, 4  ;;  %v3400_v46 = vrot.slane %v7071_v30, 4  ;;  %v3337_v59 = vmax.f32 %v3208_v24, %v3249_v36 }
 0x267   : > { %8240 = vst [vmem:[#allocation65_spill] sm:$0xff] %v7111_v48  ;;  %v7127_v9 = vsel %vm3406_vm15, %v8244_v14, %v8242_v32  ;;  %v7138_v37 = vmax.f32 %v2021_v5, 0.0  ;;  %v8249_v32 = vrot.slane %v7038_v42, 1  ;;  %v8251_v36 = vrot.slane %v8243_v26, 4  ;;  %v8252_v5 = vld [vmem:[#allocation35_spill] sm:$0xff] }
 0x268   : > { %8241 = vst [vmem:[#allocation66_spill] sm:$0xff] %v7118_v20  ;;  %v7135_v55 = vsel %vm3406_vm15, %v8247_v28, %v8245_v50  ;;  %v7150_v28 = vld [vmem:[%s7924_s3 + $0x1] ss:$0 sm:$0xff]  ;;  %v8253_v30 = vrot.slane %v8252_v5, 4  ;;  %v7163_v20 = vsel %vm3305_vm5, %v3337_v59, %v3208_v24  ;;  %v8257_v42 = vmax.f32 %v7111_v48, 0.0 }
 0x269   : > { %8248 = vst [vmem:[#allocation37_spill] sm:$0xff] %v7138_v37  ;;  %v3103_v14 = vsel %vm3084_vm10, %v6959_v10, %v8249_v32  ;;  %v2005_v50 = vadd.f32 %v7150_v28, %v1971_v57  ;;  %v8255_v10 = vmax.f32 %v6899_v62, 0.0  ;;  %v8264_v62 = vrot.slane %v8252_v5, 4 }
 0x26a   : > { %8250 = vst [vmem:[#allocation67_spill] sm:$0xff] %v7150_v28  ;;  %v7159_v13 = vsel %vm3406_vm15, %v8253_v30, %v8251_v36  ;;  %v7172_v57 = vrot.slane %v8257_v42, 1  ;;  %v7176_v28 = vmax.f32 %v6976_v15, %v7138_v37  ;;  %v8260_v30 = vmax.f32 %v7041_v4, 0.0  ;;  %v8261_v36 = vld [vmem:[#allocation40_spill] sm:$0xff] }
 0x26b   : > { %8254 = vst [vmem:[#allocation35_spill] sm:$0xff] %v7163_v20  ;;  %v7168_v32 = vmax.f32 %v8255_v10, %v7138_v37  ;;  %v8262_v43 = vmax.f32 %v8261_v36, 0.0  ;;  %v2037_v24 = vmax.f32 %v2005_v50, 0.0  ;;  %v8265_v10 = vrot.slane %v6631_v11, 4 }
 0x26c   : > { %8258 = vst [vmem:[#allocation69_spill] sm:$0xff] %v7172_v57  ;;  %v3401_v15 = vrot.slane %v7163_v20, 4  ;;  %v3086_v48 = vsel %vm3084_vm10, %v3081_v51, %v7172_v57  ;;  %v8267_v50 = vrot.slane %v6929_v17, 4  ;;  %v8268_v36 = vmax.f32 %v6921_v54, 0.0  ;;  %v8271_v51 = vld [vmem:[#allocation10_spill] sm:$0xff]  ;;  %v8280_v20 = vld [vmem:[#allocation27_spill] sm:$0xff] }
 0x26d   : > { %8256 = vst [vmem:[#allocation68_spill] sm:$0xff] %v7168_v32  ;;  %v7182_v6 = vmax.f32 %v8262_v43, %v8260_v30  ;;  %v7191_v42 = vsel %vm3406_vm15, %v8265_v10, %v8264_v62  ;;  %v7199_v43 = vmax.f32 %v6789_v45, %v7168_v32  ;;  %v3178_v10 = vmax.f32 %v6994_v56, %v3086_v48  ;;  %v8273_v45 = vld [vmem:[#allocation32_spill] sm:$0xff]  ;;  %v8284_v17 = vld [vmem:[#allocation21_spill] sm:$0xff] }
 0x26e   : > { %8259 = vst [vmem:[#allocation70_spill] sm:$0xff] %v7176_v28  ;;  %v7205_v30 = vsel %vm3406_vm15, %v8267_v50, %v3400_v46  ;;  %v7209_v62 = vmax.f32 %v8268_v36, %v3103_v14  ;;  %v8270_v59 = vmax.f32 %v6918_v16, 0.0  ;;  %v8272_v57 = vmax.f32 %v8271_v51, 0.0  ;;  %v8278_v36 = vld [vmem:[#allocation7_spill] sm:$0xff] }
 0x26f   : > { %8263 = vst [vmem:[#allocation40_spill] sm:$0xff] %v7182_v6  ;;  %v7218_v6 = vmax.f32 %v8273_v45, %v7176_v28  ;;  %v7222_v50 = vmax.f32 %v6839_v35, %v7168_v32  ;;  %v7226_v54 = vmax.f32 %v7031_v39, %v7138_v37  ;;  %v8274_v48 = vrot.slane %v7088_v52, 4  ;;  %v8279_v28 = vld [vmem:[#allocation18_spill] sm:$0xff] }
 0x270   : > { %8266 = vst [vmem:[#allocation71_spill] sm:$0xff] %v7199_v43  ;;  %v2344_v4 = vmax.f32 %v8270_v59, %v2037_v24  ;;  %v2346_v40 = vmax.f32 %v2037_v24, %v8272_v57  ;;  %v8275_v16 = vrot.slane %v6966_v21, 4  ;;  %v7239_v57 = vsel %vm3146_vm6, %v3178_v10, %v6994_v56  ;;  %v8282_v56 = vld [vmem:[#allocation6_spill] sm:$0xff] }
 0x271   : > { %8269 = vst [vmem:[#allocation72_spill] sm:$0xff] %v7209_v62  ;;  %v8283_v10 = vmax.f32 %v8282_v56, %v6433_v25  ;;  %vm3446_vm11 = vcmp.lt.s32.totalorder %v6547_v0, 12  ;;  %vm3448_vm13 = vcmp.lt.s32.totalorder %v6671_v38, 12  ;;  %vm3462_vm2 = vcmp.lt.s32.totalorder %v6506_v33, 12 }
 0x272   : > { %v7234_v14 = vsel %vm3406_vm15, %v8275_v16, %v8274_v48  ;;  %8276 = vst [vmem:[#allocation10_spill] sm:$0xff] %v7239_v57  ;;  %v2436_v59 = vmax.f32 %v6825_v49, %v2344_v4  ;;  %v7243_v24 = vmax.f32 %v7001_v58, %v2346_v40  ;;  %v2440_v51 = vmax.f32 %v2344_v4, %v8278_v36 }
 0x273   : > { %v2442_v62 = vmax.f32 %v2346_v40, %v8279_v28  ;;  %v7250_v48 = vmax.f32 %v8280_v20, %v7199_v43  ;;  %v7254_v16 = vsel %vm3406_vm15, %v3400_v46, %v3401_v15  ;;  %v8285_v4 = vmax.f32 %v8284_v17, %v6581_v1  ;;  %v8287_v46 = vld [vmem:[#allocation14_spill] sm:$0xff] }
 0x274   : > { %8277 = vst [vmem:[#allocation73_spill] sm:$0xff] %v7243_v24  ;;  %v7259_v23 = vmax.f32 %v8283_v10, %v2436_v59  ;;  %v8286_v40 = vmax.f32 %v6433_v25, %v6825_v49  ;;  %v2532_v52 = vmax.f32 %v2436_v59, %v8280_v20  ;;  %vm3440_vm7 = vcmp.lt.s32.totalorder %v8287_v46, 12  ;;  %v8290_v49 = vld [vmem:[#allocation17_spill] sm:$0xff]  ;;  %v8291_v20 = vld [vmem:[#allocation28_spill] sm:$0xff] }
 0x275   : > { %8281 = vst [vmem:[#allocation7_spill] sm:$0xff] %v7254_v16  ;;  %v7265_v36 = vmax.f32 %v8285_v4, %v7243_v24  ;;  %v8288_v16 = vrot.slane %v7239_v57, 2  ;;  %v8289_v10 = vmax.f32 %v6581_v1, %v7001_v58  ;;  %v2536_v25 = vmax.f32 %v2440_v51, %v6839_v35  ;;  %v8301_v4 = vld [vmem:[#allocation47_spill] sm:$0xff]  ;;  %v8311_v57 = vld [vmem:[#allocation56_spill] sm:$0xff] }
 0x276   : > { %v7270_v28 = vmax.f32 %v8286_v40, %v2440_v51  ;;  %vm3442_vm8 = vcmp.lt.s32.totalorder %v8290_v49, 12  ;;  %vm3444_vm9 = vcmp.lt.s32.totalorder %v8291_v20, 12  ;;  %v2538_v1 = vmax.f32 %v2442_v62, %v7031_v39  ;;  %v8293_v40 = vld [vmem:[#allocation5_spill] sm:$0xff] }
 0x277   : > { %v3248_v56 = vsel %vm3245_vm12, %v3241_v47, %v8288_v16  ;;  %v7281_v17 = vmax.f32 %v8289_v10, %v2442_v62  ;;  %v2620_v58 = vmax.f32 %v7259_v23, %v7250_v48  ;;  %v2622_v59 = vmax.f32 %v7265_v36, %v7218_v6  ;;  %v8296_v62 = vld [vmem:[#allocation16_spill] sm:$0xff]  ;;  %v8297_v36 = vld [vmem:[#allocation25_spill] sm:$0xff] }
 0x278   : > { %v7291_v47 = vmax.f32 %v7062_v12, %v3248_v56  ;;  %v2624_v35 = vmax.f32 %v7270_v28, %v7222_v50  ;;  %v2628_v16 = vmax.f32 %v2532_v52, %v7199_v43  ;;  %vm3456_vm14 = vcmp.lt.s32.totalorder %v8293_v40, 12  ;;  %v8316_v43 = vld [vmem:[#allocation35_spill] sm:$0xff] }
 0x279   : > { %v2626_v51 = vmax.f32 %v7281_v17, %v7226_v54  ;;  %v7306_v39 = vmax.f32 %v2536_v25, %v7168_v32  ;;  %v7309_v23 = vmax.f32 %v2538_v1, %v7138_v37  ;;  %vm3458_vm0 = vcmp.lt.s32.totalorder %v8296_v62, 12  ;;  %v8305_v37 = vld [vmem:[#allocation55_spill] sm:$0xff]  ;;  %v8307_v32 = vld [vmem:[#allocation54_spill] sm:$0xff] }
 0x27a   : > { %8292 = vst [vmem:[#allocation18_spill] sm:$0xff] %v7291_v47  ;;  %v8058_v12 = vrot.slane %v7291_v47, 4  ;;  %vm3460_vm1 = vcmp.lt.s32.totalorder %v8297_v36, 12  ;;  %vm3464_vm3 = vcmp.lt.s32.totalorder %v6644_v60, 12  ;;  %vm3466_vm4 = vcmp.lt.s32.totalorder %v6764_v29, 12  ;;  %v8309_v47 = vld [vmem:[#allocation53_spill] sm:$0xff] }
 0x27b   : > { %8294 = vst [vmem:[#allocation27_spill] sm:$0xff] %v7306_v39  ;;  %v3471_v28 = vmax.f32 %v8246_v31, %v7135_v55  ;;  %v3472_v56 = vmax.f32 %v6336_v53, %v7098_v63  ;;  %v3473_v10 = vmax.f32 %v6378_v8, %v7052_v34  ;;  %v3474_v17 = vmax.f32 %v6631_v11, %v7191_v42  ;;  %v8299_v42 = vld [vmem:[#allocation50_spill] sm:$0xff] }
 0x27c   : > { %8295 = vst [vmem:[#allocation6_spill] sm:$0xff] %v7309_v23  ;;  %v3410_v52 = vsel %vm3406_vm15, %v3401_v15, %v8058_v12  ;;  %v3475_v25 = vmax.f32 %v8252_v5, %v7159_v13  ;;  %v3476_v1 = vmax.f32 %v8243_v26, %v7127_v9  ;;  %v3477_v15 = vmax.f32 %v6844_v7, %v7085_v2  ;;  %v8298_v13 = vld [vmem:[#allocation20_spill] sm:$0xff]  ;;  %v8300_v9 = vld [vmem:[#allocation23_spill] sm:$0xff]  ;;  %v8302_v7 = vld [vmem:[#allocation26_spill] sm:$0xff] }
 0x27d   : > { %v3478_v55 = vmax.f32 %v6882_v3, %v7027_v61  ;;  %v3479_v63 = vmax.f32 %v6907_v22, %v7068_v41  ;;  %v3480_v8 = vmax.f32 %v6966_v21, %v7234_v14  ;;  %v3487_v34 = vmax.f32 %v6253_v18, %v7023_v27  ;;  %v8303_v23 = vld [vmem:[#allocation46_spill] sm:$0xff]  ;;  %v8304_v61 = vld [vmem:[#allocation31_spill] sm:$0xff]  ;;  %v8310_v27 = vld [vmem:[#allocation49_spill] sm:$0xff] }
 0x27e   : > { %v3488_v5 = vmax.f32 %v8298_v13, %v6938_v44  ;;  %v3489_v12 = vmax.f32 %v8300_v9, %v8299_v42  ;;  %v3490_v2 = vmax.f32 %v8302_v7, %v8301_v4  ;;  %v3491_v39 = vmax.f32 %v8304_v61, %v8303_v23  ;;  %v8306_v41 = vld [vmem:[#allocation38_spill] sm:$0xff]  ;;  %v8308_v14 = vld [vmem:[#allocation39_spill] sm:$0xff]  ;;  %v8312_v44 = vld [vmem:[#allocation48_spill] sm:$0xff] }
 0x27f   : > { %v3492_v22 = vmax.f32 %v8306_v41, %v8305_v37  ;;  %v3493_v31 = vmax.f32 %v8308_v14, %v8307_v32  ;;  %v3494_v18 = vmax.f32 %v8310_v27, %v8309_v47  ;;  %v3495_v45 = vmax.f32 %v8312_v44, %v8311_v57  ;;  %v8313_v42 = vld [vmem:[#allocation52_spill] sm:$0xff]  ;;  %v8314_v24 = vld [vmem:[#allocation7_spill] sm:$0xff]  ;;  %v1952_v14 = vpop.f32.mrf.mxu2  ;;  %v8331_v44 = vld [vmem:[#allocation57_spill] sm:$0xff] }
 0x280   : > { %v3496_v9 = vmax.f32 %v8313_v42, %v7205_v30  ;;  %v8315_v4 = vld [vmem:[#allocation60_spill] sm:$0xff]  ;;  %v3498_v23 = vmax.f32 %v8316_v43, %v3410_v52  ;;  %v7366_v37 = vsel %vm3440_vm7, %v3472_v56, %v6336_v53  ;;  %v7371_v32 = vsel %vm3442_vm8, %v3474_v17, %v6631_v11 }
 0x281   : > { %v3497_v19 = vmax.f32 %v8315_v4, %v8314_v24  ;;  %v7376_v57 = vsel %vm3444_vm9, %v3476_v1, %v8243_v26  ;;  %v7381_v30 = vsel %vm3446_vm11, %v3478_v55, %v6882_v3  ;;  %v7386_v53 = vsel %vm3448_vm13, %v3480_v8, %v6966_v21  ;;  %v8326_v1 = vld [vmem:[#allocation33_spill] sm:$0xff]  ;;  %v8327_v55 = vld [vmem:[#allocation63_spill] sm:$0xff] }
 0x282   : > { %v7391_v11 = vsel %vm3456_vm14, %v3488_v5, %v8298_v13  ;;  %v7396_v26 = vsel %vm3458_vm0, %v3490_v2, %v8302_v7  ;;  %v7401_v0 = vsel %vm3460_vm1, %v3492_v22, %v8306_v41  ;;  %v7406_v38 = vsel %vm3462_vm2, %v3494_v18, %v8310_v27  ;;  %v8329_v8 = vld [vmem:[#allocation41_spill] sm:$0xff]  ;;  %v2122_v7 = vpop.f32.mrf.mxu1  ;;  %v2164_v27 = vpop.f32.mrf.mxu3 }
 0x283   : > { %v7411_v3 = vsel %vm3464_vm3, %v3496_v9, %v8313_v42  ;;  %v7416_v21 = vsel %vm3466_vm4, %v3498_v23, %v8316_v43  ;;  %v3567_v24 = vmax.f32 %v3471_v28, %v7366_v37  ;;  %v3569_v46 = vmax.f32 %v3473_v10, %v7371_v32  ;;  %v8333_v9 = vld [vmem:[#allocation2_spill] sm:$0xff] }
 0x284   : > { %8317 = vst [vmem:[#allocation21_spill] sm:$0xff] %v7411_v3  ;;  %v3571_v49 = vmax.f32 %v3475_v25, %v7376_v57  ;;  %v3573_v33 = vmax.f32 %v3477_v15, %v7381_v30  ;;  %v3575_v18 = vmax.f32 %v3479_v63, %v7386_v53  ;;  %v3583_v20 = vmax.f32 %v3487_v34, %v7391_v11 }
 0x285   : > { %8318 = vst [vmem:[#allocation14_spill] sm:$0xff] %v7416_v21  ;;  %v3585_v60 = vmax.f32 %v3489_v12, %v7396_v26  ;;  %v3587_v47 = vmax.f32 %v3491_v39, %v7401_v0  ;;  %v3589_v29 = vmax.f32 %v3493_v31, %v7406_v38  ;;  %v3591_v43 = vmax.f32 %v3495_v45, %v7411_v3  ;;  %v8319_v31 = vld [vmem:[#allocation72_spill] sm:$0xff] }
 0x286   : > { %v3593_v40 = vmax.f32 %v3497_v19, %v7416_v21  ;;  %v7429_v62 = vadd.f32 %v3567_v24, %v2620_v58  ;;  %v7431_v36 = vadd.f32 %v3569_v46, %v2622_v59  ;;  %v7433_v52 = vadd.f32 %v3571_v49, %v2624_v35  ;;  %v8321_v59 = vld [vmem:[#allocation71_spill] sm:$0xff] }
 0x287   : > { %v7435_v28 = vadd.f32 %v3573_v33, %v2626_v51  ;;  %v7437_v56 = vadd.f32 %v3575_v18, %v2628_v16  ;;  %v7440_v12 = vadd.f32 %v3583_v20, %v7250_v48  ;;  %v7443_v39 = vadd.f32 %v3585_v60, %v7218_v6  ;;  %v8323_v6 = vld [vmem:[#allocation70_spill] sm:$0xff]  ;;  %v8334_v20 = vld [vmem:[#allocation61_spill] sm:$0xff] }
 0x288   : > { %v8084_v45 = vrot.slane %v8319_v31, 2  ;;  %v7447_v19 = vadd.f32 %v3587_v47, %v7222_v50  ;;  %v7450_v58 = vadd.f32 %v3589_v29, %v7226_v54  ;;  %v7453_v35 = vadd.f32 %v3591_v43, %v8321_v59  ;;  %v8325_v54 = vld [vmem:[#allocation40_spill] sm:$0xff]  ;;  %v8335_v29 = vld [vmem:[#allocation66_spill] sm:$0xff] }
 0x289   : > { %v8083_v51 = vrot.slane %v7429_v62, 7  ;;  %v8082_v48 = vrot.slane %v7431_v36, 7  ;;  %v8081_v16 = vrot.slane %v7433_v52, 7  ;;  %v7459_v10 = vadd.f32 %v3593_v40, %v8323_v6 }
 0x28a   : > { %8320 = vst [vmem:[#allocation17_spill] sm:$0xff] %v7450_v58  ;;  %v8080_v17 = vrot.slane %v7435_v28, 7  ;;  %v8079_v50 = vrot.slane %v7437_v56, 7  ;;  %v8073_v25 = vrot.slane %v7440_v12, 7  ;;  %v7466_v15 = vmax.f32 %v8326_v1, %v8325_v54  ;;  %v8336_v1 = vld [vmem:[#allocation34_spill] sm:$0xff] }
 0x28b   : > { %8322 = vst [vmem:[#allocation28_spill] sm:$0xff] %v7453_v35  ;;  %v8328_v63 = vmax.f32 %v8327_v55, 0.0  ;;  %v8330_v34 = vmax.f32 %v8329_v8, 0.0  ;;  %vm3696_vm5 = vcmask 1040384   ;;  %v8072_v5 = vrot.slane %v7443_v39, 7 }
 0x28c   : > { %8324 = vst [vmem:[#allocation5_spill] sm:$0xff] %v7459_v10  ;;  %v8074_v2 = vrot.slane %v7447_v19, 7  ;;  %v3798_v61 = vsel %vm3696_vm5, 0.0, %v8083_v51  ;;  %v3799_v41 = vsel %vm3696_vm5, 0.0, %v8082_v48  ;;  %v3800_v22 = vsel %vm3696_vm5, 0.0, %v8081_v16  ;;  %v8360_v51 = vld [vmem:[#allocation8_spill] sm:$0xff] }
 0x28d   : > { %v7472_v13 = vmax.f32 %v8330_v34, %v8328_v63  ;;  %v8332_v42 = vrot.slane %v8331_v44, 2  ;;  %v8078_v23 = vrot.slane %v7450_v58, 7  ;;  %v8076_v24 = vrot.slane %v7453_v35, 7  ;;  %3834 = vst [vmem:[%s7480_s10 + $0x18] sm:$0xff] %v3798_v61 }
 0x28e   : > { %v3801_v46 = vsel %vm3696_vm5, 0.0, %v8080_v17  ;;  %v8075_v49 = vrot.slane %v7459_v10, 7  ;;  %v3802_v33 = vsel %vm3696_vm5, 0.0, %v8079_v50  ;;  %v3806_v18 = vsel %vm3696_vm5, 0.0, %v8073_v25  ;;  %3837 = vst [vmem:[%s7480_s10 + $0x30] sm:$0xff] %v3799_v41  ;;  %v8362_v10 = vld [vmem:[#allocation29_spill] sm:$0xff] }
 0x28f   : > { %v3265_v4 = vsel %vm3245_vm12, %v8332_v42, %v8084_v45  ;;  %v2183_v60 = vmul.f32 %v8334_v20, %v2122_v7  ;;  %3840 = vst [vmem:[%s7480_s10 + $0x48] sm:$0xff] %v3800_v22  ;;  %v2281_v47 = vadd.s32 104, %v8333_v9  ;;  %v1988_v43 = vmul.f32 %v8335_v29, %v1952_v14  ;;  %v8337_v7 = vld [vmem:[#allocation64_spill] sm:$0xff]  ;;  %v8340_v22 = vld [vmem:[#allocation67_spill] sm:$0xff] }
 0x290   : > { %v2200_v40 = vmul.f32 %v8334_v20, %v2164_v27  ;;  %v2299_v59 = vadd.s32 248, %v8333_v9  ;;  %v3807_v8 = vsel %vm3696_vm5, 0.0, %v8072_v5  ;;  %v3808_v34 = vsel %vm3696_vm5, 0.0, %v8074_v2  ;;  %3843 = vst [vmem:[%s7480_s10 + $0x60] sm:$0xff] %v3801_v46  ;;  %v1912_v5 = vpop.f32.mrf.mxu0 }
 0x291   : > { %v7528_v61 = vadd.f32 %v8337_v7, %v2183_v60  ;;  %3846 = vst [vmem:[%s7480_s10 + $0x78] sm:$0xff] %v3802_v33  ;;  %v7531_v41 = vand.u32 15, %v2281_v47  ;;  %v2022_v14 = vadd.f32 %v8340_v22, %v1988_v43  ;;  %v3321_v25 = vmax.f32 %v8331_v44, %v3265_v4  ;;  %v8341_v47 = vld [vmem:[#allocation73_spill] sm:$0xff]  ;;  %v8342_v43 = vld [vmem:[#allocation32_spill] sm:$0xff] }
 0x292   : > { %v2234_v27 = vadd.f32 %v8337_v7, %v2200_v40  ;;  %v7535_v42 = vand.u32 15, %v2299_v59  ;;  %v3809_v46 = vsel %vm3696_vm5, 0.0, %v8078_v23  ;;  %3858 = vst [vmem:[%s7480_s10 + $0xd8] sm:$0xff] %v3806_v18  ;;  %v1972_v60 = vmul.f32 %v8335_v29, %v1912_v5  ;;  %v8346_v29 = vld [vmem:[#allocation51_spill] sm:$0xff] }
 0x293   : > { %8338 = vst [vmem:[#allocation16_spill] sm:$0xff] %v7528_v61  ;;  %v8077_v33 = vmax.f32 %v7528_v61, 0.0  ;;  %v8343_v2 = vmax.f32 %v8341_v47, %v8342_v43  ;;  %v3810_v4 = vsel %vm3696_vm5, 0.0, %v8076_v24  ;;  %v3811_v59 = vsel %vm3696_vm5, 0.0, %v8075_v49  ;;  %v8347_v47 = vld [vmem:[#allocation59_spill] sm:$0xff] }
 0x294   : > { %8339 = vst [vmem:[#allocation25_spill] sm:$0xff] %v7531_v41  ;;  %v7557_v18 = vmax.f32 %v2022_v14, 0.0  ;;  %vm3130_vm6 = vcmp.lt.s32.totalorder %v7531_v41, 15  ;;  %vm3307_vm8 = vcmp.lt.s32.totalorder %v8346_v29, 14  ;;  %v8348_v43 = vmax.f32 %v8347_v47, 0.0  ;;  %v8353_v23 = vld [vmem:[#allocation11_spill] sm:$0xff] }
 0x295   : > { %v7548_v40 = vmax.f32 %v8343_v2, %v8323_v6  ;;  %3861 = vst [vmem:[%s7480_s10 + $0xf0] sm:$0xff] %v3807_v8  ;;  %v7562_v5 = vrot.slane %v8077_v33, 1  ;;  %v2266_v6 = vmax.f32 %v2234_v27, 0.0  ;;  %v8345_v2 = vld [vmem:[#allocation42_spill] sm:$0xff]  ;;  %vm3148_vm9 = vcmp.lt.s32.totalorder %v7535_v42, 15  ;;  %v8369_v61 = vld [vmem:[#allocation15_spill] sm:$0xff] }
 0x296   : > { %3864 = vst [vmem:[%s7480_s10 + $0x108] sm:$0xff] %v3808_v34  ;;  %vm3289_vm7 = vcmp.lt.s32.totalorder %v8345_v2, 14  ;;  %v7571_v8 = vmax.f32 %v8348_v43, %v7557_v18  ;;  %v2006_v34 = vadd.f32 %v8340_v22, %v1972_v60  ;;  %v7577_v14 = vmax.f32 %v8325_v54, %v7557_v18  ;;  %v8349_v27 = vld [vmem:[#allocation58_spill] sm:$0xff]  ;;  %v8351_v54 = vld [vmem:[#allocation43_spill] sm:$0xff] }
 0x297   : > { %8344 = vst [vmem:[#allocation20_spill] sm:$0xff] %v7562_v5  ;;  %v8350_v49 = vrot.slane %v8349_v27, 1  ;;  %v3083_v24 = vrot.slane %v2266_v6, 1  ;;  %vm3309_vm11 = vcmp.lt.s32.totalorder %v7535_v42, 14  ;;  %v7588_v47 = vmax.f32 %v7466_v15, %v7557_v18 }
 0x298   : > { %3867 = vst [vmem:[%s7480_s10 + $0x120] sm:$0xff] %v3809_v46  ;;  %v2038_v60 = vmax.f32 %v2006_v34, 0.0  ;;  %v7599_v43 = vsel %vm3289_vm7, %v3321_v25, %v8331_v44  ;;  %v8357_v44 = vld [vmem:[#allocation65_spill] sm:$0xff]  ;;  %v8359_v48 = vmov %v8328_v63  ;;  %v8361_v63 = vmax.f32 %v8360_v51, 0.0 }
 0x299   : > { %3870 = vst [vmem:[%s7480_s10 + $0x138] sm:$0xff] %v3810_v4  ;;  %v3102_v46 = vsel %vm3084_vm10, %v8350_v49, %v7562_v5  ;;  %v7594_v4 = vmax.f32 %v8351_v54, %v7571_v8  ;;  %v8352_v49 = vld [vmem:[#allocation69_spill] sm:$0xff]  ;;  %v8355_v54 = vld [vmem:[#allocation44_spill] sm:$0xff]  ;;  %v8358_v17 = vmax.f32 %v8357_v44, 0.0  ;;  %v3385_v41 = vrot.slane %v7599_v43, 4  ;;  %v8366_v44 = vld [vmem:[#allocation22_spill] sm:$0xff] }
 0x29a   : > { %3873 = vst [vmem:[%s7480_s10 + $0x150] sm:$0xff] %v3811_v59  ;;  %v3162_v22 = vmax.f32 %v8349_v27, %v3102_v46  ;;  %v3085_v33 = vsel %vm3084_vm10, %v8352_v49, %v3083_v24  ;;  %v3116_v59 = vsel %vm3084_vm10, %v3083_v24, %v8353_v23  ;;  %v8354_v46 = vld [vmem:[#allocation36_spill] sm:$0xff]  ;;  %v7613_v50 = vmax.f32 %v8355_v54, %v7571_v8  ;;  %v8370_v5 = vld [vmem:[#allocation30_spill] sm:$0xff] }
 0x29b   : > { %v7609_v34 = vmax.f32 %v8354_v46, %v7577_v14  ;;  %v3179_v49 = vmax.f32 %v8358_v17, %v3085_v33  ;;  %v3180_v16 = vmax.f32 %v2266_v6, %v3116_v59  ;;  %v2345_v23 = vmax.f32 %v8359_v48, %v2038_v60  ;;  %v8364_v48 = vld [vmem:[#allocation13_spill] sm:$0xff] }
 0x29c   : > { %v7618_v25 = vsel %vm3130_vm6, %v3162_v22, %v8349_v27  ;;  %v2347_v45 = vmax.f32 %v2038_v60, %v8361_v63  ;;  %v7629_v35 = vmax.f32 %v8362_v10, %v7594_v4  ;;  %vm3468_vm13 = vcmp.lt.s32.totalorder %v8346_v29, 12  ;;  %v8363_v27 = vld [vmem:[#allocation45_spill] sm:$0xff] }
 0x29d   : > { %8356 = vst [vmem:[#allocation50_spill] sm:$0xff] %v7618_v25  ;;  %v8094_v24 = vrot.slane %v7618_v25, 2  ;;  %v3212_v17 = vsel %vm3148_vm9, %v3180_v16, %v2266_v6  ;;  %v3243_v33 = vrot.slane %v3179_v49, 2  ;;  %v2437_v55 = vmax.f32 %v8363_v27, %v2345_v23 }
 0x29e   : > { %v7637_v22 = vmax.f32 %v2345_v23, %v8364_v48  ;;  %v8365_v51 = vrot.slane %v8319_v31, 2  ;;  %v3244_v60 = vrot.slane %v3212_v17, 2  ;;  %vm3470_vm14 = vcmp.lt.s32.totalorder %v7535_v42, 12  ;;  %v8367_v23 = vld [vmem:[#allocation10_spill] sm:$0xff] }
 0x29f   : > { %v2439_v59 = vmax.f32 %v7472_v13, %v2347_v45  ;;  %v7648_v16 = vmax.f32 %v2347_v45, %v8366_v44  ;;  %v8368_v48 = vrot.slane %v8367_v23, 2  ;;  %v8371_v21 = vmax.f32 %v8369_v61, %v8370_v5  ;;  %v8373_v44 = vld [vmem:[#allocation4_spill] sm:$0xff] }
 0x2a0   : > { %v3264_v63 = vsel %vm3245_vm12, %v8365_v51, %v8094_v24  ;;  %v8372_v24 = vmax.f32 %v8370_v5, %v8363_v27  ;;  %v3246_v45 = vsel %vm3245_vm12, %v3243_v33, %v3244_v60  ;;  %v8377_v5 = vmax.f32 %v8336_v1, %v7472_v13 }
 0x2a1   : > { %v7651_v6 = vmax.f32 %v8319_v31, %v3264_v63  ;;  %v3247_v25 = vsel %vm3245_vm12, %v8368_v48, %v3243_v33  ;;  %v2525_v51 = vmax.f32 %v8371_v21, %v2437_v55  ;;  %v8374_v31 = vrot.slane %v8373_v44, 2  ;;  %v8375_v48 = vld [vmem:[#allocation24_spill] sm:$0xff] }
 0x2a2   : > { %v2529_v3 = vmax.f32 %v8372_v24, %v7637_v22  ;;  %v3339_v7 = vmax.f32 %v8367_v23, %v3247_v25  ;;  %v8376_v20 = vmax.f32 %v8375_v48, %v8336_v1  ;;  %v3340_v21 = vmax.f32 %v3179_v49, %v3246_v45  ;;  %v8382_v48 = vld [vmem:[#allocation19_spill] sm:$0xff] }
 0x2a3   : > { %v3277_v63 = vsel %vm3245_vm12, %v3244_v60, %v8374_v31  ;;  %v2531_v24 = vmax.f32 %v8377_v5, %v7648_v16  ;;  %v2533_v33 = vmax.f32 %v2437_v55, %v8362_v10  ;;  %v2535_v60 = vmax.f32 %v2439_v59, %v8354_v46 }
 0x2a4   : > { %v2527_v61 = vmax.f32 %v8376_v20, %v2439_v59  ;;  %v3341_v58 = vmax.f32 %v3212_v17, %v3277_v63  ;;  %v3371_v27 = vsel %vm3307_vm8, %v3339_v7, %v8367_v23  ;;  %v3404_v13 = vrot.slane %v3340_v21, 4  ;;  %v8378_v23 = vld [vmem:[#allocation18_spill] sm:$0xff] }
 0x2a5   : > { %v3403_v45 = vrot.slane %v3371_v27, 4  ;;  %v2621_v1 = vmax.f32 %v2525_v51, %v7629_v35  ;;  %v2625_v7 = vmax.f32 %v2529_v3, %v7613_v50  ;;  %v2627_v46 = vmax.f32 %v2531_v24, %v7588_v47 }
 0x2a6   : > { %v3373_v49 = vsel %vm3309_vm11, %v3341_v58, %v3212_v17  ;;  %v2623_v55 = vmax.f32 %v2527_v61, %v7609_v34  ;;  %v8379_v44 = vrot.slane %v8378_v23, 4  ;;  %v2629_v58 = vmax.f32 %v2533_v33, %v7594_v4  ;;  %v8380_v17 = vld [vmem:[#allocation62_spill] sm:$0xff] }
 0x2a7   : > { %v3405_v10 = vrot.slane %v3373_v49, 4  ;;  %v3408_v59 = vsel %vm3406_vm15, %v3403_v45, %v3404_v13  ;;  %v8381_v63 = vrot.slane %v8380_v17, 4  ;;  %v8383_v61 = vrot.slane %v8382_v48, 4 }
 0x2a8   : > { %v3409_v31 = vsel %vm3406_vm15, %v8379_v44, %v3403_v45  ;;  %v3500_v20 = vmax.f32 %v3371_v27, %v3408_v59  ;;  %v2631_v33 = vmax.f32 %v2535_v60, %v7577_v14  ;;  %vm3450_vm0 = vcmp.lt.s32.totalorder %v8345_v2, 12 }
 0x2a9   : > { %v3427_v51 = vsel %vm3406_vm15, %v8381_v63, %v3385_v41  ;;  %v3407_v3 = vsel %vm3406_vm15, %v3404_v13, %v3405_v10  ;;  %v3438_v5 = vsel %vm3406_vm15, %v3405_v10, %v8383_v61  ;;  %v3499_v24 = vmax.f32 %v8378_v23, %v3409_v31 }
 0x2aa   : > { %v3501_v25 = vmax.f32 %v3340_v21, %v3407_v3  ;;  %v3502_v45 = vmax.f32 %v3373_v49, %v3438_v5  ;;  %v3532_v44 = vsel %vm3468_vm13, %v3500_v20, %v3371_v27  ;;  %v3386_v63 = vrot.slane %v7651_v6, 4 }
 0x2ab   : > { %v3481_v13 = vmax.f32 %v8380_v17, %v3427_v51  ;;  %v3632_v48 = vadd.f32 %v7366_v37, %v2621_v1  ;;  %v3595_v23 = vmax.f32 %v3499_v24, %v3532_v44  ;;  %v3660_v21 = vadd.f32 %v3532_v44, %v7571_v8  ;;  %v8384_v37 = vld [vmem:[#allocation68_spill] sm:$0xff]  ;;  %v8385_v17 = vld [vmem:[#allocation37_spill] sm:$0xff] }
 0x2ac   : > { %v3534_v10 = vsel %vm3470_vm14, %v3502_v45, %v3373_v49  ;;  %v3634_v59 = vadd.f32 %v7371_v32, %v2623_v55  ;;  %v3426_v29 = vsel %vm3406_vm15, %v3385_v41, %v3386_v63  ;;  %v3636_v27 = vadd.f32 %v7376_v57, %v2625_v7 }
 0x2ad   : > { %v3597_v60 = vmax.f32 %v3501_v25, %v3534_v10  ;;  %v3662_v31 = vadd.f32 %v3534_v10, %v7557_v18  ;;  %v3659_v20 = vadd.f32 %v3595_v23, %v8384_v37  ;;  %v3742_v42 = vrot.slane %v3660_v21, 7 }
 0x2ae   : > { %v3482_v49 = vmax.f32 %v7599_v43, %v3426_v29  ;;  %v3638_v1 = vadd.f32 %v7381_v30, %v2627_v46  ;;  %v3640_v55 = vadd.f32 %v7386_v53, %v2629_v58  ;;  %v7735_v51 = vadd.f32 %v7391_v11, %v7629_v35 }
 0x2af   : > { %v3661_v32 = vadd.f32 %v3597_v60, %v8385_v17  ;;  %v3745_v25 = vrot.slane %v3662_v31, 7  ;;  %v3741_v41 = vrot.slane %v3659_v20, 7  ;;  %v3829_v57 = vsel %vm3696_vm5, %v3742_v42, 0.0 }
 0x2b0   : > { %v3514_v7 = vsel %vm3450_vm0, %v3482_v49, %v7599_v43  ;;  %v7743_v30 = vadd.f32 %v7396_v26, %v7609_v34  ;;  %3878 = vst [vmem:[%s7480_s10 + $0x178] sm:$0x3] %v3829_v57  ;;  %v7752_v2 = vadd.f32 %v7401_v0, %v7613_v50  ;;  %v7761_v61 = vadd.f32 %v7406_v38, %v7588_v47  ;;  %v8394_v49 = vld [vmem:[#allocation17_spill] sm:$0xff] }
 0x2b1   : > { %v3744_v46 = vrot.slane %v3661_v32, 7  ;;  %v3830_v53 = vsel %vm3696_vm5, %v3745_v25, 0.0  ;;  %v3577_v11 = vmax.f32 %v3481_v13, %v3514_v7  ;;  %v3642_v35 = vadd.f32 %v3514_v7, %v2631_v33 }
 0x2b2   : > { %v3743_v58 = vsel %vm3696_vm5, %v3741_v41, %v3742_v42  ;;  %v3812_v3 = vsel %vm3696_vm5, 0.0, %v3741_v41  ;;  %3881 = vst [vmem:[%s7480_s10 + $0x190] sm:$0x3] %v3830_v53  ;;  %v3700_v5 = vrot.slane %v3632_v48, 7  ;;  %v3703_v24 = vrot.slane %v3634_v59, 7 }
 0x2b3   : > { %v3746_v26 = vsel %vm3696_vm5, %v3744_v46, %v3745_v25  ;;  %v3813_v43 = vsel %vm3696_vm5, 0.0, %v3744_v46  ;;  %3876 = vst [vmem:[%s7480_s10 + $0x168] sm:$0xff] %v3812_v3  ;;  %v3641_v34 = vadd.f32 %v3577_v11, %v7548_v40  ;;  %v3706_v45 = vrot.slane %v3636_v27, 7  ;;  %v8398_v11 = vld [vmem:[#allocation21_spill] sm:$0xff] }
 0x2b4   : > { %3877 = vst [vmem:[%s7480_s10 + $0x170] sm:$0xff] %v3743_v58  ;;  %v3709_v33 = vrot.slane %v3638_v1, 7  ;;  %v3712_v0 = vrot.slane %v3640_v55, 7  ;;  %v3715_v44 = vrot.slane %v3642_v35, 7  ;;  %v8386_v13 = vrot.slane %v7429_v62, 7 }
 0x2b5   : > { %3879 = vst [vmem:[%s7480_s10 + $0x180] sm:$0xff] %v3813_v43  ;;  %v3714_v50 = vrot.slane %v3641_v34, 7  ;;  %v8387_v10 = vrot.slane %v7431_v36, 7  ;;  %v8388_v47 = vrot.slane %v7433_v52, 7  ;;  %v3724_v23 = vrot.slane %v7735_v51, 7  ;;  %v8396_v51 = vld [vmem:[#allocation61_spill] sm:$0xff] }
 0x2b6   : > { %3880 = vst [vmem:[%s7480_s10 + $0x188] sm:$0xff] %v3746_v26  ;;  %v3701_v40 = vsel %vm3696_vm5, %v8386_v13, %v3700_v5  ;;  %v8389_v21 = vrot.slane %v7435_v28, 7  ;;  %v8390_v62 = vrot.slane %v7437_v56, 7  ;;  %v3727_v36 = vrot.slane %v7743_v30, 7  ;;  %v8397_v30 = vld [vmem:[#allocation64_spill] sm:$0xff]  ;;  %v8399_v43 = vld [vmem:[#allocation14_spill] sm:$0xff] }
 0x2b7   : > { %v3704_v38 = vsel %vm3696_vm5, %v8387_v10, %v3703_v24  ;;  %v3707_v48 = vsel %vm3696_vm5, %v8388_v47, %v3706_v45  ;;  %v3716_v31 = vsel %vm3696_vm5, %v3714_v50, %v3715_v44  ;;  %3835 = vst [vmem:[%s7480_s10 + $0x20] sm:$0xff] %v3701_v40  ;;  %v8391_v52 = vrot.slane %v7440_v12, 7 }
 0x2b8   : > { %v3710_v59 = vsel %vm3696_vm5, %v8389_v21, %v3709_v33  ;;  %v3713_v60 = vsel %vm3696_vm5, %v8390_v62, %v3712_v0  ;;  %v3730_v28 = vrot.slane %v7752_v2, 7  ;;  %v3733_v27 = vrot.slane %v7761_v61, 7  ;;  %3838 = vst [vmem:[%s7480_s10 + $0x38] sm:$0xff] %v3704_v38 }
 0x2b9   : > { %v3725_v29 = vsel %vm3696_vm5, %v8391_v52, %v3724_v23  ;;  %v8392_v56 = vrot.slane %v7443_v39, 7  ;;  %v3815_v20 = vsel %vm3696_vm5, %v3700_v5, 0.0  ;;  %3841 = vst [vmem:[%s7480_s10 + $0x50] sm:$0xff] %v3707_v48  ;;  %v8393_v42 = vrot.slane %v7447_v19, 7  ;;  %v2124_v39 = vpop.f32.mrf.mxu1  ;;  %v8404_v48 = vld [vmem:[#allocation28_spill] sm:$0xff] }
 0x2ba   : > { %v8395_v1 = vrot.slane %v8394_v49, 7  ;;  %v3816_v32 = vsel %vm3696_vm5, %v3703_v24, 0.0  ;;  %3836 = vst [vmem:[%s7480_s10 + $0x28] sm:$0x3] %v3815_v20  ;;  %v3817_v25 = vsel %vm3696_vm5, %v3706_v45, 0.0  ;;  %v3818_v55 = vsel %vm3696_vm5, %v3709_v33, 0.0 }
 0x2bb   : > { %v3728_v37 = vsel %vm3696_vm5, %v8392_v56, %v3727_v36  ;;  %v3731_v12 = vsel %vm3696_vm5, %v8393_v42, %v3730_v28  ;;  %3839 = vst [vmem:[%s7480_s10 + $0x40] sm:$0x3] %v3816_v32  ;;  %v3819_v19 = vsel %vm3696_vm5, %v3712_v0, 0.0  ;;  %v2184_v41 = vmul.f32 %v8396_v51, %v2124_v39  ;;  %v8401_v45 = vld [vmem:[#allocation20_spill] sm:$0xff]  ;;  %v8411_v20 = vld [vmem:[#allocation9_spill] sm:$0xff] }
 0x2bc   : > { %v3734_v17 = vsel %vm3696_vm5, %v8395_v1, %v3733_v27  ;;  %3842 = vst [vmem:[%s7480_s10 + $0x58] sm:$0x3] %v3817_v25  ;;  %v3803_v57 = vsel %vm3696_vm5, 0.0, %v3714_v50  ;;  %v2283_v7 = vadd.s32 120, %v8333_v9  ;;  %v3820_v53 = vsel %vm3696_vm5, %v3715_v44, 0.0 }
 0x2bd   : > { %3844 = vst [vmem:[%s7480_s10 + $0x68] sm:$0xff] %v3710_v59  ;;  %v2218_v46 = vadd.f32 %v8397_v30, %v2184_v41  ;;  %v3656_v35 = vadd.f32 %v8398_v11, %v7594_v4  ;;  %v3823_v2 = vsel %vm3696_vm5, %v3724_v23, 0.0  ;;  %v3658_v34 = vadd.f32 %v8399_v43, %v7577_v14  ;;  %v8400_v4 = vld [vmem:[#allocation3_spill] sm:$0xff]  ;;  %v8402_v14 = vld [vmem:[#allocation16_spill] sm:$0xff] }
 0x2be   : > { %3845 = vst [vmem:[%s7480_s10 + $0x70] sm:$0x3] %v3818_v55  ;;  %v7820_v3 = vand.u32 15, %v2283_v7  ;;  %v3824_v61 = vsel %vm3696_vm5, %v3727_v36, 0.0  ;;  %v3825_v0 = vsel %vm3696_vm5, %v3730_v28, 0.0  ;;  %v8403_v50 = vmax.f32 %v8402_v14, 0.0 }
 0x2bf   : > { %3847 = vst [vmem:[%s7480_s10 + $0x80] sm:$0xff] %v3713_v60  ;;  %v2250_v58 = vmax.f32 %v2218_v46, 0.0  ;;  %v3736_v5 = vrot.slane %v3656_v35, 7  ;;  %v3739_v40 = vrot.slane %v3658_v34, 7  ;;  %v3826_v10 = vsel %vm3696_vm5, %v3733_v27, 0.0  ;;  %v8407_v36 = vld [vmem:[#allocation5_spill] sm:$0xff] }
 0x2c0   : > { %3848 = vst [vmem:[%s7480_s10 + $0x88] sm:$0x3] %v3819_v19  ;;  %vm3132_vm1 = vcmp.lt.s32.totalorder %v7820_v3, 15  ;;  %v8405_v23 = vrot.slane %v8404_v48, 7  ;;  %v4881_v62 = vmov 0.0   ;;  %v8408_v52 = vrot.slane %v8407_v36, 7 }
 0x2c1   : > { %3849 = vst [vmem:[%s7480_s10 + $0x90] sm:$0xff] %v3803_v57  ;;  %v3067_v26 = vrot.slane %v2250_v58, 1  ;;  %v3697_v60 = vrot.slane %v4881_v62, 7  ;;  %v3827_v28 = vsel %vm3696_vm5, %v3736_v5, 0.0  ;;  %v8409_v27 = vld [vmem:[#allocation50_spill] sm:$0xff]  ;;  %v8412_v42 = vrot.slane %v8411_v20, 2 }
 0x2c2   : > { %3850 = vst [vmem:[%s7480_s10 + $0x98] sm:$0xff] %v3716_v31  ;;  %v3737_v21 = vsel %vm3696_vm5, %v8405_v23, %v3736_v5  ;;  %v8406_v31 = vld [vmem:[#allocation25_spill] sm:$0xff]  ;;  %v8410_v56 = vrot.slane %v8409_v27, 2  ;;  %vm3293_vm2 = vcmp.lt.s32.totalorder %v7820_v3, 14  ;;  %vm3454_vm3 = vcmp.lt.s32.totalorder %v7820_v3, 12 }
 0x2c3   : > { %3851 = vst [vmem:[%s7480_s10 + $0xa0] sm:$0x3] %v3820_v53  ;;  %v3100_v24 = vsel %vm3084_vm10, %v3067_v26, %v8400_v4  ;;  %v3101_v33 = vsel %vm3084_vm10, %v8401_v45, %v3067_v26  ;;  %vm3291_vm10 = vcmp.lt.s32.totalorder %v8406_v31, 14  ;;  %v3797_v55 = vsel %vm3696_vm5, 0.0, %v3697_v60  ;;  %v8413_v53 = vld [vmem:[#allocation12_spill] sm:$0xff] }
 0x2c4   : > { %3859 = vst [vmem:[%s7480_s10 + $0xe0] sm:$0xff] %v3725_v29  ;;  %v3163_v44 = vmax.f32 %v8403_v50, %v3101_v33  ;;  %v3164_v13 = vmax.f32 %v2250_v58, %v3100_v24  ;;  %v3740_v29 = vsel %vm3696_vm5, %v8408_v52, %v3739_v40  ;;  %v3814_v7 = vsel %vm3696_vm5, %v3697_v60, 0.0 }
 0x2c5   : > { %3860 = vst [vmem:[%s7480_s10 + $0xe8] sm:$0x3] %v3823_v2  ;;  %v8414_v11 = vrot.slane %v8413_v53, 4 }
 0x2c6   : > { %3862 = vst [vmem:[%s7480_s10 + $0xf8] sm:$0xff] %v3728_v37  ;;  %v3196_v38 = vsel %vm3132_vm1, %v3164_v13, %v2250_v58  ;;  %v3227_v47 = vrot.slane %v3163_v44, 2 }
 0x2c7   : > { %3863 = vst [vmem:[%s7480_s10 + $0x100] sm:$0x3] %v3824_v61  ;;  %v3228_v59 = vrot.slane %v3196_v38, 2  ;;  %v8416_v61 = vmax.f32 %v7648_v16, %v7466_v15 }
 0x2c8   : > { %3865 = vst [vmem:[%s7480_s10 + $0x110] sm:$0xff] %v3731_v12  ;;  %v3263_v37 = vsel %vm3245_vm12, %v8410_v56, %v3227_v47 }
 0x2c9   : > { %3866 = vst [vmem:[%s7480_s10 + $0x118] sm:$0x3] %v3825_v0  ;;  %v3261_v12 = vsel %vm3245_vm12, %v3228_v59, %v8412_v42  ;;  %v3262_v49 = vsel %vm3245_vm12, %v3227_v47, %v3228_v59  ;;  %v3323_v1 = vmax.f32 %v8409_v27, %v3263_v37  ;;  %vm3452_vm12 = vcmp.lt.s32.totalorder %v8406_v31, 12  ;;  %v8418_v0 = vld [vmem:[#allocation6_spill] sm:$0xff] }
 0x2ca   : > { %3868 = vst [vmem:[%s7480_s10 + $0x128] sm:$0xff] %v3734_v17  ;;  %v3828_v17 = vsel %vm3696_vm5, %v3739_v40, 0.0  ;;  %v3324_v32 = vmax.f32 %v3163_v44, %v3262_v49  ;;  %v3325_v39 = vmax.f32 %v3196_v38, %v3261_v12  ;;  %v2635_v5 = vmax.f32 %v8416_v61, %v7557_v18 }
 0x2cb   : > { %3869 = vst [vmem:[%s7480_s10 + $0x130] sm:$0x3] %v3826_v10  ;;  %v3355_v25 = vsel %vm3291_vm10, %v3323_v1, %v8409_v27 }
 0x2cc   : > { %3871 = vst [vmem:[%s7480_s10 + $0x140] sm:$0xff] %v3737_v21  ;;  %v3357_v19 = vsel %vm3293_vm2, %v3325_v39, %v3196_v38  ;;  %v3387_v51 = vrot.slane %v3355_v25, 4  ;;  %v3388_v41 = vrot.slane %v3324_v32, 4 }
 0x2cd   : > { %3872 = vst [vmem:[%s7480_s10 + $0x148] sm:$0x3] %v3827_v28  ;;  %v3389_v57 = vrot.slane %v3357_v19, 4 }
 0x2ce   : > { %3874 = vst [vmem:[%s7480_s10 + $0x158] sm:$0xff] %v3740_v29  ;;  %v3424_v30 = vsel %vm3406_vm15, %v3387_v51, %v3388_v41  ;;  %v3425_v46 = vsel %vm3406_vm15, %v3386_v63, %v3387_v51  ;;  %v8415_v63 = vmax.f32 %v7637_v22, %v8355_v54 }
 0x2cf   : > { %3875 = vst [vmem:[%s7480_s10 + $0x160] sm:$0x3] %v3828_v17  ;;  %v3422_v35 = vsel %vm3406_vm15, %v3389_v57, %v8414_v11  ;;  %v3423_v58 = vsel %vm3406_vm15, %v3388_v41, %v3389_v57  ;;  %v3483_v2 = vmax.f32 %v7651_v6, %v3425_v46  ;;  %v3484_v26 = vmax.f32 %v3355_v25, %v3424_v30 }
 0x2d0   : > { %3831 = vst [vmem:[%s7480_s10] sm:$0xff] %v3797_v55  ;;  %v2633_v3 = vmax.f32 %v8415_v63, %v7571_v8  ;;  %v3485_v43 = vmax.f32 %v3324_v32, %v3423_v58  ;;  %v3486_v34 = vmax.f32 %v3357_v19, %v3422_v35  ;;  %v8417_v8 = vld [vmem:[#allocation27_spill] sm:$0xff] }
 0x2d1   : > { %3832 = vst [vmem:[%s7480_s10 + $0x8] sm:$0xff] %v3697_v60  ;;  %v3516_v9 = vsel %vm3452_vm12, %v3484_v26, %v3355_v25 }
 0x2d2   : > { %3833 = vst [vmem:[%s7480_s10 + $0x10] sm:$0x3] %v3814_v7  ;;  %v3518_v6 = vsel %vm3454_vm3, %v3486_v34, %v3357_v19  ;;  %v3579_v4 = vmax.f32 %v3483_v2, %v3516_v9  ;;  %v3644_v24 = vadd.f32 %v3516_v9, %v2633_v3 }
 0x2d3   : > { %3882 = vst [vmem:[%s7480_s10 + $0x198] sm:$0xff] %v3797_v55  ;;  %v3581_v45 = vmax.f32 %v3485_v43, %v3518_v6  ;;  %v3646_v33 = vadd.f32 %v3518_v6, %v2635_v5 }
 0x2d4   : > { %3883 = vst [vmem:[%s7480_s10 + $0x1a0] sm:$0xff] %v3697_v60  ;;  %v3643_v54 = vadd.f32 %v3579_v4, %v8417_v8  ;;  %v3718_v22 = vrot.slane %v3644_v24, 7 }
 0x2d5   : > { %3884 = vst [vmem:[%s7480_s10 + $0x1a8] sm:$0x3] %v3814_v7  ;;  %v3645_v15 = vadd.f32 %v3581_v45, %v8418_v0  ;;  %v3721_v18 = vrot.slane %v3646_v33, 7 }
 0x2d6   : > { %v3717_v16 = vrot.slane %v3643_v54, 7  ;;  %v3821_v14 = vsel %vm3696_vm5, %v3718_v22, 0.0 }
 0x2d7   : > { %v3720_v50 = vrot.slane %v3645_v15, 7  ;;  %v3822_v44 = vsel %vm3696_vm5, %v3721_v18, 0.0  ;;  %3854 = vst [vmem:[%s7480_s10 + $0xb8] sm:$0x3] %v3821_v14 }
 0x2d8   : > { %v3719_v13 = vsel %vm3696_vm5, %v3717_v16, %v3718_v22  ;;  %v3804_v40 = vsel %vm3696_vm5, 0.0, %v3717_v16  ;;  %3857 = vst [vmem:[%s7480_s10 + $0xd0] sm:$0x3] %v3822_v44 }
 0x2d9   : > { %v3722_v10 = vsel %vm3696_vm5, %v3720_v50, %v3721_v18  ;;  %v3805_v38 = vsel %vm3696_vm5, 0.0, %v3720_v50  ;;  %3852 = vst [vmem:[%s7480_s10 + $0xa8] sm:$0xff] %v3804_v40 }
 0x2da   : > { %3853 = vst [vmem:[%s7480_s10 + $0xb0] sm:$0xff] %v3719_v13 }
 0x2db   : > { %3855 = vst [vmem:[%s7480_s10 + $0xc0] sm:$0xff] %v3805_v38 }
 0x2dc   : > { %3856 = vst [vmem:[%s7480_s10 + $0xc8] sm:$0xff] %v3722_v10 }
 0x2dd PF: > { %s14_s15 = sadd.s32 1, %s4871_s15  }
 0x2de   : > { %p11_p4 = scmp.ge.s32.totalorder %s14_s15, 4  }
 0x2e0   :  { %13 = sbr.rel (!%p11_p4) target bundleno = 1 (0x1), region = 68 }

</bundles_post_ra>
